<compile_context>
chip_gen: v6e
topology: v6e:2x2x1
jax: 0.10.0
libtpu: 0.0.40
codegen_flags: <defaults>
</compile_context>

<pallas_src>
import jax
import jax.numpy as jnp
from jax import lax
from jax.experimental import pallas as pl
from jax.experimental.pallas import tpu as pltpu

# ---- small, module-consistent shapes ----
B = 2            # batch
S = 8            # sequence length
H = 32           # synthetic BERT hidden size
NH = 2           # attention heads
HD = H // NH     # head dim
FF = 4 * H       # BERT intermediate size
V = 64           # vocab size
LATENT_DIM = 200
OUTPUT_DIM = 200
PAD_DIM = 256    # lane-dense padding of the 200-wide head dims
E_ADD = 16       # dim of the per-id "additional embeddings" dict entries

# per-tower kernel args: ids, mask, word_emb, pos_emb, add_emb, bias_bank, 8 weight matrices
N_PER_TOWER = 6 + 8

# bias-bank row indices (each bias occupies lanes [0:len) of its own row; 14 rows, padded to 16)
(_R_EMB_G, _R_EMB_B, _R_BQKV, _R_BO, _R_LN1_G, _R_LN1_B, _R_B1, _R_B2,
 _R_LN2_G, _R_LN2_B, _R_BP, _R_BF1, _R_BF2, _R_BF3) = range(14)
N_BIAS_ROWS = 16


def _layernorm(x, g, b, eps=1e-12):
    mu = jnp.mean(x, axis=-1, keepdims=True)
    var = jnp.mean((x - mu) ** 2, axis=-1, keepdims=True)
    return (x - mu) * lax.rsqrt(var + eps) * g + b


def _tower(ids_ref, mask_ref, we_ref, pe_ref, bias_ref,
           wqkv_ref, wo_ref, w1_ref, w2_ref, wp_ref, wf1_ref, wf2_ref, wf3_ref):
    """One BertWithCustomHead tower on flattened (B*S, H) activations. Returns (B, PAD_DIM)."""
    # unpack the bias bank (sub-row VMEM loads, all lane-0 aligned)
    emb_g = bias_ref[_R_EMB_G, :H]
    emb_b = bias_ref[_R_EMB_B, :H]
    bqkv  = bias_ref[_R_BQKV, :3 * H]
    bo    = bias_ref[_R_BO, :H]
    ln1_g = bias_ref[_R_LN1_G, :H]
    ln1_b = bias_ref[_R_LN1_B, :H]
    b1    = bias_ref[_R_B1, :FF]
    b2    = bias_ref[_R_B2, :H]
    ln2_g = bias_ref[_R_LN2_G, :H]
    ln2_b = bias_ref[_R_LN2_B, :H]
    bp    = bias_ref[_R_BP, :H]
    bf1   = bias_ref[_R_BF1, :]
    bf2   = bias_ref[_R_BF2, :]
    bf3   = bias_ref[_R_BF3, :]

    # --- token embedding as one-hot matmul (in-kernel gather) + position add + embedding LN ---
    onehot = (ids_ref[...] == lax.broadcasted_iota(jnp.int32, (B * S, V), 1)).astype(jnp.float32)
    x = jnp.dot(onehot, we_ref[...], preferred_element_type=jnp.float32)          # (B*S, H)
    x = x + jnp.concatenate([pe_ref[...]] * B, axis=0)                            # position add
    x = _layernorm(x, emb_g, emb_b)

    # --- self-attention: fused QKV projection, per-(batch, head) 2-D dots ---
    qkv = jnp.dot(x, wqkv_ref[...], preferred_element_type=jnp.float32) + bqkv    # (B*S, 3H)
    neg = (1.0 - mask_ref[...]) * (-1e9)                                          # (B, S)
    scale = HD ** -0.5
    ctx_rows = []
    for b in range(B):
        r0 = b * S
        neg_b = neg[b:b + 1, :]                                                   # (1, S)
        heads = []
        for n in range(NH):
            q = qkv[r0:r0 + S, n * HD:(n + 1) * HD]                               # (S, HD)
            k = qkv[r0:r0 + S, H + n * HD:H + (n + 1) * HD]                       # (S, HD)
            v = qkv[r0:r0 + S, 2 * H + n * HD:2 * H + (n + 1) * HD]               # (S, HD)
            sc = lax.dot_general(q, k, (((1,), (1,)), ((), ())),
                                 preferred_element_type=jnp.float32) * scale      # (S, S)
            p = jax.nn.softmax(sc + neg_b, axis=-1)                               # mask padded keys
            heads.append(jnp.dot(p, v, preferred_element_type=jnp.float32))       # (S, HD)
        ctx_rows.append(jnp.concatenate(heads, axis=-1))                          # (S, H)
    ctx = jnp.concatenate(ctx_rows, axis=0)                                       # (B*S, H)
    attn_out = jnp.dot(ctx, wo_ref[...], preferred_element_type=jnp.float32) + bo
    h = _layernorm(x + attn_out, ln1_g, ln1_b)

    # --- feed-forward (BERT intermediate/output) ---
    f = jax.nn.gelu(jnp.dot(h, w1_ref[...], preferred_element_type=jnp.float32) + b1)
    f = jnp.dot(f, w2_ref[...], preferred_element_type=jnp.float32) + b2
    h2 = _layernorm(h + f, ln2_g, ln2_b)

    # --- BERT pooler: tanh(dense(CLS token)) ---
    cls = jnp.concatenate([h2[b * S:b * S + 1, :] for b in range(B)], axis=0)     # (B, H)
    pooled = jnp.tanh(jnp.dot(cls, wp_ref[...], preferred_element_type=jnp.float32) + bp)

    # --- custom head: (Linear -> ReLU) x3, 200 padded to 256 lanes (pad lanes stay exactly 0) ---
    z = jnp.maximum(jnp.dot(pooled, wf1_ref[...], preferred_element_type=jnp.float32) + bf1, 0.0)
    z = jnp.maximum(jnp.dot(z, wf2_ref[...], preferred_element_type=jnp.float32) + bf2, 0.0)
    z = jnp.maximum(jnp.dot(z, wf3_ref[...], preferred_element_type=jnp.float32) + bf3, 0.0)
    return z                                                                      # (B, PAD_DIM)


def fused_kernel(*refs):
    # TODO(synk): on v7x the two tower sub-bodies could be split across the 2 TensorCores via a
    # parallel grid/core_map over the tower axis; kept single-body so the score stays in one launch.
    out_ref = refs[-1]
    u = refs[:N_PER_TOWER]
    it = refs[N_PER_TOWER:2 * N_PER_TOWER]

    # per-tower arg layout: ids, mask, we, pe, add_emb, bias_bank, 8 weights
    u_repr = _tower(u[0], u[1], u[2], u[3], u[5], *u[6:])
    i_repr = _tower(it[0], it[1], it[2], it[3], it[5], *it[6:])

    # score = sum(concat(repr, add) * concat(repr, add)); padded repr lanes are zero.
    score = jnp.sum(u_repr * i_repr, axis=1, keepdims=True)
    score = score + jnp.sum(u[4][...] * it[4][...], axis=1, keepdims=True)
    out_ref[...] = score                                                          # (B, 1)


def run_two_tower(user_args, item_args):
    args = (*user_args, *item_args)
    vmem = pl.BlockSpec(memory_space=pltpu.MemorySpace.VMEM)
    out = pl.pallas_call(
        fused_kernel,
        out_shape=jax.ShapeDtypeStruct((B, 1), jnp.float32),
        in_specs=[vmem] * len(args),
        out_specs=vmem,
    )(*args)
    return out[:, 0]


def init_tower(key):
    """Deterministic synthetic parameters for one BertWithCustomHead tower."""
    ks = iter(jax.random.split(key, 16))

    def w(shape):
        return jax.random.normal(next(ks), shape, jnp.float32) * 0.02

    word_emb = w((V, H))
    pos_emb = w((S, H))
    wqkv = jnp.concatenate([w((H, H)), w((H, H)), w((H, H))], axis=1)             # fused Q/K/V
    wo = w((H, H))
    w1 = w((H, FF))
    w2 = w((FF, H))
    wp = w((H, H))
    pad_l = PAD_DIM - LATENT_DIM
    pad_o = PAD_DIM - OUTPUT_DIM
    wf1 = jnp.pad(w((H, LATENT_DIM)), ((0, 0), (0, pad_l)))
    wf2 = jnp.pad(w((LATENT_DIM, LATENT_DIM)), ((0, pad_l), (0, pad_l)))
    wf3 = jnp.pad(w((LATENT_DIM, OUTPUT_DIM)), ((0, pad_l), (0, pad_o)))

    def row(v):
        return jnp.pad(v, (0, PAD_DIM - v.shape[0]))

    ones_h = jnp.ones((H,), jnp.float32)
    zeros_h = jnp.zeros((H,), jnp.float32)
    bias_rows = [
        row(ones_h), row(zeros_h),                          # embedding LN gamma / beta
        row(jnp.zeros((3 * H,), jnp.float32)),              # fused QKV bias
        row(zeros_h),                                       # attn output bias
        row(ones_h), row(zeros_h),                          # LN1 gamma / beta
        row(jnp.zeros((FF,), jnp.float32)),                 # FFN b1
        row(zeros_h),                                       # FFN b2
        row(ones_h), row(zeros_h),                          # LN2 gamma / beta
        row(zeros_h),                                       # pooler bias
        jnp.zeros((PAD_DIM,), jnp.float32),                 # head b1 (padded)
        jnp.zeros((PAD_DIM,), jnp.float32),                 # head b2 (padded)
        jnp.zeros((PAD_DIM,), jnp.float32),                 # head b3 (padded)
    ]
    while len(bias_rows) < N_BIAS_ROWS:                     # pad to 16 rows (sublane multiple)
        bias_rows.append(jnp.zeros((PAD_DIM,), jnp.float32))
    bias_bank = jnp.stack(bias_rows)                        # (16, 256) lane-dense bank

    weights = (wqkv, wo, w1, w2, wp, wf1, wf2, wf3)
    return word_emb, pos_emb, bias_bank, weights


def two_tower_forward(user_raw_ids, item_raw_ids,
                      user_input_ids, user_attention_mask,
                      item_input_ids, item_attention_mask,
                      user_tower, item_tower,
                      user_embeddings_dict, item_embeddings_dict,
                      train=True):
    u_we, u_pe, u_bias, u_weights = user_tower
    i_we, i_pe, i_bias, i_weights = item_tower

    if train:
        # TODO(synk): Python-int dict lookup matches the reference module but is not jit-traceable.
        user_add = jnp.stack([user_embeddings_dict[int(rid)] for rid in user_raw_ids])
        item_add = jnp.stack([item_embeddings_dict[int(rid)] for rid in item_raw_ids])
    else:
        # reference skips the concat when train=False; zero add-embeddings give the same score
        user_add = jnp.zeros((B, E_ADD), jnp.float32)
        item_add = jnp.zeros((B, E_ADD), jnp.float32)

    user_args = (user_input_ids.reshape(B * S, 1).astype(jnp.int32),
                 user_attention_mask.astype(jnp.float32),
                 u_we, u_pe, user_add, u_bias, *u_weights)
    item_args = (item_input_ids.reshape(B * S, 1).astype(jnp.int32),
                 item_attention_mask.astype(jnp.float32),
                 i_we, i_pe, item_add, i_bias, *i_weights)
    return run_two_tower(user_args, item_args)


if __name__ == "__main__":
    root = jax.random.PRNGKey(0)
    k_user, k_item, k_dicts, k_data = jax.random.split(root, 4)

    user_tower = init_tower(k_user)
    item_tower = init_tower(k_item)

    # per-id additional embeddings dicts (the user/item_embeddings_dict of the module)
    kd = jax.random.split(k_dicts, 8)
    user_embeddings_dict = {i: jax.random.normal(kd[i], (E_ADD,), jnp.float32) for i in range(4)}
    item_embeddings_dict = {i: jax.random.normal(kd[4 + i], (E_ADD,), jnp.float32) for i in range(4)}

    kd1, kd2 = jax.random.split(k_data)
    user_input_ids = jax.random.randint(kd1, (B, S), 0, V, jnp.int32)
    item_input_ids = jax.random.randint(kd2, (B, S), 0, V, jnp.int32)
    user_attention_mask = jnp.ones((B, S), jnp.int32).at[1, 6:].set(0)   # pad tail of row 1
    item_attention_mask = jnp.ones((B, S), jnp.int32)
    user_raw_ids = [0, 1]
    item_raw_ids = [2, 3]

    score = two_tower_forward(user_raw_ids, item_raw_ids,
                              user_input_ids, user_attention_mask,
                              item_input_ids, item_attention_mask,
                              user_tower, item_tower,
                              user_embeddings_dict, item_embeddings_dict,
                              train=True)
    score = jax.block_until_ready(score)
    assert score.shape == (B,)
    print("KERNEL_OK")
</pallas_src>

<mosaic_0001>
module attributes {stable_mosaic.version = 11 : i64} {
  func.func @fused_kernel(%arg0: memref<16x1xi32, #tpu.memory_space<vmem>>, %arg1: memref<2x8xf32, #tpu.memory_space<vmem>>, %arg2: memref<64x32xf32, #tpu.memory_space<vmem>>, %arg3: memref<8x32xf32, #tpu.memory_space<vmem>>, %arg4: memref<2x16xf32, #tpu.memory_space<vmem>>, %arg5: memref<16x256xf32, #tpu.memory_space<vmem>>, %arg6: memref<32x96xf32, #tpu.memory_space<vmem>>, %arg7: memref<32x32xf32, #tpu.memory_space<vmem>>, %arg8: memref<32x128xf32, #tpu.memory_space<vmem>>, %arg9: memref<128x32xf32, #tpu.memory_space<vmem>>, %arg10: memref<32x32xf32, #tpu.memory_space<vmem>>, %arg11: memref<32x256xf32, #tpu.memory_space<vmem>>, %arg12: memref<256x256xf32, #tpu.memory_space<vmem>>, %arg13: memref<256x256xf32, #tpu.memory_space<vmem>>, %arg14: memref<16x1xi32, #tpu.memory_space<vmem>>, %arg15: memref<2x8xf32, #tpu.memory_space<vmem>>, %arg16: memref<64x32xf32, #tpu.memory_space<vmem>>, %arg17: memref<8x32xf32, #tpu.memory_space<vmem>>, %arg18: memref<2x16xf32, #tpu.memory_space<vmem>>, %arg19: memref<16x256xf32, #tpu.memory_space<vmem>>, %arg20: memref<32x96xf32, #tpu.memory_space<vmem>>, %arg21: memref<32x32xf32, #tpu.memory_space<vmem>>, %arg22: memref<32x128xf32, #tpu.memory_space<vmem>>, %arg23: memref<128x32xf32, #tpu.memory_space<vmem>>, %arg24: memref<32x32xf32, #tpu.memory_space<vmem>>, %arg25: memref<32x256xf32, #tpu.memory_space<vmem>>, %arg26: memref<256x256xf32, #tpu.memory_space<vmem>>, %arg27: memref<256x256xf32, #tpu.memory_space<vmem>>, %arg28: memref<2x1xf32, #tpu.memory_space<vmem>>) attributes {dimension_semantics = [], scalar_prefetch = 0 : i64, scratch_operands = 0 : i64, tpu.core_type = #tpu.core_type<tc>} {
    %c0 = arith.constant 0 : index
    %c0_0 = arith.constant 0 : index
    %0 = vector.load %arg5[%c0, %c0_0] : memref<16x256xf32, #tpu.memory_space<vmem>>, vector<1x32xf32>
    %1 = vector.shape_cast %0 : vector<1x32xf32> to vector<32xf32>
    %c1 = arith.constant 1 : index
    %c0_1 = arith.constant 0 : index
    %2 = vector.load %arg5[%c1, %c0_1] : memref<16x256xf32, #tpu.memory_space<vmem>>, vector<1x32xf32>
    %3 = vector.shape_cast %2 : vector<1x32xf32> to vector<32xf32>
    %c2 = arith.constant 2 : index
    %c0_2 = arith.constant 0 : index
    %4 = vector.load %arg5[%c2, %c0_2] : memref<16x256xf32, #tpu.memory_space<vmem>>, vector<1x96xf32>
    %5 = vector.shape_cast %4 : vector<1x96xf32> to vector<96xf32>
    %c3 = arith.constant 3 : index
    %c0_3 = arith.constant 0 : index
    %6 = vector.load %arg5[%c3, %c0_3] : memref<16x256xf32, #tpu.memory_space<vmem>>, vector<1x32xf32>
    %7 = vector.shape_cast %6 : vector<1x32xf32> to vector<32xf32>
    %c4 = arith.constant 4 : index
    %c0_4 = arith.constant 0 : index
    %8 = vector.load %arg5[%c4, %c0_4] : memref<16x256xf32, #tpu.memory_space<vmem>>, vector<1x32xf32>
    %9 = vector.shape_cast %8 : vector<1x32xf32> to vector<32xf32>
    %c5 = arith.constant 5 : index
    %c0_5 = arith.constant 0 : index
    %10 = vector.load %arg5[%c5, %c0_5] : memref<16x256xf32, #tpu.memory_space<vmem>>, vector<1x32xf32>
    %11 = vector.shape_cast %10 : vector<1x32xf32> to vector<32xf32>
    %c6 = arith.constant 6 : index
    %c0_6 = arith.constant 0 : index
    %12 = vector.load %arg5[%c6, %c0_6] : memref<16x256xf32, #tpu.memory_space<vmem>>, vector<1x128xf32>
    %13 = vector.shape_cast %12 : vector<1x128xf32> to vector<128xf32>
    %c7 = arith.constant 7 : index
    %c0_7 = arith.constant 0 : index
    %14 = vector.load %arg5[%c7, %c0_7] : memref<16x256xf32, #tpu.memory_space<vmem>>, vector<1x32xf32>
    %15 = vector.shape_cast %14 : vector<1x32xf32> to vector<32xf32>
    %c8 = arith.constant 8 : index
    %c0_8 = arith.constant 0 : index
    %16 = vector.load %arg5[%c8, %c0_8] : memref<16x256xf32, #tpu.memory_space<vmem>>, vector<1x32xf32>
    %17 = vector.shape_cast %16 : vector<1x32xf32> to vector<32xf32>
    %c9 = arith.constant 9 : index
    %c0_9 = arith.constant 0 : index
    %18 = vector.load %arg5[%c9, %c0_9] : memref<16x256xf32, #tpu.memory_space<vmem>>, vector<1x32xf32>
    %19 = vector.shape_cast %18 : vector<1x32xf32> to vector<32xf32>
    %c10 = arith.constant 10 : index
    %c0_10 = arith.constant 0 : index
    %20 = vector.load %arg5[%c10, %c0_10] : memref<16x256xf32, #tpu.memory_space<vmem>>, vector<1x32xf32>
    %21 = vector.shape_cast %20 : vector<1x32xf32> to vector<32xf32>
    %c11 = arith.constant 11 : index
    %c0_11 = arith.constant 0 : index
    %22 = vector.load %arg5[%c11, %c0_11] : memref<16x256xf32, #tpu.memory_space<vmem>>, vector<1x256xf32>
    %23 = vector.shape_cast %22 : vector<1x256xf32> to vector<256xf32>
    %c12 = arith.constant 12 : index
    %c0_12 = arith.constant 0 : index
    %24 = vector.load %arg5[%c12, %c0_12] : memref<16x256xf32, #tpu.memory_space<vmem>>, vector<1x256xf32>
    %25 = vector.shape_cast %24 : vector<1x256xf32> to vector<256xf32>
    %c13 = arith.constant 13 : index
    %c0_13 = arith.constant 0 : index
    %26 = vector.load %arg5[%c13, %c0_13] : memref<16x256xf32, #tpu.memory_space<vmem>>, vector<1x256xf32>
    %27 = vector.shape_cast %26 : vector<1x256xf32> to vector<256xf32>
    %c0_14 = arith.constant 0 : index
    %c0_15 = arith.constant 0 : index
    %28 = vector.load %arg0[%c0_14, %c0_15] : memref<16x1xi32, #tpu.memory_space<vmem>>, vector<16x1xi32>
    %29 = tpu.iota {dimensions = array<i32: 1>} : vector<16x64xi32>
    %30 = vector.broadcast %28 : vector<16x1xi32> to vector<16x64xi32>
    %31 = arith.cmpi eq, %30, %29 : vector<16x64xi32>
    %32 = arith.extui %31 : vector<16x64xi1> to vector<16x64xi32>
    %33 = arith.sitofp %32 : vector<16x64xi32> to vector<16x64xf32>
    %c0_16 = arith.constant 0 : index
    %c0_17 = arith.constant 0 : index
    %34 = vector.load %arg2[%c0_16, %c0_17] : memref<64x32xf32, #tpu.memory_space<vmem>>, vector<64x32xf32>
    %cst = arith.constant dense<0.000000e+00> : vector<16x32xf32>
    %35 = tpu.matmul %33, %34, %cst {dimension_numbers = #tpu.dot_dimension_numbers<[1], [0], [0], [1], [0, 0, 1, 1], [], []>} : vector<16x64xf32>, vector<64x32xf32>, vector<16x32xf32> -> vector<16x32xf32>
    %c0_18 = arith.constant 0 : index
    %c0_19 = arith.constant 0 : index
    %36 = vector.load %arg3[%c0_18, %c0_19] : memref<8x32xf32, #tpu.memory_space<vmem>>, vector<8x32xf32>
    %37 = tpu.concatenate %36, %36 in 0 : vector<8x32xf32>, vector<8x32xf32> -> vector<16x32xf32>
    %38 = arith.addf %35, %37 : vector<16x32xf32>
    %cst_20 = arith.constant dense<0.000000e+00> : vector<16xf32>
    %39 = vector.multi_reduction <add>, %38, %cst_20 [1] : vector<16x32xf32> to vector<16xf32>
    %40 = vector.shape_cast %39 : vector<16xf32> to vector<16x1xf32>
    %cst_21 = arith.constant 3.200000e+01 : f32
    %41 = vector.broadcast %cst_21 : f32 to vector<16x1xf32>
    %42 = arith.divf %40, %41 : vector<16x1xf32>
    %43 = vector.broadcast %42 : vector<16x1xf32> to vector<16x32xf32>
    %44 = arith.subf %38, %43 : vector<16x32xf32>
    %45 = arith.mulf %44, %44 : vector<16x32xf32>
    %cst_22 = arith.constant dense<0.000000e+00> : vector<16xf32>
    %46 = vector.multi_reduction <add>, %45, %cst_22 [1] : vector<16x32xf32> to vector<16xf32>
    %47 = vector.shape_cast %46 : vector<16xf32> to vector<16x1xf32>
    %cst_23 = arith.constant 3.200000e+01 : f32
    %48 = vector.broadcast %cst_23 : f32 to vector<16x1xf32>
    %49 = arith.divf %47, %48 : vector<16x1xf32>
    %50 = vector.broadcast %42 : vector<16x1xf32> to vector<16x32xf32>
    %51 = arith.subf %38, %50 : vector<16x32xf32>
    %cst_24 = arith.constant 9.99999996E-13 : f32
    %52 = vector.broadcast %cst_24 : f32 to vector<16x1xf32>
    %53 = arith.addf %49, %52 : vector<16x1xf32>
    %54 = math.rsqrt %53 : vector<16x1xf32>
    %55 = vector.broadcast %54 : vector<16x1xf32> to vector<16x32xf32>
    %56 = arith.mulf %51, %55 : vector<16x32xf32>
    %57 = vector.shape_cast %1 : vector<32xf32> to vector<1x32xf32>
    %58 = vector.broadcast %57 : vector<1x32xf32> to vector<16x32xf32>
    %59 = arith.mulf %56, %58 : vector<16x32xf32>
    %60 = vector.shape_cast %3 : vector<32xf32> to vector<1x32xf32>
    %61 = vector.broadcast %60 : vector<1x32xf32> to vector<16x32xf32>
    %62 = arith.addf %59, %61 : vector<16x32xf32>
    %c0_25 = arith.constant 0 : index
    %c0_26 = arith.constant 0 : index
    %63 = vector.load %arg6[%c0_25, %c0_26] : memref<32x96xf32, #tpu.memory_space<vmem>>, vector<32x96xf32>
    %cst_27 = arith.constant dense<0.000000e+00> : vector<16x96xf32>
    %64 = tpu.matmul %62, %63, %cst_27 {dimension_numbers = #tpu.dot_dimension_numbers<[1], [0], [0], [1], [0, 0, 1, 1], [], []>} : vector<16x32xf32>, vector<32x96xf32>, vector<16x96xf32> -> vector<16x96xf32>
    %65 = vector.shape_cast %5 : vector<96xf32> to vector<1x96xf32>
    %66 = vector.broadcast %65 : vector<1x96xf32> to vector<16x96xf32>
    %67 = arith.addf %64, %66 : vector<16x96xf32>
    %c0_28 = arith.constant 0 : index
    %c0_29 = arith.constant 0 : index
    %68 = vector.load %arg1[%c0_28, %c0_29] : memref<2x8xf32, #tpu.memory_space<vmem>>, vector<2x8xf32>
    %cst_30 = arith.constant 1.000000e+00 : f32
    %69 = vector.broadcast %cst_30 : f32 to vector<2x8xf32>
    %70 = arith.subf %69, %68 : vector<2x8xf32>
    %cst_31 = arith.constant -1.000000e+09 : f32
    %71 = vector.broadcast %cst_31 : f32 to vector<2x8xf32>
    %72 = arith.mulf %70, %71 : vector<2x8xf32>
    %73 = vector.extract_strided_slice %72 {offsets = [0, 0], sizes = [1, 8], strides = [1, 1]} : vector<2x8xf32> to vector<1x8xf32>
    %74 = vector.extract_strided_slice %67 {offsets = [0, 0], sizes = [8, 16], strides = [1, 1]} : vector<16x96xf32> to vector<8x16xf32>
    %75 = vector.extract_strided_slice %67 {offsets = [0, 32], sizes = [8, 16], strides = [1, 1]} : vector<16x96xf32> to vector<8x16xf32>
    %76 = vector.extract_strided_slice %67 {offsets = [0, 64], sizes = [8, 16], strides = [1, 1]} : vector<16x96xf32> to vector<8x16xf32>
    %cst_32 = arith.constant dense<0.000000e+00> : vector<8x8xf32>
    %77 = tpu.matmul %74, %75, %cst_32 {dimension_numbers = #tpu.dot_dimension_numbers<[1], [1], [0], [0], [0, 0, 1, 0], [], []>} : vector<8x16xf32>, vector<8x16xf32>, vector<8x8xf32> -> vector<8x8xf32>
    %cst_33 = arith.constant 2.500000e-01 : f32
    %78 = vector.broadcast %cst_33 : f32 to vector<8x8xf32>
    %79 = arith.mulf %77, %78 : vector<8x8xf32>
    %80 = vector.broadcast %73 : vector<1x8xf32> to vector<8x8xf32>
    %81 = arith.addf %79, %80 : vector<8x8xf32>
    %cst_34 = arith.constant dense<0xFF800000> : vector<8xf32>
    %82 = vector.multi_reduction <maximumf>, %81, %cst_34 [1] : vector<8x8xf32> to vector<8xf32>
    %cst_35 = arith.constant 0xFF800000 : f32
    %83 = vector.broadcast %cst_35 : f32 to vector<8xf32>
    %84 = arith.maximumf %83, %82 : vector<8xf32>
    %85 = vector.shape_cast %84 : vector<8xf32> to vector<8x1xf32>
    %86 = vector.broadcast %85 : vector<8x1xf32> to vector<8x8xf32>
    %87 = arith.subf %81, %86 : vector<8x8xf32>
    %88 = math.exp %87 : vector<8x8xf32>
    %cst_36 = arith.constant dense<0.000000e+00> : vector<8xf32>
    %89 = vector.multi_reduction <add>, %88, %cst_36 [1] : vector<8x8xf32> to vector<8xf32>
    %90 = vector.shape_cast %89 : vector<8xf32> to vector<8x1xf32>
    %91 = vector.broadcast %90 : vector<8x1xf32> to vector<8x8xf32>
    %92 = arith.divf %88, %91 : vector<8x8xf32>
    %cst_37 = arith.constant dense<0.000000e+00> : vector<8x16xf32>
    %93 = tpu.matmul %92, %76, %cst_37 {dimension_numbers = #tpu.dot_dimension_numbers<[1], [0], [0], [1], [0, 0, 1, 1], [], []>} : vector<8x8xf32>, vector<8x16xf32>, vector<8x16xf32> -> vector<8x16xf32>
    %94 = vector.extract_strided_slice %67 {offsets = [0, 16], sizes = [8, 16], strides = [1, 1]} : vector<16x96xf32> to vector<8x16xf32>
    %95 = vector.extract_strided_slice %67 {offsets = [0, 48], sizes = [8, 16], strides = [1, 1]} : vector<16x96xf32> to vector<8x16xf32>
    %96 = vector.extract_strided_slice %67 {offsets = [0, 80], sizes = [8, 16], strides = [1, 1]} : vector<16x96xf32> to vector<8x16xf32>
    %cst_38 = arith.constant dense<0.000000e+00> : vector<8x8xf32>
    %97 = tpu.matmul %94, %95, %cst_38 {dimension_numbers = #tpu.dot_dimension_numbers<[1], [1], [0], [0], [0, 0, 1, 0], [], []>} : vector<8x16xf32>, vector<8x16xf32>, vector<8x8xf32> -> vector<8x8xf32>
    %cst_39 = arith.constant 2.500000e-01 : f32
    %98 = vector.broadcast %cst_39 : f32 to vector<8x8xf32>
    %99 = arith.mulf %97, %98 : vector<8x8xf32>
    %100 = vector.broadcast %73 : vector<1x8xf32> to vector<8x8xf32>
    %101 = arith.addf %99, %100 : vector<8x8xf32>
    %cst_40 = arith.constant dense<0xFF800000> : vector<8xf32>
    %102 = vector.multi_reduction <maximumf>, %101, %cst_40 [1] : vector<8x8xf32> to vector<8xf32>
    %cst_41 = arith.constant 0xFF800000 : f32
    %103 = vector.broadcast %cst_41 : f32 to vector<8xf32>
    %104 = arith.maximumf %103, %102 : vector<8xf32>
    %105 = vector.shape_cast %104 : vector<8xf32> to vector<8x1xf32>
    %106 = vector.broadcast %105 : vector<8x1xf32> to vector<8x8xf32>
    %107 = arith.subf %101, %106 : vector<8x8xf32>
    %108 = math.exp %107 : vector<8x8xf32>
    %cst_42 = arith.constant dense<0.000000e+00> : vector<8xf32>
    %109 = vector.multi_reduction <add>, %108, %cst_42 [1] : vector<8x8xf32> to vector<8xf32>
    %110 = vector.shape_cast %109 : vector<8xf32> to vector<8x1xf32>
    %111 = vector.broadcast %110 : vector<8x1xf32> to vector<8x8xf32>
    %112 = arith.divf %108, %111 : vector<8x8xf32>
    %cst_43 = arith.constant dense<0.000000e+00> : vector<8x16xf32>
    %113 = tpu.matmul %112, %96, %cst_43 {dimension_numbers = #tpu.dot_dimension_numbers<[1], [0], [0], [1], [0, 0, 1, 1], [], []>} : vector<8x8xf32>, vector<8x16xf32>, vector<8x16xf32> -> vector<8x16xf32>
    %114 = tpu.concatenate %93, %113 in 1 : vector<8x16xf32>, vector<8x16xf32> -> vector<8x32xf32>
    %115 = vector.extract_strided_slice %72 {offsets = [1, 0], sizes = [1, 8], strides = [1, 1]} : vector<2x8xf32> to vector<1x8xf32>
    %116 = vector.extract_strided_slice %67 {offsets = [8, 0], sizes = [8, 16], strides = [1, 1]} : vector<16x96xf32> to vector<8x16xf32>
    %117 = vector.extract_strided_slice %67 {offsets = [8, 32], sizes = [8, 16], strides = [1, 1]} : vector<16x96xf32> to vector<8x16xf32>
    %118 = vector.extract_strided_slice %67 {offsets = [8, 64], sizes = [8, 16], strides = [1, 1]} : vector<16x96xf32> to vector<8x16xf32>
    %cst_44 = arith.constant dense<0.000000e+00> : vector<8x8xf32>
    %119 = tpu.matmul %116, %117, %cst_44 {dimension_numbers = #tpu.dot_dimension_numbers<[1], [1], [0], [0], [0, 0, 1, 0], [], []>} : vector<8x16xf32>, vector<8x16xf32>, vector<8x8xf32> -> vector<8x8xf32>
    %cst_45 = arith.constant 2.500000e-01 : f32
    %120 = vector.broadcast %cst_45 : f32 to vector<8x8xf32>
    %121 = arith.mulf %119, %120 : vector<8x8xf32>
    %122 = vector.broadcast %115 : vector<1x8xf32> to vector<8x8xf32>
    %123 = arith.addf %121, %122 : vector<8x8xf32>
    %cst_46 = arith.constant dense<0xFF800000> : vector<8xf32>
    %124 = vector.multi_reduction <maximumf>, %123, %cst_46 [1] : vector<8x8xf32> to vector<8xf32>
    %cst_47 = arith.constant 0xFF800000 : f32
    %125 = vector.broadcast %cst_47 : f32 to vector<8xf32>
    %126 = arith.maximumf %125, %124 : vector<8xf32>
    %127 = vector.shape_cast %126 : vector<8xf32> to vector<8x1xf32>
    %128 = vector.broadcast %127 : vector<8x1xf32> to vector<8x8xf32>
    %129 = arith.subf %123, %128 : vector<8x8xf32>
    %130 = math.exp %129 : vector<8x8xf32>
    %cst_48 = arith.constant dense<0.000000e+00> : vector<8xf32>
    %131 = vector.multi_reduction <add>, %130, %cst_48 [1] : vector<8x8xf32> to vector<8xf32>
    %132 = vector.shape_cast %131 : vector<8xf32> to vector<8x1xf32>
    %133 = vector.broadcast %132 : vector<8x1xf32> to vector<8x8xf32>
    %134 = arith.divf %130, %133 : vector<8x8xf32>
    %cst_49 = arith.constant dense<0.000000e+00> : vector<8x16xf32>
    %135 = tpu.matmul %134, %118, %cst_49 {dimension_numbers = #tpu.dot_dimension_numbers<[1], [0], [0], [1], [0, 0, 1, 1], [], []>} : vector<8x8xf32>, vector<8x16xf32>, vector<8x16xf32> -> vector<8x16xf32>
    %136 = vector.extract_strided_slice %67 {offsets = [8, 16], sizes = [8, 16], strides = [1, 1]} : vector<16x96xf32> to vector<8x16xf32>
    %137 = vector.extract_strided_slice %67 {offsets = [8, 48], sizes = [8, 16], strides = [1, 1]} : vector<16x96xf32> to vector<8x16xf32>
    %138 = vector.extract_strided_slice %67 {offsets = [8, 80], sizes = [8, 16], strides = [1, 1]} : vector<16x96xf32> to vector<8x16xf32>
    %cst_50 = arith.constant dense<0.000000e+00> : vector<8x8xf32>
    %139 = tpu.matmul %136, %137, %cst_50 {dimension_numbers = #tpu.dot_dimension_numbers<[1], [1], [0], [0], [0, 0, 1, 0], [], []>} : vector<8x16xf32>, vector<8x16xf32>, vector<8x8xf32> -> vector<8x8xf32>
    %cst_51 = arith.constant 2.500000e-01 : f32
    %140 = vector.broadcast %cst_51 : f32 to vector<8x8xf32>
    %141 = arith.mulf %139, %140 : vector<8x8xf32>
    %142 = vector.broadcast %115 : vector<1x8xf32> to vector<8x8xf32>
    %143 = arith.addf %141, %142 : vector<8x8xf32>
    %cst_52 = arith.constant dense<0xFF800000> : vector<8xf32>
    %144 = vector.multi_reduction <maximumf>, %143, %cst_52 [1] : vector<8x8xf32> to vector<8xf32>
    %cst_53 = arith.constant 0xFF800000 : f32
    %145 = vector.broadcast %cst_53 : f32 to vector<8xf32>
    %146 = arith.maximumf %145, %144 : vector<8xf32>
    %147 = vector.shape_cast %146 : vector<8xf32> to vector<8x1xf32>
    %148 = vector.broadcast %147 : vector<8x1xf32> to vector<8x8xf32>
    %149 = arith.subf %143, %148 : vector<8x8xf32>
    %150 = math.exp %149 : vector<8x8xf32>
    %cst_54 = arith.constant dense<0.000000e+00> : vector<8xf32>
    %151 = vector.multi_reduction <add>, %150, %cst_54 [1] : vector<8x8xf32> to vector<8xf32>
    %152 = vector.shape_cast %151 : vector<8xf32> to vector<8x1xf32>
    %153 = vector.broadcast %152 : vector<8x1xf32> to vector<8x8xf32>
    %154 = arith.divf %150, %153 : vector<8x8xf32>
    %cst_55 = arith.constant dense<0.000000e+00> : vector<8x16xf32>
    %155 = tpu.matmul %154, %138, %cst_55 {dimension_numbers = #tpu.dot_dimension_numbers<[1], [0], [0], [1], [0, 0, 1, 1], [], []>} : vector<8x8xf32>, vector<8x16xf32>, vector<8x16xf32> -> vector<8x16xf32>
    %156 = tpu.concatenate %135, %155 in 1 : vector<8x16xf32>, vector<8x16xf32> -> vector<8x32xf32>
    %157 = tpu.concatenate %114, %156 in 0 : vector<8x32xf32>, vector<8x32xf32> -> vector<16x32xf32>
    %c0_56 = arith.constant 0 : index
    %c0_57 = arith.constant 0 : index
    %158 = vector.load %arg7[%c0_56, %c0_57] : memref<32x32xf32, #tpu.memory_space<vmem>>, vector<32x32xf32>
    %cst_58 = arith.constant dense<0.000000e+00> : vector<16x32xf32>
    %159 = tpu.matmul %157, %158, %cst_58 {dimension_numbers = #tpu.dot_dimension_numbers<[1], [0], [0], [1], [0, 0, 1, 1], [], []>} : vector<16x32xf32>, vector<32x32xf32>, vector<16x32xf32> -> vector<16x32xf32>
    %160 = vector.shape_cast %7 : vector<32xf32> to vector<1x32xf32>
    %161 = vector.broadcast %160 : vector<1x32xf32> to vector<16x32xf32>
    %162 = arith.addf %159, %161 : vector<16x32xf32>
    %163 = arith.addf %62, %162 : vector<16x32xf32>
    %cst_59 = arith.constant dense<0.000000e+00> : vector<16xf32>
    %164 = vector.multi_reduction <add>, %163, %cst_59 [1] : vector<16x32xf32> to vector<16xf32>
    %165 = vector.shape_cast %164 : vector<16xf32> to vector<16x1xf32>
    %cst_60 = arith.constant 3.200000e+01 : f32
    %166 = vector.broadcast %cst_60 : f32 to vector<16x1xf32>
    %167 = arith.divf %165, %166 : vector<16x1xf32>
    %168 = vector.broadcast %167 : vector<16x1xf32> to vector<16x32xf32>
    %169 = arith.subf %163, %168 : vector<16x32xf32>
    %170 = arith.mulf %169, %169 : vector<16x32xf32>
    %cst_61 = arith.constant dense<0.000000e+00> : vector<16xf32>
    %171 = vector.multi_reduction <add>, %170, %cst_61 [1] : vector<16x32xf32> to vector<16xf32>
    %172 = vector.shape_cast %171 : vector<16xf32> to vector<16x1xf32>
    %cst_62 = arith.constant 3.200000e+01 : f32
    %173 = vector.broadcast %cst_62 : f32 to vector<16x1xf32>
    %174 = arith.divf %172, %173 : vector<16x1xf32>
    %175 = vector.broadcast %167 : vector<16x1xf32> to vector<16x32xf32>
    %176 = arith.subf %163, %175 : vector<16x32xf32>
    %cst_63 = arith.constant 9.99999996E-13 : f32
    %177 = vector.broadcast %cst_63 : f32 to vector<16x1xf32>
    %178 = arith.addf %174, %177 : vector<16x1xf32>
    %179 = math.rsqrt %178 : vector<16x1xf32>
    %180 = vector.broadcast %179 : vector<16x1xf32> to vector<16x32xf32>
    %181 = arith.mulf %176, %180 : vector<16x32xf32>
    %182 = vector.shape_cast %9 : vector<32xf32> to vector<1x32xf32>
    %183 = vector.broadcast %182 : vector<1x32xf32> to vector<16x32xf32>
    %184 = arith.mulf %181, %183 : vector<16x32xf32>
    %185 = vector.shape_cast %11 : vector<32xf32> to vector<1x32xf32>
    %186 = vector.broadcast %185 : vector<1x32xf32> to vector<16x32xf32>
    %187 = arith.addf %184, %186 : vector<16x32xf32>
    %c0_64 = arith.constant 0 : index
    %c0_65 = arith.constant 0 : index
    %188 = vector.load %arg8[%c0_64, %c0_65] : memref<32x128xf32, #tpu.memory_space<vmem>>, vector<32x128xf32>
    %cst_66 = arith.constant dense<0.000000e+00> : vector<16x128xf32>
    %189 = tpu.matmul %187, %188, %cst_66 {dimension_numbers = #tpu.dot_dimension_numbers<[1], [0], [0], [1], [0, 0, 1, 1], [], []>} : vector<16x32xf32>, vector<32x128xf32>, vector<16x128xf32> -> vector<16x128xf32>
    %190 = vector.shape_cast %13 : vector<128xf32> to vector<1x128xf32>
    %191 = vector.broadcast %190 : vector<1x128xf32> to vector<16x128xf32>
    %192 = arith.addf %189, %191 : vector<16x128xf32>
    %193 = arith.mulf %192, %192 : vector<16x128xf32>
    %194 = arith.mulf %192, %193 : vector<16x128xf32>
    %cst_67 = arith.constant 4.471500e-02 : f32
    %195 = vector.broadcast %cst_67 : f32 to vector<16x128xf32>
    %196 = arith.mulf %195, %194 : vector<16x128xf32>
    %197 = arith.addf %192, %196 : vector<16x128xf32>
    %cst_68 = arith.constant 0.797884583 : f32
    %198 = vector.broadcast %cst_68 : f32 to vector<16x128xf32>
    %199 = arith.mulf %198, %197 : vector<16x128xf32>
    %200 = math.tanh %199 : vector<16x128xf32>
    %cst_69 = arith.constant 1.000000e+00 : f32
    %201 = vector.broadcast %cst_69 : f32 to vector<16x128xf32>
    %202 = arith.addf %201, %200 : vector<16x128xf32>
    %cst_70 = arith.constant 5.000000e-01 : f32
    %203 = vector.broadcast %cst_70 : f32 to vector<16x128xf32>
    %204 = arith.mulf %203, %202 : vector<16x128xf32>
    %205 = arith.mulf %192, %204 : vector<16x128xf32>
    %c0_71 = arith.constant 0 : index
    %c0_72 = arith.constant 0 : index
    %206 = vector.load %arg9[%c0_71, %c0_72] : memref<128x32xf32, #tpu.memory_space<vmem>>, vector<128x32xf32>
    %cst_73 = arith.constant dense<0.000000e+00> : vector<16x32xf32>
    %207 = tpu.matmul %205, %206, %cst_73 {dimension_numbers = #tpu.dot_dimension_numbers<[1], [0], [0], [1], [0, 0, 1, 1], [], []>} : vector<16x128xf32>, vector<128x32xf32>, vector<16x32xf32> -> vector<16x32xf32>
    %208 = vector.shape_cast %15 : vector<32xf32> to vector<1x32xf32>
    %209 = vector.broadcast %208 : vector<1x32xf32> to vector<16x32xf32>
    %210 = arith.addf %207, %209 : vector<16x32xf32>
    %211 = arith.addf %187, %210 : vector<16x32xf32>
    %cst_74 = arith.constant dense<0.000000e+00> : vector<16xf32>
    %212 = vector.multi_reduction <add>, %211, %cst_74 [1] : vector<16x32xf32> to vector<16xf32>
    %213 = vector.shape_cast %212 : vector<16xf32> to vector<16x1xf32>
    %cst_75 = arith.constant 3.200000e+01 : f32
    %214 = vector.broadcast %cst_75 : f32 to vector<16x1xf32>
    %215 = arith.divf %213, %214 : vector<16x1xf32>
    %216 = vector.broadcast %215 : vector<16x1xf32> to vector<16x32xf32>
    %217 = arith.subf %211, %216 : vector<16x32xf32>
    %218 = arith.mulf %217, %217 : vector<16x32xf32>
    %cst_76 = arith.constant dense<0.000000e+00> : vector<16xf32>
    %219 = vector.multi_reduction <add>, %218, %cst_76 [1] : vector<16x32xf32> to vector<16xf32>
    %220 = vector.shape_cast %219 : vector<16xf32> to vector<16x1xf32>
    %cst_77 = arith.constant 3.200000e+01 : f32
    %221 = vector.broadcast %cst_77 : f32 to vector<16x1xf32>
    %222 = arith.divf %220, %221 : vector<16x1xf32>
    %223 = vector.broadcast %215 : vector<16x1xf32> to vector<16x32xf32>
    %224 = arith.subf %211, %223 : vector<16x32xf32>
    %cst_78 = arith.constant 9.99999996E-13 : f32
    %225 = vector.broadcast %cst_78 : f32 to vector<16x1xf32>
    %226 = arith.addf %222, %225 : vector<16x1xf32>
    %227 = math.rsqrt %226 : vector<16x1xf32>
    %228 = vector.broadcast %227 : vector<16x1xf32> to vector<16x32xf32>
    %229 = arith.mulf %224, %228 : vector<16x32xf32>
    %230 = vector.shape_cast %17 : vector<32xf32> to vector<1x32xf32>
    %231 = vector.broadcast %230 : vector<1x32xf32> to vector<16x32xf32>
    %232 = arith.mulf %229, %231 : vector<16x32xf32>
    %233 = vector.shape_cast %19 : vector<32xf32> to vector<1x32xf32>
    %234 = vector.broadcast %233 : vector<1x32xf32> to vector<16x32xf32>
    %235 = arith.addf %232, %234 : vector<16x32xf32>
    %236 = vector.extract_strided_slice %235 {offsets = [0, 0], sizes = [1, 32], strides = [1, 1]} : vector<16x32xf32> to vector<1x32xf32>
    %237 = vector.extract_strided_slice %235 {offsets = [8, 0], sizes = [1, 32], strides = [1, 1]} : vector<16x32xf32> to vector<1x32xf32>
    %238 = tpu.concatenate %236, %237 in 0 : vector<1x32xf32>, vector<1x32xf32> -> vector<2x32xf32>
    %c0_79 = arith.constant 0 : index
    %c0_80 = arith.constant 0 : index
    %239 = vector.load %arg10[%c0_79, %c0_80] : memref<32x32xf32, #tpu.memory_space<vmem>>, vector<32x32xf32>
    %cst_81 = arith.constant dense<0.000000e+00> : vector<2x32xf32>
    %240 = tpu.matmul %238, %239, %cst_81 {dimension_numbers = #tpu.dot_dimension_numbers<[1], [0], [0], [1], [0, 0, 1, 1], [], []>} : vector<2x32xf32>, vector<32x32xf32>, vector<2x32xf32> -> vector<2x32xf32>
    %241 = vector.shape_cast %21 : vector<32xf32> to vector<1x32xf32>
    %242 = vector.broadcast %241 : vector<1x32xf32> to vector<2x32xf32>
    %243 = arith.addf %240, %242 : vector<2x32xf32>
    %244 = math.tanh %243 : vector<2x32xf32>
    %c0_82 = arith.constant 0 : index
    %c0_83 = arith.constant 0 : index
    %245 = vector.load %arg11[%c0_82, %c0_83] : memref<32x256xf32, #tpu.memory_space<vmem>>, vector<32x256xf32>
    %cst_84 = arith.constant dense<0.000000e+00> : vector<2x256xf32>
    %246 = tpu.matmul %244, %245, %cst_84 {dimension_numbers = #tpu.dot_dimension_numbers<[1], [0], [0], [1], [0, 0, 1, 1], [], []>} : vector<2x32xf32>, vector<32x256xf32>, vector<2x256xf32> -> vector<2x256xf32>
    %247 = vector.shape_cast %23 : vector<256xf32> to vector<1x256xf32>
    %248 = vector.broadcast %247 : vector<1x256xf32> to vector<2x256xf32>
    %249 = arith.addf %246, %248 : vector<2x256xf32>
    %cst_85 = arith.constant 0.000000e+00 : f32
    %250 = vector.broadcast %cst_85 : f32 to vector<2x256xf32>
    %251 = arith.maximumf %249, %250 : vector<2x256xf32>
    %c0_86 = arith.constant 0 : index
    %c0_87 = arith.constant 0 : index
    %252 = vector.load %arg12[%c0_86, %c0_87] : memref<256x256xf32, #tpu.memory_space<vmem>>, vector<256x256xf32>
    %cst_88 = arith.constant dense<0.000000e+00> : vector<2x256xf32>
    %253 = tpu.matmul %251, %252, %cst_88 {dimension_numbers = #tpu.dot_dimension_numbers<[1], [0], [0], [1], [0, 0, 1, 1], [], []>} : vector<2x256xf32>, vector<256x256xf32>, vector<2x256xf32> -> vector<2x256xf32>
    %254 = vector.shape_cast %25 : vector<256xf32> to vector<1x256xf32>
    %255 = vector.broadcast %254 : vector<1x256xf32> to vector<2x256xf32>
    %256 = arith.addf %253, %255 : vector<2x256xf32>
    %cst_89 = arith.constant 0.000000e+00 : f32
    %257 = vector.broadcast %cst_89 : f32 to vector<2x256xf32>
    %258 = arith.maximumf %256, %257 : vector<2x256xf32>
    %c0_90 = arith.constant 0 : index
    %c0_91 = arith.constant 0 : index
    %259 = vector.load %arg13[%c0_90, %c0_91] : memref<256x256xf32, #tpu.memory_space<vmem>>, vector<256x256xf32>
    %cst_92 = arith.constant dense<0.000000e+00> : vector<2x256xf32>
    %260 = tpu.matmul %258, %259, %cst_92 {dimension_numbers = #tpu.dot_dimension_numbers<[1], [0], [0], [1], [0, 0, 1, 1], [], []>} : vector<2x256xf32>, vector<256x256xf32>, vector<2x256xf32> -> vector<2x256xf32>
    %261 = vector.shape_cast %27 : vector<256xf32> to vector<1x256xf32>
    %262 = vector.broadcast %261 : vector<1x256xf32> to vector<2x256xf32>
    %263 = arith.addf %260, %262 : vector<2x256xf32>
    %cst_93 = arith.constant 0.000000e+00 : f32
    %264 = vector.broadcast %cst_93 : f32 to vector<2x256xf32>
    %265 = arith.maximumf %263, %264 : vector<2x256xf32>
    %c0_94 = arith.constant 0 : index
    %c0_95 = arith.constant 0 : index
    %266 = vector.load %arg19[%c0_94, %c0_95] : memref<16x256xf32, #tpu.memory_space<vmem>>, vector<1x32xf32>
    %267 = vector.shape_cast %266 : vector<1x32xf32> to vector<32xf32>
    %c1_96 = arith.constant 1 : index
    %c0_97 = arith.constant 0 : index
    %268 = vector.load %arg19[%c1_96, %c0_97] : memref<16x256xf32, #tpu.memory_space<vmem>>, vector<1x32xf32>
    %269 = vector.shape_cast %268 : vector<1x32xf32> to vector<32xf32>
    %c2_98 = arith.constant 2 : index
    %c0_99 = arith.constant 0 : index
    %270 = vector.load %arg19[%c2_98, %c0_99] : memref<16x256xf32, #tpu.memory_space<vmem>>, vector<1x96xf32>
    %271 = vector.shape_cast %270 : vector<1x96xf32> to vector<96xf32>
    %c3_100 = arith.constant 3 : index
    %c0_101 = arith.constant 0 : index
    %272 = vector.load %arg19[%c3_100, %c0_101] : memref<16x256xf32, #tpu.memory_space<vmem>>, vector<1x32xf32>
    %273 = vector.shape_cast %272 : vector<1x32xf32> to vector<32xf32>
    %c4_102 = arith.constant 4 : index
    %c0_103 = arith.constant 0 : index
    %274 = vector.load %arg19[%c4_102, %c0_103] : memref<16x256xf32, #tpu.memory_space<vmem>>, vector<1x32xf32>
    %275 = vector.shape_cast %274 : vector<1x32xf32> to vector<32xf32>
    %c5_104 = arith.constant 5 : index
    %c0_105 = arith.constant 0 : index
    %276 = vector.load %arg19[%c5_104, %c0_105] : memref<16x256xf32, #tpu.memory_space<vmem>>, vector<1x32xf32>
    %277 = vector.shape_cast %276 : vector<1x32xf32> to vector<32xf32>
    %c6_106 = arith.constant 6 : index
    %c0_107 = arith.constant 0 : index
    %278 = vector.load %arg19[%c6_106, %c0_107] : memref<16x256xf32, #tpu.memory_space<vmem>>, vector<1x128xf32>
    %279 = vector.shape_cast %278 : vector<1x128xf32> to vector<128xf32>
    %c7_108 = arith.constant 7 : index
    %c0_109 = arith.constant 0 : index
    %280 = vector.load %arg19[%c7_108, %c0_109] : memref<16x256xf32, #tpu.memory_space<vmem>>, vector<1x32xf32>
    %281 = vector.shape_cast %280 : vector<1x32xf32> to vector<32xf32>
    %c8_110 = arith.constant 8 : index
    %c0_111 = arith.constant 0 : index
    %282 = vector.load %arg19[%c8_110, %c0_111] : memref<16x256xf32, #tpu.memory_space<vmem>>, vector<1x32xf32>
    %283 = vector.shape_cast %282 : vector<1x32xf32> to vector<32xf32>
    %c9_112 = arith.constant 9 : index
    %c0_113 = arith.constant 0 : index
    %284 = vector.load %arg19[%c9_112, %c0_113] : memref<16x256xf32, #tpu.memory_space<vmem>>, vector<1x32xf32>
    %285 = vector.shape_cast %284 : vector<1x32xf32> to vector<32xf32>
    %c10_114 = arith.constant 10 : index
    %c0_115 = arith.constant 0 : index
    %286 = vector.load %arg19[%c10_114, %c0_115] : memref<16x256xf32, #tpu.memory_space<vmem>>, vector<1x32xf32>
    %287 = vector.shape_cast %286 : vector<1x32xf32> to vector<32xf32>
    %c11_116 = arith.constant 11 : index
    %c0_117 = arith.constant 0 : index
    %288 = vector.load %arg19[%c11_116, %c0_117] : memref<16x256xf32, #tpu.memory_space<vmem>>, vector<1x256xf32>
    %289 = vector.shape_cast %288 : vector<1x256xf32> to vector<256xf32>
    %c12_118 = arith.constant 12 : index
    %c0_119 = arith.constant 0 : index
    %290 = vector.load %arg19[%c12_118, %c0_119] : memref<16x256xf32, #tpu.memory_space<vmem>>, vector<1x256xf32>
    %291 = vector.shape_cast %290 : vector<1x256xf32> to vector<256xf32>
    %c13_120 = arith.constant 13 : index
    %c0_121 = arith.constant 0 : index
    %292 = vector.load %arg19[%c13_120, %c0_121] : memref<16x256xf32, #tpu.memory_space<vmem>>, vector<1x256xf32>
    %293 = vector.shape_cast %292 : vector<1x256xf32> to vector<256xf32>
    %c0_122 = arith.constant 0 : index
    %c0_123 = arith.constant 0 : index
    %294 = vector.load %arg14[%c0_122, %c0_123] : memref<16x1xi32, #tpu.memory_space<vmem>>, vector<16x1xi32>
    %295 = tpu.iota {dimensions = array<i32: 1>} : vector<16x64xi32>
    %296 = vector.broadcast %294 : vector<16x1xi32> to vector<16x64xi32>
    %297 = arith.cmpi eq, %296, %295 : vector<16x64xi32>
    %298 = arith.extui %297 : vector<16x64xi1> to vector<16x64xi32>
    %299 = arith.sitofp %298 : vector<16x64xi32> to vector<16x64xf32>
    %c0_124 = arith.constant 0 : index
    %c0_125 = arith.constant 0 : index
    %300 = vector.load %arg16[%c0_124, %c0_125] : memref<64x32xf32, #tpu.memory_space<vmem>>, vector<64x32xf32>
    %cst_126 = arith.constant dense<0.000000e+00> : vector<16x32xf32>
    %301 = tpu.matmul %299, %300, %cst_126 {dimension_numbers = #tpu.dot_dimension_numbers<[1], [0], [0], [1], [0, 0, 1, 1], [], []>} : vector<16x64xf32>, vector<64x32xf32>, vector<16x32xf32> -> vector<16x32xf32>
    %c0_127 = arith.constant 0 : index
    %c0_128 = arith.constant 0 : index
    %302 = vector.load %arg17[%c0_127, %c0_128] : memref<8x32xf32, #tpu.memory_space<vmem>>, vector<8x32xf32>
    %303 = tpu.concatenate %302, %302 in 0 : vector<8x32xf32>, vector<8x32xf32> -> vector<16x32xf32>
    %304 = arith.addf %301, %303 : vector<16x32xf32>
    %cst_129 = arith.constant dense<0.000000e+00> : vector<16xf32>
    %305 = vector.multi_reduction <add>, %304, %cst_129 [1] : vector<16x32xf32> to vector<16xf32>
    %306 = vector.shape_cast %305 : vector<16xf32> to vector<16x1xf32>
    %cst_130 = arith.constant 3.200000e+01 : f32
    %307 = vector.broadcast %cst_130 : f32 to vector<16x1xf32>
    %308 = arith.divf %306, %307 : vector<16x1xf32>
    %309 = vector.broadcast %308 : vector<16x1xf32> to vector<16x32xf32>
    %310 = arith.subf %304, %309 : vector<16x32xf32>
    %311 = arith.mulf %310, %310 : vector<16x32xf32>
    %cst_131 = arith.constant dense<0.000000e+00> : vector<16xf32>
    %312 = vector.multi_reduction <add>, %311, %cst_131 [1] : vector<16x32xf32> to vector<16xf32>
    %313 = vector.shape_cast %312 : vector<16xf32> to vector<16x1xf32>
    %cst_132 = arith.constant 3.200000e+01 : f32
    %314 = vector.broadcast %cst_132 : f32 to vector<16x1xf32>
    %315 = arith.divf %313, %314 : vector<16x1xf32>
    %316 = vector.broadcast %308 : vector<16x1xf32> to vector<16x32xf32>
    %317 = arith.subf %304, %316 : vector<16x32xf32>
    %cst_133 = arith.constant 9.99999996E-13 : f32
    %318 = vector.broadcast %cst_133 : f32 to vector<16x1xf32>
    %319 = arith.addf %315, %318 : vector<16x1xf32>
    %320 = math.rsqrt %319 : vector<16x1xf32>
    %321 = vector.broadcast %320 : vector<16x1xf32> to vector<16x32xf32>
    %322 = arith.mulf %317, %321 : vector<16x32xf32>
    %323 = vector.shape_cast %267 : vector<32xf32> to vector<1x32xf32>
    %324 = vector.broadcast %323 : vector<1x32xf32> to vector<16x32xf32>
    %325 = arith.mulf %322, %324 : vector<16x32xf32>
    %326 = vector.shape_cast %269 : vector<32xf32> to vector<1x32xf32>
    %327 = vector.broadcast %326 : vector<1x32xf32> to vector<16x32xf32>
    %328 = arith.addf %325, %327 : vector<16x32xf32>
    %c0_134 = arith.constant 0 : index
    %c0_135 = arith.constant 0 : index
    %329 = vector.load %arg20[%c0_134, %c0_135] : memref<32x96xf32, #tpu.memory_space<vmem>>, vector<32x96xf32>
    %cst_136 = arith.constant dense<0.000000e+00> : vector<16x96xf32>
    %330 = tpu.matmul %328, %329, %cst_136 {dimension_numbers = #tpu.dot_dimension_numbers<[1], [0], [0], [1], [0, 0, 1, 1], [], []>} : vector<16x32xf32>, vector<32x96xf32>, vector<16x96xf32> -> vector<16x96xf32>
    %331 = vector.shape_cast %271 : vector<96xf32> to vector<1x96xf32>
    %332 = vector.broadcast %331 : vector<1x96xf32> to vector<16x96xf32>
    %333 = arith.addf %330, %332 : vector<16x96xf32>
    %c0_137 = arith.constant 0 : index
    %c0_138 = arith.constant 0 : index
    %334 = vector.load %arg15[%c0_137, %c0_138] : memref<2x8xf32, #tpu.memory_space<vmem>>, vector<2x8xf32>
    %cst_139 = arith.constant 1.000000e+00 : f32
    %335 = vector.broadcast %cst_139 : f32 to vector<2x8xf32>
    %336 = arith.subf %335, %334 : vector<2x8xf32>
    %cst_140 = arith.constant -1.000000e+09 : f32
    %337 = vector.broadcast %cst_140 : f32 to vector<2x8xf32>
    %338 = arith.mulf %336, %337 : vector<2x8xf32>
    %339 = vector.extract_strided_slice %338 {offsets = [0, 0], sizes = [1, 8], strides = [1, 1]} : vector<2x8xf32> to vector<1x8xf32>
    %340 = vector.extract_strided_slice %333 {offsets = [0, 0], sizes = [8, 16], strides = [1, 1]} : vector<16x96xf32> to vector<8x16xf32>
    %341 = vector.extract_strided_slice %333 {offsets = [0, 32], sizes = [8, 16], strides = [1, 1]} : vector<16x96xf32> to vector<8x16xf32>
    %342 = vector.extract_strided_slice %333 {offsets = [0, 64], sizes = [8, 16], strides = [1, 1]} : vector<16x96xf32> to vector<8x16xf32>
    %cst_141 = arith.constant dense<0.000000e+00> : vector<8x8xf32>
    %343 = tpu.matmul %340, %341, %cst_141 {dimension_numbers = #tpu.dot_dimension_numbers<[1], [1], [0], [0], [0, 0, 1, 0], [], []>} : vector<8x16xf32>, vector<8x16xf32>, vector<8x8xf32> -> vector<8x8xf32>
    %cst_142 = arith.constant 2.500000e-01 : f32
    %344 = vector.broadcast %cst_142 : f32 to vector<8x8xf32>
    %345 = arith.mulf %343, %344 : vector<8x8xf32>
    %346 = vector.broadcast %339 : vector<1x8xf32> to vector<8x8xf32>
    %347 = arith.addf %345, %346 : vector<8x8xf32>
    %cst_143 = arith.constant dense<0xFF800000> : vector<8xf32>
    %348 = vector.multi_reduction <maximumf>, %347, %cst_143 [1] : vector<8x8xf32> to vector<8xf32>
    %cst_144 = arith.constant 0xFF800000 : f32
    %349 = vector.broadcast %cst_144 : f32 to vector<8xf32>
    %350 = arith.maximumf %349, %348 : vector<8xf32>
    %351 = vector.shape_cast %350 : vector<8xf32> to vector<8x1xf32>
    %352 = vector.broadcast %351 : vector<8x1xf32> to vector<8x8xf32>
    %353 = arith.subf %347, %352 : vector<8x8xf32>
    %354 = math.exp %353 : vector<8x8xf32>
    %cst_145 = arith.constant dense<0.000000e+00> : vector<8xf32>
    %355 = vector.multi_reduction <add>, %354, %cst_145 [1] : vector<8x8xf32> to vector<8xf32>
    %356 = vector.shape_cast %355 : vector<8xf32> to vector<8x1xf32>
    %357 = vector.broadcast %356 : vector<8x1xf32> to vector<8x8xf32>
    %358 = arith.divf %354, %357 : vector<8x8xf32>
    %cst_146 = arith.constant dense<0.000000e+00> : vector<8x16xf32>
    %359 = tpu.matmul %358, %342, %cst_146 {dimension_numbers = #tpu.dot_dimension_numbers<[1], [0], [0], [1], [0, 0, 1, 1], [], []>} : vector<8x8xf32>, vector<8x16xf32>, vector<8x16xf32> -> vector<8x16xf32>
    %360 = vector.extract_strided_slice %333 {offsets = [0, 16], sizes = [8, 16], strides = [1, 1]} : vector<16x96xf32> to vector<8x16xf32>
    %361 = vector.extract_strided_slice %333 {offsets = [0, 48], sizes = [8, 16], strides = [1, 1]} : vector<16x96xf32> to vector<8x16xf32>
    %362 = vector.extract_strided_slice %333 {offsets = [0, 80], sizes = [8, 16], strides = [1, 1]} : vector<16x96xf32> to vector<8x16xf32>
    %cst_147 = arith.constant dense<0.000000e+00> : vector<8x8xf32>
    %363 = tpu.matmul %360, %361, %cst_147 {dimension_numbers = #tpu.dot_dimension_numbers<[1], [1], [0], [0], [0, 0, 1, 0], [], []>} : vector<8x16xf32>, vector<8x16xf32>, vector<8x8xf32> -> vector<8x8xf32>
    %cst_148 = arith.constant 2.500000e-01 : f32
    %364 = vector.broadcast %cst_148 : f32 to vector<8x8xf32>
    %365 = arith.mulf %363, %364 : vector<8x8xf32>
    %366 = vector.broadcast %339 : vector<1x8xf32> to vector<8x8xf32>
    %367 = arith.addf %365, %366 : vector<8x8xf32>
    %cst_149 = arith.constant dense<0xFF800000> : vector<8xf32>
    %368 = vector.multi_reduction <maximumf>, %367, %cst_149 [1] : vector<8x8xf32> to vector<8xf32>
    %cst_150 = arith.constant 0xFF800000 : f32
    %369 = vector.broadcast %cst_150 : f32 to vector<8xf32>
    %370 = arith.maximumf %369, %368 : vector<8xf32>
    %371 = vector.shape_cast %370 : vector<8xf32> to vector<8x1xf32>
    %372 = vector.broadcast %371 : vector<8x1xf32> to vector<8x8xf32>
    %373 = arith.subf %367, %372 : vector<8x8xf32>
    %374 = math.exp %373 : vector<8x8xf32>
    %cst_151 = arith.constant dense<0.000000e+00> : vector<8xf32>
    %375 = vector.multi_reduction <add>, %374, %cst_151 [1] : vector<8x8xf32> to vector<8xf32>
    %376 = vector.shape_cast %375 : vector<8xf32> to vector<8x1xf32>
    %377 = vector.broadcast %376 : vector<8x1xf32> to vector<8x8xf32>
    %378 = arith.divf %374, %377 : vector<8x8xf32>
    %cst_152 = arith.constant dense<0.000000e+00> : vector<8x16xf32>
    %379 = tpu.matmul %378, %362, %cst_152 {dimension_numbers = #tpu.dot_dimension_numbers<[1], [0], [0], [1], [0, 0, 1, 1], [], []>} : vector<8x8xf32>, vector<8x16xf32>, vector<8x16xf32> -> vector<8x16xf32>
    %380 = tpu.concatenate %359, %379 in 1 : vector<8x16xf32>, vector<8x16xf32> -> vector<8x32xf32>
    %381 = vector.extract_strided_slice %338 {offsets = [1, 0], sizes = [1, 8], strides = [1, 1]} : vector<2x8xf32> to vector<1x8xf32>
    %382 = vector.extract_strided_slice %333 {offsets = [8, 0], sizes = [8, 16], strides = [1, 1]} : vector<16x96xf32> to vector<8x16xf32>
    %383 = vector.extract_strided_slice %333 {offsets = [8, 32], sizes = [8, 16], strides = [1, 1]} : vector<16x96xf32> to vector<8x16xf32>
    %384 = vector.extract_strided_slice %333 {offsets = [8, 64], sizes = [8, 16], strides = [1, 1]} : vector<16x96xf32> to vector<8x16xf32>
    %cst_153 = arith.constant dense<0.000000e+00> : vector<8x8xf32>
    %385 = tpu.matmul %382, %383, %cst_153 {dimension_numbers = #tpu.dot_dimension_numbers<[1], [1], [0], [0], [0, 0, 1, 0], [], []>} : vector<8x16xf32>, vector<8x16xf32>, vector<8x8xf32> -> vector<8x8xf32>
    %cst_154 = arith.constant 2.500000e-01 : f32
    %386 = vector.broadcast %cst_154 : f32 to vector<8x8xf32>
    %387 = arith.mulf %385, %386 : vector<8x8xf32>
    %388 = vector.broadcast %381 : vector<1x8xf32> to vector<8x8xf32>
    %389 = arith.addf %387, %388 : vector<8x8xf32>
    %cst_155 = arith.constant dense<0xFF800000> : vector<8xf32>
    %390 = vector.multi_reduction <maximumf>, %389, %cst_155 [1] : vector<8x8xf32> to vector<8xf32>
    %cst_156 = arith.constant 0xFF800000 : f32
    %391 = vector.broadcast %cst_156 : f32 to vector<8xf32>
    %392 = arith.maximumf %391, %390 : vector<8xf32>
    %393 = vector.shape_cast %392 : vector<8xf32> to vector<8x1xf32>
    %394 = vector.broadcast %393 : vector<8x1xf32> to vector<8x8xf32>
    %395 = arith.subf %389, %394 : vector<8x8xf32>
    %396 = math.exp %395 : vector<8x8xf32>
    %cst_157 = arith.constant dense<0.000000e+00> : vector<8xf32>
    %397 = vector.multi_reduction <add>, %396, %cst_157 [1] : vector<8x8xf32> to vector<8xf32>
    %398 = vector.shape_cast %397 : vector<8xf32> to vector<8x1xf32>
    %399 = vector.broadcast %398 : vector<8x1xf32> to vector<8x8xf32>
    %400 = arith.divf %396, %399 : vector<8x8xf32>
    %cst_158 = arith.constant dense<0.000000e+00> : vector<8x16xf32>
    %401 = tpu.matmul %400, %384, %cst_158 {dimension_numbers = #tpu.dot_dimension_numbers<[1], [0], [0], [1], [0, 0, 1, 1], [], []>} : vector<8x8xf32>, vector<8x16xf32>, vector<8x16xf32> -> vector<8x16xf32>
    %402 = vector.extract_strided_slice %333 {offsets = [8, 16], sizes = [8, 16], strides = [1, 1]} : vector<16x96xf32> to vector<8x16xf32>
    %403 = vector.extract_strided_slice %333 {offsets = [8, 48], sizes = [8, 16], strides = [1, 1]} : vector<16x96xf32> to vector<8x16xf32>
    %404 = vector.extract_strided_slice %333 {offsets = [8, 80], sizes = [8, 16], strides = [1, 1]} : vector<16x96xf32> to vector<8x16xf32>
    %cst_159 = arith.constant dense<0.000000e+00> : vector<8x8xf32>
    %405 = tpu.matmul %402, %403, %cst_159 {dimension_numbers = #tpu.dot_dimension_numbers<[1], [1], [0], [0], [0, 0, 1, 0], [], []>} : vector<8x16xf32>, vector<8x16xf32>, vector<8x8xf32> -> vector<8x8xf32>
    %cst_160 = arith.constant 2.500000e-01 : f32
    %406 = vector.broadcast %cst_160 : f32 to vector<8x8xf32>
    %407 = arith.mulf %405, %406 : vector<8x8xf32>
    %408 = vector.broadcast %381 : vector<1x8xf32> to vector<8x8xf32>
    %409 = arith.addf %407, %408 : vector<8x8xf32>
    %cst_161 = arith.constant dense<0xFF800000> : vector<8xf32>
    %410 = vector.multi_reduction <maximumf>, %409, %cst_161 [1] : vector<8x8xf32> to vector<8xf32>
    %cst_162 = arith.constant 0xFF800000 : f32
    %411 = vector.broadcast %cst_162 : f32 to vector<8xf32>
    %412 = arith.maximumf %411, %410 : vector<8xf32>
    %413 = vector.shape_cast %412 : vector<8xf32> to vector<8x1xf32>
    %414 = vector.broadcast %413 : vector<8x1xf32> to vector<8x8xf32>
    %415 = arith.subf %409, %414 : vector<8x8xf32>
    %416 = math.exp %415 : vector<8x8xf32>
    %cst_163 = arith.constant dense<0.000000e+00> : vector<8xf32>
    %417 = vector.multi_reduction <add>, %416, %cst_163 [1] : vector<8x8xf32> to vector<8xf32>
    %418 = vector.shape_cast %417 : vector<8xf32> to vector<8x1xf32>
    %419 = vector.broadcast %418 : vector<8x1xf32> to vector<8x8xf32>
    %420 = arith.divf %416, %419 : vector<8x8xf32>
    %cst_164 = arith.constant dense<0.000000e+00> : vector<8x16xf32>
    %421 = tpu.matmul %420, %404, %cst_164 {dimension_numbers = #tpu.dot_dimension_numbers<[1], [0], [0], [1], [0, 0, 1, 1], [], []>} : vector<8x8xf32>, vector<8x16xf32>, vector<8x16xf32> -> vector<8x16xf32>
    %422 = tpu.concatenate %401, %421 in 1 : vector<8x16xf32>, vector<8x16xf32> -> vector<8x32xf32>
    %423 = tpu.concatenate %380, %422 in 0 : vector<8x32xf32>, vector<8x32xf32> -> vector<16x32xf32>
    %c0_165 = arith.constant 0 : index
    %c0_166 = arith.constant 0 : index
    %424 = vector.load %arg21[%c0_165, %c0_166] : memref<32x32xf32, #tpu.memory_space<vmem>>, vector<32x32xf32>
    %cst_167 = arith.constant dense<0.000000e+00> : vector<16x32xf32>
    %425 = tpu.matmul %423, %424, %cst_167 {dimension_numbers = #tpu.dot_dimension_numbers<[1], [0], [0], [1], [0, 0, 1, 1], [], []>} : vector<16x32xf32>, vector<32x32xf32>, vector<16x32xf32> -> vector<16x32xf32>
    %426 = vector.shape_cast %273 : vector<32xf32> to vector<1x32xf32>
    %427 = vector.broadcast %426 : vector<1x32xf32> to vector<16x32xf32>
    %428 = arith.addf %425, %427 : vector<16x32xf32>
    %429 = arith.addf %328, %428 : vector<16x32xf32>
    %cst_168 = arith.constant dense<0.000000e+00> : vector<16xf32>
    %430 = vector.multi_reduction <add>, %429, %cst_168 [1] : vector<16x32xf32> to vector<16xf32>
    %431 = vector.shape_cast %430 : vector<16xf32> to vector<16x1xf32>
    %cst_169 = arith.constant 3.200000e+01 : f32
    %432 = vector.broadcast %cst_169 : f32 to vector<16x1xf32>
    %433 = arith.divf %431, %432 : vector<16x1xf32>
    %434 = vector.broadcast %433 : vector<16x1xf32> to vector<16x32xf32>
    %435 = arith.subf %429, %434 : vector<16x32xf32>
    %436 = arith.mulf %435, %435 : vector<16x32xf32>
    %cst_170 = arith.constant dense<0.000000e+00> : vector<16xf32>
    %437 = vector.multi_reduction <add>, %436, %cst_170 [1] : vector<16x32xf32> to vector<16xf32>
    %438 = vector.shape_cast %437 : vector<16xf32> to vector<16x1xf32>
    %cst_171 = arith.constant 3.200000e+01 : f32
    %439 = vector.broadcast %cst_171 : f32 to vector<16x1xf32>
    %440 = arith.divf %438, %439 : vector<16x1xf32>
    %441 = vector.broadcast %433 : vector<16x1xf32> to vector<16x32xf32>
    %442 = arith.subf %429, %441 : vector<16x32xf32>
    %cst_172 = arith.constant 9.99999996E-13 : f32
    %443 = vector.broadcast %cst_172 : f32 to vector<16x1xf32>
    %444 = arith.addf %440, %443 : vector<16x1xf32>
    %445 = math.rsqrt %444 : vector<16x1xf32>
    %446 = vector.broadcast %445 : vector<16x1xf32> to vector<16x32xf32>
    %447 = arith.mulf %442, %446 : vector<16x32xf32>
    %448 = vector.shape_cast %275 : vector<32xf32> to vector<1x32xf32>
    %449 = vector.broadcast %448 : vector<1x32xf32> to vector<16x32xf32>
    %450 = arith.mulf %447, %449 : vector<16x32xf32>
    %451 = vector.shape_cast %277 : vector<32xf32> to vector<1x32xf32>
    %452 = vector.broadcast %451 : vector<1x32xf32> to vector<16x32xf32>
    %453 = arith.addf %450, %452 : vector<16x32xf32>
    %c0_173 = arith.constant 0 : index
    %c0_174 = arith.constant 0 : index
    %454 = vector.load %arg22[%c0_173, %c0_174] : memref<32x128xf32, #tpu.memory_space<vmem>>, vector<32x128xf32>
    %cst_175 = arith.constant dense<0.000000e+00> : vector<16x128xf32>
    %455 = tpu.matmul %453, %454, %cst_175 {dimension_numbers = #tpu.dot_dimension_numbers<[1], [0], [0], [1], [0, 0, 1, 1], [], []>} : vector<16x32xf32>, vector<32x128xf32>, vector<16x128xf32> -> vector<16x128xf32>
    %456 = vector.shape_cast %279 : vector<128xf32> to vector<1x128xf32>
    %457 = vector.broadcast %456 : vector<1x128xf32> to vector<16x128xf32>
    %458 = arith.addf %455, %457 : vector<16x128xf32>
    %459 = arith.mulf %458, %458 : vector<16x128xf32>
    %460 = arith.mulf %458, %459 : vector<16x128xf32>
    %cst_176 = arith.constant 4.471500e-02 : f32
    %461 = vector.broadcast %cst_176 : f32 to vector<16x128xf32>
    %462 = arith.mulf %461, %460 : vector<16x128xf32>
    %463 = arith.addf %458, %462 : vector<16x128xf32>
    %cst_177 = arith.constant 0.797884583 : f32
    %464 = vector.broadcast %cst_177 : f32 to vector<16x128xf32>
    %465 = arith.mulf %464, %463 : vector<16x128xf32>
    %466 = math.tanh %465 : vector<16x128xf32>
    %cst_178 = arith.constant 1.000000e+00 : f32
    %467 = vector.broadcast %cst_178 : f32 to vector<16x128xf32>
    %468 = arith.addf %467, %466 : vector<16x128xf32>
    %cst_179 = arith.constant 5.000000e-01 : f32
    %469 = vector.broadcast %cst_179 : f32 to vector<16x128xf32>
    %470 = arith.mulf %469, %468 : vector<16x128xf32>
    %471 = arith.mulf %458, %470 : vector<16x128xf32>
    %c0_180 = arith.constant 0 : index
    %c0_181 = arith.constant 0 : index
    %472 = vector.load %arg23[%c0_180, %c0_181] : memref<128x32xf32, #tpu.memory_space<vmem>>, vector<128x32xf32>
    %cst_182 = arith.constant dense<0.000000e+00> : vector<16x32xf32>
    %473 = tpu.matmul %471, %472, %cst_182 {dimension_numbers = #tpu.dot_dimension_numbers<[1], [0], [0], [1], [0, 0, 1, 1], [], []>} : vector<16x128xf32>, vector<128x32xf32>, vector<16x32xf32> -> vector<16x32xf32>
    %474 = vector.shape_cast %281 : vector<32xf32> to vector<1x32xf32>
    %475 = vector.broadcast %474 : vector<1x32xf32> to vector<16x32xf32>
    %476 = arith.addf %473, %475 : vector<16x32xf32>
    %477 = arith.addf %453, %476 : vector<16x32xf32>
    %cst_183 = arith.constant dense<0.000000e+00> : vector<16xf32>
    %478 = vector.multi_reduction <add>, %477, %cst_183 [1] : vector<16x32xf32> to vector<16xf32>
    %479 = vector.shape_cast %478 : vector<16xf32> to vector<16x1xf32>
    %cst_184 = arith.constant 3.200000e+01 : f32
    %480 = vector.broadcast %cst_184 : f32 to vector<16x1xf32>
    %481 = arith.divf %479, %480 : vector<16x1xf32>
    %482 = vector.broadcast %481 : vector<16x1xf32> to vector<16x32xf32>
    %483 = arith.subf %477, %482 : vector<16x32xf32>
    %484 = arith.mulf %483, %483 : vector<16x32xf32>
    %cst_185 = arith.constant dense<0.000000e+00> : vector<16xf32>
    %485 = vector.multi_reduction <add>, %484, %cst_185 [1] : vector<16x32xf32> to vector<16xf32>
    %486 = vector.shape_cast %485 : vector<16xf32> to vector<16x1xf32>
    %cst_186 = arith.constant 3.200000e+01 : f32
    %487 = vector.broadcast %cst_186 : f32 to vector<16x1xf32>
    %488 = arith.divf %486, %487 : vector<16x1xf32>
    %489 = vector.broadcast %481 : vector<16x1xf32> to vector<16x32xf32>
    %490 = arith.subf %477, %489 : vector<16x32xf32>
    %cst_187 = arith.constant 9.99999996E-13 : f32
    %491 = vector.broadcast %cst_187 : f32 to vector<16x1xf32>
    %492 = arith.addf %488, %491 : vector<16x1xf32>
    %493 = math.rsqrt %492 : vector<16x1xf32>
    %494 = vector.broadcast %493 : vector<16x1xf32> to vector<16x32xf32>
    %495 = arith.mulf %490, %494 : vector<16x32xf32>
    %496 = vector.shape_cast %283 : vector<32xf32> to vector<1x32xf32>
    %497 = vector.broadcast %496 : vector<1x32xf32> to vector<16x32xf32>
    %498 = arith.mulf %495, %497 : vector<16x32xf32>
    %499 = vector.shape_cast %285 : vector<32xf32> to vector<1x32xf32>
    %500 = vector.broadcast %499 : vector<1x32xf32> to vector<16x32xf32>
    %501 = arith.addf %498, %500 : vector<16x32xf32>
    %502 = vector.extract_strided_slice %501 {offsets = [0, 0], sizes = [1, 32], strides = [1, 1]} : vector<16x32xf32> to vector<1x32xf32>
    %503 = vector.extract_strided_slice %501 {offsets = [8, 0], sizes = [1, 32], strides = [1, 1]} : vector<16x32xf32> to vector<1x32xf32>
    %504 = tpu.concatenate %502, %503 in 0 : vector<1x32xf32>, vector<1x32xf32> -> vector<2x32xf32>
    %c0_188 = arith.constant 0 : index
    %c0_189 = arith.constant 0 : index
    %505 = vector.load %arg24[%c0_188, %c0_189] : memref<32x32xf32, #tpu.memory_space<vmem>>, vector<32x32xf32>
    %cst_190 = arith.constant dense<0.000000e+00> : vector<2x32xf32>
    %506 = tpu.matmul %504, %505, %cst_190 {dimension_numbers = #tpu.dot_dimension_numbers<[1], [0], [0], [1], [0, 0, 1, 1], [], []>} : vector<2x32xf32>, vector<32x32xf32>, vector<2x32xf32> -> vector<2x32xf32>
    %507 = vector.shape_cast %287 : vector<32xf32> to vector<1x32xf32>
    %508 = vector.broadcast %507 : vector<1x32xf32> to vector<2x32xf32>
    %509 = arith.addf %506, %508 : vector<2x32xf32>
    %510 = math.tanh %509 : vector<2x32xf32>
    %c0_191 = arith.constant 0 : index
    %c0_192 = arith.constant 0 : index
    %511 = vector.load %arg25[%c0_191, %c0_192] : memref<32x256xf32, #tpu.memory_space<vmem>>, vector<32x256xf32>
    %cst_193 = arith.constant dense<0.000000e+00> : vector<2x256xf32>
    %512 = tpu.matmul %510, %511, %cst_193 {dimension_numbers = #tpu.dot_dimension_numbers<[1], [0], [0], [1], [0, 0, 1, 1], [], []>} : vector<2x32xf32>, vector<32x256xf32>, vector<2x256xf32> -> vector<2x256xf32>
    %513 = vector.shape_cast %289 : vector<256xf32> to vector<1x256xf32>
    %514 = vector.broadcast %513 : vector<1x256xf32> to vector<2x256xf32>
    %515 = arith.addf %512, %514 : vector<2x256xf32>
    %cst_194 = arith.constant 0.000000e+00 : f32
    %516 = vector.broadcast %cst_194 : f32 to vector<2x256xf32>
    %517 = arith.maximumf %515, %516 : vector<2x256xf32>
    %c0_195 = arith.constant 0 : index
    %c0_196 = arith.constant 0 : index
    %518 = vector.load %arg26[%c0_195, %c0_196] : memref<256x256xf32, #tpu.memory_space<vmem>>, vector<256x256xf32>
    %cst_197 = arith.constant dense<0.000000e+00> : vector<2x256xf32>
    %519 = tpu.matmul %517, %518, %cst_197 {dimension_numbers = #tpu.dot_dimension_numbers<[1], [0], [0], [1], [0, 0, 1, 1], [], []>} : vector<2x256xf32>, vector<256x256xf32>, vector<2x256xf32> -> vector<2x256xf32>
    %520 = vector.shape_cast %291 : vector<256xf32> to vector<1x256xf32>
    %521 = vector.broadcast %520 : vector<1x256xf32> to vector<2x256xf32>
    %522 = arith.addf %519, %521 : vector<2x256xf32>
    %cst_198 = arith.constant 0.000000e+00 : f32
    %523 = vector.broadcast %cst_198 : f32 to vector<2x256xf32>
    %524 = arith.maximumf %522, %523 : vector<2x256xf32>
    %c0_199 = arith.constant 0 : index
    %c0_200 = arith.constant 0 : index
    %525 = vector.load %arg27[%c0_199, %c0_200] : memref<256x256xf32, #tpu.memory_space<vmem>>, vector<256x256xf32>
    %cst_201 = arith.constant dense<0.000000e+00> : vector<2x256xf32>
    %526 = tpu.matmul %524, %525, %cst_201 {dimension_numbers = #tpu.dot_dimension_numbers<[1], [0], [0], [1], [0, 0, 1, 1], [], []>} : vector<2x256xf32>, vector<256x256xf32>, vector<2x256xf32> -> vector<2x256xf32>
    %527 = vector.shape_cast %293 : vector<256xf32> to vector<1x256xf32>
    %528 = vector.broadcast %527 : vector<1x256xf32> to vector<2x256xf32>
    %529 = arith.addf %526, %528 : vector<2x256xf32>
    %cst_202 = arith.constant 0.000000e+00 : f32
    %530 = vector.broadcast %cst_202 : f32 to vector<2x256xf32>
    %531 = arith.maximumf %529, %530 : vector<2x256xf32>
    %532 = arith.mulf %265, %531 : vector<2x256xf32>
    %cst_203 = arith.constant dense<0.000000e+00> : vector<2xf32>
    %533 = vector.multi_reduction <add>, %532, %cst_203 [1] : vector<2x256xf32> to vector<2xf32>
    %534 = vector.shape_cast %533 : vector<2xf32> to vector<2x1xf32>
    %c0_204 = arith.constant 0 : index
    %c0_205 = arith.constant 0 : index
    %535 = vector.load %arg4[%c0_204, %c0_205] : memref<2x16xf32, #tpu.memory_space<vmem>>, vector<2x16xf32>
    %c0_206 = arith.constant 0 : index
    %c0_207 = arith.constant 0 : index
    %536 = vector.load %arg18[%c0_206, %c0_207] : memref<2x16xf32, #tpu.memory_space<vmem>>, vector<2x16xf32>
    %537 = arith.mulf %535, %536 : vector<2x16xf32>
    %cst_208 = arith.constant dense<0.000000e+00> : vector<2xf32>
    %538 = vector.multi_reduction <add>, %537, %cst_208 [1] : vector<2x16xf32> to vector<2xf32>
    %539 = vector.shape_cast %538 : vector<2xf32> to vector<2x1xf32>
    %540 = arith.addf %534, %539 : vector<2x1xf32>
    %c0_209 = arith.constant 0 : index
    %c0_210 = arith.constant 0 : index
    %541 = vector.load %arg28[%c0_209, %c0_210] : memref<2x1xf32, #tpu.memory_space<vmem>>, vector<2x1xf32>
    tpu.vector_store %arg28[%c0_209, %c0_210], %540 {strides = array<i32>} : memref<2x1xf32, #tpu.memory_space<vmem>>, vector<2x1xf32>,
    return
  }
}

</mosaic_0001>

<bundles_post_ra>
// kernel: tpu_custom_call.1
= control target key start
LH: loop header
LB: loop body
LE: loop exit
PB: predicated region body
PF: predicated region fallthrough
CT: control target
= control target key end

     0   :  { %s5678_s0 = inlined_call_operand.vmem [shape: s32[16,1], index: 0, kind: input, shape index: {}]   ;;  %s5679_s1 = inlined_call_operand.vmem [shape: f32[2,8], index: 1, kind: input, shape index: {}]   ;;  %s5680_s2 = inlined_call_operand.vmem [shape: f32[64,32], index: 2, kind: input, shape index: {}]   ;;  %s5681_s3 = inlined_call_operand.hbm [shape: f32[8,32], index: 3, kind: input, shape index: {}]   ;;  %s5682_s4 = inlined_call_operand.vmem [shape: f32[2,16], index: 4, kind: input, shape index: {}]   ;;  %s5683_s5 = inlined_call_operand.hbm [shape: f32[16,256], index: 5, kind: input, shape index: {}]   ;;  %s5684_s6 = inlined_call_operand.hbm [shape: f32[32,96], index: 6, kind: input, shape index: {}]   ;;  %s5685_s7 = inlined_call_operand.hbm [shape: f32[32,32], index: 7, kind: input, shape index: {}]   ;;  %s5686_s8 = inlined_call_operand.hbm [shape: f32[32,128], index: 8, kind: input, shape index: {}]   ;;  %s5687_s9 = inlined_call_operand.vmem [shape: f32[128,32], index: 9, kind: input, shape index: {}]   ;;  %s5688_s10 = inlined_call_operand.hbm [shape: f32[32,32], index: 10, kind: input, shape index: {}]   ;;  %s5689_s11 = inlined_call_operand.hbm [shape: f32[32,256], index: 11, kind: input, shape index: {}]   ;;  %s5690_s12 = inlined_call_operand.vmem [shape: f32[256,256], index: 12, kind: input, shape index: {}]   ;;  %s5691_s13 = inlined_call_operand.hbm [shape: f32[256,256], index: 13, kind: input, shape index: {}]   ;;  %s5692_s14 = inlined_call_operand.vmem [shape: s32[16,1], index: 14, kind: input, shape index: {}]   ;;  %s5693_s15 = inlined_call_operand.vmem [shape: f32[2,8], index: 15, kind: input, shape index: {}]   ;;  %s5694_s16 = inlined_call_operand.vmem [shape: f32[64,32], index: 16, kind: input, shape index: {}]   ;;  %s5695_s17 = inlined_call_operand.hbm [shape: f32[8,32], index: 17, kind: input, shape index: {}]   ;;  %s5696_s18 = inlined_call_operand.hbm [shape: f32[2,16], index: 18, kind: input, shape index: {}]   ;;  %s5697_s19 = inlined_call_operand.hbm [shape: f32[16,256], index: 19, kind: input, shape index: {}]   ;;  %s5698_s20 = inlined_call_operand.hbm [shape: f32[32,96], index: 20, kind: input, shape index: {}]   ;;  %s5699_s21 = inlined_call_operand.hbm [shape: f32[32,32], index: 21, kind: input, shape index: {}]   ;;  %s5700_s22 = inlined_call_operand.hbm [shape: f32[32,128], index: 22, kind: input, shape index: {}]   ;;  %s5701_s23 = inlined_call_operand.vmem [shape: f32[128,32], index: 23, kind: input, shape index: {}]   ;;  %s5702_s24 = inlined_call_operand.hbm [shape: f32[32,32], index: 24, kind: input, shape index: {}]   ;;  %s5703_s25 = inlined_call_operand.vmem [shape: f32[32,256], index: 25, kind: input, shape index: {}]   ;;  %s5704_s26 = inlined_call_operand.hbm [shape: f32[256,256], index: 26, kind: input, shape index: {}]   ;;  %s5705_s27 = inlined_call_operand.hbm [shape: f32[256,256], index: 27, kind: input, shape index: {}]   ;;  %s5706_s28 = inlined_call_operand.vmem [shape: f32[2,1], index: 28, kind: output, shape index: {}]  }
   0x1   :  { %5713 = sst [smem:[#allocation37_spill]] %s5678_s0 }
   0x2   :  { %5714 = sst [smem:[#allocation38_spill]] %s5679_s1 }
   0x3   :  { %5715 = sst [smem:[#allocation39_spill]] %s5680_s2 }
   0x4   :  { %5716 = sst [smem:[#allocation40_spill]] %s5681_s3 }
   0x5   :  { %5717 = sst [smem:[#allocation41_spill]] %s5682_s4 }
   0x6   :  { %5718 = sst [smem:[#allocation42_spill]] %s5683_s5 }
   0x7   :  { %5719 = sst [smem:[#allocation43_spill]] %s5684_s6 }
   0x8   :  { %5720 = sst [smem:[#allocation44_spill]] %s5685_s7 }
   0x9   :  { %5721 = sst [smem:[#allocation45_spill]] %s5686_s8 }
   0xa   :  { %5722 = sst [smem:[#allocation46_spill]] %s5687_s9 }
   0xb   :  { %5723 = sst [smem:[#allocation47_spill]] %s5688_s10 }
   0xc   :  { %5724 = sst [smem:[#allocation48_spill]] %s5689_s11 }
   0xd   :  { %5725 = sst [smem:[#allocation49_spill]] %s5690_s12 }
   0xe   :  { %33 = vsyncpa [#allocation3], 0 }
   0xf   :  { %34 = vsyncpa [#allocation5], 0 }
  0x10   :  { %35 = vsyncpa [#allocation8], 0 }
  0x11   :  { %36 = vsyncpa [#allocation11], 0 }
  0x12   :  { %37 = vsyncpa [#allocation14], 0 }
  0x13   :  { %38 = vsyncpa [#allocation17], 0 }
  0x14   :  { %39 = vsyncpa [#allocation20], 0 }
  0x15   :  { %40 = vsyncpa [#allocation23], 0 }
  0x16   :  { %41 = vsyncpa [#allocation26], 0  ;;  %s4745_s8 = smov [#allocation4]  }
  0x17   :  { %s65_s5 = sshll.u32 %s4745_s8, 4  ;;  %s66_s5 = int_to_ptr.vmem [resolvable:$true] %s65_s5 }
  0x18   :  { %s4395_s9 = scalar_lea.vmem %s66_s5, 512  ;;  %p4400_p1 = scmp.lt.s32.totalorder %s66_s5, %s66_s5 }
  0x19   :  { %p4396_p0 = scmp.ne.s32.totalorder %s66_s5, %s4395_s9  ;;  %p4401_p2 = scmp.lt.s32.totalorder %s4395_s9, %s4395_s9 }
  0x1b   :  { %p4402_p3 = por %p4401_p2, %p4400_p1 }
  0x1d   :  { %p4403_p4 = pnand %p4402_p3, %p4396_p0 }
  0x1f   :  { %4406 = shalt.err (!%p4403_p4)
}
  0x20   :  { %s4746_s30 = smov 256   ;;  %s4747_s3 = smov 16  }
  0x21   :  { %s5726_s0 = sld [smem:[#allocation42_spill]]  ;;  %s4748_s11 = smov [#allocation7]  }
  0x22   :  { %s89_s29 = sshll.u32 %s4748_s11, 4  ;;  %s4749_s2 = smov [#allocation10]   ;;  %s90_s29 = int_to_ptr.vmem [resolvable:$true] %s89_s29 }
  0x23   :  { %s115_s7 = sshll.u32 %s4749_s2, 4  ;;  %s4415_s12 = scalar_lea.vmem %s90_s29, 512  ;;  %s116_s7 = int_to_ptr.vmem [resolvable:$true] %s115_s7 }
  0x24   :  { %p4416_p5 = scmp.ne.s32.totalorder %s90_s29, %s4415_s12  ;;  %p4420_p6 = scmp.lt.s32.totalorder %s90_s29, %s90_s29 }
  0x25   :  { %p4421_p7 = scmp.lt.s32.totalorder %s4415_s12, %s4415_s12 }
  0x27   :  { %71 = dma.hbm_to_vmem [thread:$0]  %s5726_s0, 512, %s66_s5, [#allocation5], %s4746_s30, %s4746_s30, %s4747_s3  }
  0x28   :  { %p4422_p8 = por %p4421_p7, %p4420_p6 }
  0x2a   :  { %p4423_p9 = pnand %p4422_p8, %p4416_p5 }
  0x2c   :  { %4426 = shalt.err (!%p4423_p9)
}
  0x2d   :  { %s5711_s1 = smov 128   ;;  %s4751_s4 = smov 8  }
  0x2e   :  { %s5727_s5 = sld [smem:[#allocation44_spill]]  ;;  %s4435_s6 = scalar_lea.vmem %s116_s7, 512 }
  0x2f   :  { %p4436_p10 = scmp.ne.s32.totalorder %s116_s7, %s4435_s6  ;;  %p4440_p11 = scmp.lt.s32.totalorder %s116_s7, %s116_s7 }
  0x30   :  { %p4441_p12 = scmp.lt.s32.totalorder %s4435_s6, %s4435_s6 }
  0x32   :  { %p4442_p13 = por %p4441_p12, %p4440_p11 }
  0x34   :  { %95 = dma.hbm_to_vmem [thread:$0]  %s5727_s5, 512, %s90_s29, [#allocation8], %s5711_s1, %s5711_s1, %s4751_s4  }
  0x35   :  { %p4443_p0 = pnand %p4442_p13, %p4436_p10 }
  0x37   :  { %4446 = shalt.err (!%p4443_p0)
}
  0x38   :  { %s5728_s11 = sld [smem:[#allocation47_spill]]  ;;  %s4752_s2 = smov [#allocation13]  }
  0x39   :  { %s141_s12 = sshll.u32 %s4752_s2, 4  ;;  %s4753_s8 = smov [#allocation16]   ;;  %s142_s12 = int_to_ptr.vmem [resolvable:$true] %s141_s12 }
  0x3a   :  { %s170_s29 = sshll.u32 %s4753_s8, 4  ;;  %s4455_s9 = scalar_lea.vmem %s142_s12, 8192  ;;  %s171_s29 = int_to_ptr.vmem [resolvable:$true] %s170_s29 }
  0x3b   :  { %p4456_p1 = scmp.ne.s32.totalorder %s142_s12, %s4455_s9  ;;  %p4460_p2 = scmp.lt.s32.totalorder %s142_s12, %s142_s12 }
  0x3c   :  { %p4461_p3 = scmp.lt.s32.totalorder %s4455_s9, %s4455_s9 }
  0x3e   :  { %121 = dma.hbm_to_vmem [thread:$0]  %s5728_s11, 512, %s116_s7, [#allocation11], %s5711_s1, %s5711_s1, %s4751_s4  }
  0x3f   :  { %p4462_p4 = por %p4461_p3, %p4460_p2 }
  0x41   :  { %p4463_p5 = pnand %p4462_p4, %p4456_p1 }
  0x43   :  { %4466 = shalt.err (!%p4463_p5)
}
  0x44   :  { %147 = dma.hbm_to_vmem [thread:$0]  %s5691_s13, 8192, %s142_s12, [#allocation14], %s4746_s30, %s4746_s30, %s4747_s3  }
  0x45   :  { %s4475_s7 = scalar_lea.vmem %s171_s29, 32  ;;  %p4480_p7 = scmp.lt.s32.totalorder %s171_s29, %s171_s29 }
  0x46   :  { %p4476_p6 = scmp.ne.s32.totalorder %s171_s29, %s4475_s7  ;;  %p4481_p8 = scmp.lt.s32.totalorder %s4475_s7, %s4475_s7 }
  0x48   :  { %p4482_p9 = por %p4481_p8, %p4480_p7 }
  0x4a   :  { %p4483_p10 = pnand %p4482_p9, %p4476_p6 }
  0x4c   :  { %4486 = shalt.err (!%p4483_p10)
}
  0x4d   :  { %173 = dma.hbm_to_vmem [thread:$0]  %s5696_s18, 32, %s171_s29, [#allocation17]  }
  0x4e   :  { %s4754_s11 = smov [#allocation19]   ;;  %s4755_s8 = smov [#allocation22]  }
  0x4f   :  { %s191_s2 = sshll.u32 %s4754_s11, 4  ;;  %s215_s9 = sshll.u32 %s4755_s8, 4  ;;  %s192_s2 = int_to_ptr.vmem [resolvable:$true] %s191_s2  ;;  %s216_s9 = int_to_ptr.vmem [resolvable:$true] %s215_s9 }
  0x50   :  { %s4495_s1 = scalar_lea.vmem %s192_s2, 512  ;;  %p4500_p12 = scmp.lt.s32.totalorder %s192_s2, %s192_s2 }
  0x51   :  { %p4496_p11 = scmp.ne.s32.totalorder %s192_s2, %s4495_s1  ;;  %p4501_p13 = scmp.lt.s32.totalorder %s4495_s1, %s4495_s1 }
  0x53   :  { %p4502_p0 = por %p4501_p13, %p4500_p12 }
  0x55   :  { %p4503_p1 = pnand %p4502_p0, %p4496_p11 }
  0x57   :  { %4506 = shalt.err (!%p4503_p1)
}
  0x58   :  { %s5729_s13 = smov 128   ;;  %s4515_s18 = scalar_lea.vmem %s216_s9, 512 }
  0x59   :  { %197 = dma.hbm_to_vmem [thread:$0]  %s5698_s20, 512, %s192_s2, [#allocation20], %s5729_s13, %s5729_s13, %s4751_s4  }
  0x5a   :  { %p4516_p2 = scmp.ne.s32.totalorder %s216_s9, %s4515_s18  ;;  %p4520_p3 = scmp.lt.s32.totalorder %s216_s9, %s216_s9 }
  0x5b   :  { %p4521_p4 = scmp.lt.s32.totalorder %s4515_s18, %s4515_s18 }
  0x5d   :  { %p4522_p5 = por %p4521_p4, %p4520_p3 }
  0x5f   :  { %p4523_p6 = pnand %p4522_p5, %p4516_p2 }
  0x61   :  { %4526 = shalt.err (!%p4523_p6)
}
  0x62   :  { %221 = dma.hbm_to_vmem [thread:$0]  %s5700_s22, 512, %s216_s9, [#allocation23], %s5729_s13, %s5729_s13, %s4751_s4  }
  0x63   :  { %s4756_s6 = smov [#allocation25]   ;;  %s4757_s10 = smov [#allocation2]  }
  0x64   :  { %s243_s7 = sshll.u32 %s4756_s6, 4  ;;  %s54_s20 = sshll.u32 %s4757_s10, 4  ;;  %s244_s7 = int_to_ptr.vmem [resolvable:$true] %s243_s7  ;;  %s55_s20 = int_to_ptr.vmem [resolvable:$true] %s54_s20 }
  0x65   :  { %s4535_s0 = scalar_lea.vmem %s244_s7, 8192  ;;  %p4540_p8 = scmp.lt.s32.totalorder %s244_s7, %s244_s7 }
  0x66   :  { %p4536_p7 = scmp.ne.s32.totalorder %s244_s7, %s4535_s0  ;;  %p4541_p9 = scmp.lt.s32.totalorder %s4535_s0, %s4535_s0 }
  0x68   :  { %p4542_p10 = por %p4541_p9, %p4540_p8 }
  0x6a   :  { %p4543_p11 = pnand %p4542_p10, %p4536_p7 }
  0x6c   :  { %4546 = shalt.err (!%p4543_p11)
}
  0x6d   :  { %249 = dma.hbm_to_vmem [thread:$0]  %s5704_s26, 8192, %s244_s7, [#allocation26], %s4746_s30, %s4746_s30, %s4747_s3  }
  0x6e   :  { %s4555_s22 = scalar_lea.vmem %s55_s20, 128  ;;  %p4560_p13 = scmp.lt.s32.totalorder %s55_s20, %s55_s20 }
  0x6f   :  { %p4556_p12 = scmp.ne.s32.totalorder %s55_s20, %s4555_s22  ;;  %p4561_p0 = scmp.lt.s32.totalorder %s4555_s22, %s4555_s22 }
  0x71   :  { %p4562_p1 = por %p4561_p0, %p4560_p13 }
  0x73   :  { %p4563_p2 = pnand %p4562_p1, %p4556_p12 }
  0x75   :  { %4566 = shalt.err (!%p4563_p2)
}
  0x76   :  { %s5730_s12 = sld [smem:[#allocation40_spill]]  ;;  %s4758_s5 = smov [#allocation6]  }
  0x77   :  { %s77_s18 = sshll.u32 %s4758_s5, 4  ;;  %s4759_s1 = smov [#allocation9]   ;;  %s78_s18 = int_to_ptr.vmem [resolvable:$true] %s77_s18 }
  0x78   :  { %s101_s29 = sshll.u32 %s4759_s1, 4  ;;  %s4575_s6 = scalar_lea.vmem %s78_s18, 512  ;;  %s102_s29 = int_to_ptr.vmem [resolvable:$true] %s101_s29 }
  0x79   :  { %p4576_p3 = scmp.ne.s32.totalorder %s78_s18, %s4575_s6  ;;  %p4580_p4 = scmp.lt.s32.totalorder %s78_s18, %s78_s18 }
  0x7a   :  { %p4581_p5 = scmp.lt.s32.totalorder %s4575_s6, %s4575_s6 }
  0x7c   :  { %57 = dma.hbm_to_vmem [thread:$0]  %s5730_s12, 128, %s55_s20, [#allocation3]  }
  0x7d   :  { %p4582_p6 = por %p4581_p5, %p4580_p4 }
  0x7f   :  { %p4583_p7 = pnand %p4582_p6, %p4576_p3 }
  0x81   :  { %4586 = shalt.err (!%p4583_p7)
}
  0x82   :  { %s5731_s10 = sld [smem:[#allocation43_spill]]  ;;  %s4595_s20 = scalar_lea.vmem %s102_s29, 512 }
  0x83   :  { %p4596_p8 = scmp.ne.s32.totalorder %s102_s29, %s4595_s20  ;;  %p4600_p9 = scmp.lt.s32.totalorder %s102_s29, %s102_s29 }
  0x84   :  { %p4601_p10 = scmp.lt.s32.totalorder %s4595_s20, %s4595_s20 }
  0x86   :  { %p4602_p11 = por %p4601_p10, %p4600_p9 }
  0x88   :  { %83 = dma.hbm_to_vmem [thread:$0]  %s5731_s10, 512, %s78_s18, [#allocation5], %s5729_s13, %s5729_s13, %s4751_s4  }
  0x89   :  { %p4603_p12 = pnand %p4602_p11, %p4596_p8 }
  0x8b   :  { %4606 = shalt.err (!%p4603_p12)
}
  0x8c   :  { %s5732_s2 = sld [smem:[#allocation45_spill]]  ;;  %s4760_s22 = smov [#allocation12]  }
  0x8d   :  { %s127_s8 = sshll.u32 %s4760_s22, 4  ;;  %s4761_s9 = smov [#allocation15]   ;;  %s128_s8 = int_to_ptr.vmem [resolvable:$true] %s127_s8 }
  0x8e   :  { %s160_s12 = sshll.u32 %s4761_s9, 4  ;;  %s4615_s5 = scalar_lea.vmem %s128_s8, 1024  ;;  %s161_s12 = int_to_ptr.vmem [resolvable:$true] %s160_s12 }
  0x8f   :  { %p4616_p13 = scmp.ne.s32.totalorder %s128_s8, %s4615_s5  ;;  %p4620_p0 = scmp.lt.s32.totalorder %s128_s8, %s128_s8 }
  0x90   :  { %p4621_p1 = scmp.lt.s32.totalorder %s4615_s5, %s4615_s5 }
  0x92   :  { %107 = dma.hbm_to_vmem [thread:$0]  %s5732_s2, 512, %s102_s29, [#allocation8], %s5729_s13, %s5729_s13, %s4751_s4  }
  0x93   :  { %p4622_p2 = por %p4621_p1, %p4620_p0 }
  0x95   :  { %p4623_p3 = pnand %p4622_p2, %p4616_p13 }
  0x97   :  { %4626 = shalt.err (!%p4623_p3)
}
  0x98   :  { %s5733_s6 = sld [smem:[#allocation48_spill]]  ;;  %s4635_s29 = scalar_lea.vmem %s161_s12, 128 }
  0x99   :  { %p4636_p4 = scmp.ne.s32.totalorder %s161_s12, %s4635_s29  ;;  %p4640_p5 = scmp.lt.s32.totalorder %s161_s12, %s161_s12 }
  0x9a   :  { %p4641_p6 = scmp.lt.s32.totalorder %s4635_s29, %s4635_s29 }
  0x9c   :  { %p4642_p7 = por %p4641_p6, %p4640_p5 }
  0x9e   :  { %133 = dma.hbm_to_vmem [thread:$0]  %s5733_s6, 1024, %s128_s8, [#allocation11], %s4746_s30, %s4746_s30, %s4747_s3  }
  0x9f   :  { %p4643_p8 = pnand %p4642_p7, %p4636_p4 }
  0xa1   :  { %4646 = shalt.err (!%p4643_p8)
}
  0xa2   :  { %163 = dma.hbm_to_vmem [thread:$0]  %s5695_s17, 128, %s161_s12, [#allocation14]  }
  0xa3   :  { %s4762_s10 = smov [#allocation18]   ;;  %s4763_s0 = smov [#allocation21]  }
  0xa4   :  { %s179_s20 = sshll.u32 %s4762_s10, 4  ;;  %s203_s11 = sshll.u32 %s4763_s0, 4  ;;  %s180_s20 = int_to_ptr.vmem [resolvable:$true] %s179_s20  ;;  %s204_s11 = int_to_ptr.vmem [resolvable:$true] %s203_s11 }
  0xa5   :  { %s4655_s2 = scalar_lea.vmem %s180_s20, 512  ;;  %p4660_p10 = scmp.lt.s32.totalorder %s180_s20, %s180_s20 }
  0xa6   :  { %p4656_p9 = scmp.ne.s32.totalorder %s180_s20, %s4655_s2  ;;  %p4661_p11 = scmp.lt.s32.totalorder %s4655_s2, %s4655_s2 }
  0xa8   :  { %p4662_p12 = por %p4661_p11, %p4660_p10 }
  0xaa   :  { %p4663_p13 = pnand %p4662_p12, %p4656_p9 }
  0xac   :  { %4666 = shalt.err (!%p4663_p13)
}
  0xad   :  { %185 = dma.hbm_to_vmem [thread:$0]  %s5697_s19, 512, %s180_s20, [#allocation17], %s4746_s30, %s4746_s30, %s4747_s3  }
  0xae   :  { %s4675_s17 = scalar_lea.vmem %s204_s11, 512  ;;  %p4680_p1 = scmp.lt.s32.totalorder %s204_s11, %s204_s11 }
  0xaf   :  { %p4676_p0 = scmp.ne.s32.totalorder %s204_s11, %s4675_s17  ;;  %p4681_p2 = scmp.lt.s32.totalorder %s4675_s17, %s4675_s17 }
  0xb1   :  { %p4682_p3 = por %p4681_p2, %p4680_p1 }
  0xb3   :  { %p4683_p4 = pnand %p4682_p3, %p4676_p0 }
  0xb5   :  { %4686 = shalt.err (!%p4683_p4)
}
  0xb6   :  { %209 = dma.hbm_to_vmem [thread:$0]  %s5699_s21, 512, %s204_s11, [#allocation20], %s5729_s13, %s5729_s13, %s4751_s4  }
  0xb7   :  { %s4764_s5 = smov [#allocation24]   ;;  %s4765_s1 = smov [#allocation27]  }
  0xb8   :  { %s229_s18 = sshll.u32 %s4764_s5, 4  ;;  %s255_s19 = sshll.u32 %s4765_s1, 4  ;;  %s230_s18 = int_to_ptr.vmem [resolvable:$true] %s229_s18  ;;  %s256_s19 = int_to_ptr.vmem [resolvable:$true] %s255_s19 }
  0xb9   :  { %s4695_s6 = scalar_lea.vmem %s230_s18, 512  ;;  %p4700_p6 = scmp.lt.s32.totalorder %s230_s18, %s230_s18 }
  0xba   :  { %p4696_p5 = scmp.ne.s32.totalorder %s230_s18, %s4695_s6  ;;  %p4701_p7 = scmp.lt.s32.totalorder %s4695_s6, %s4695_s6 }
  0xbc   :  { %p4702_p8 = por %p4701_p7, %p4700_p6 }
  0xbe   :  { %p4703_p9 = pnand %p4702_p8, %p4696_p5 }
  0xc0   :  { %4706 = shalt.err (!%p4703_p9)
}
  0xc1   :  { %235 = dma.hbm_to_vmem [thread:$0]  %s5702_s24, 512, %s230_s18, [#allocation23], %s5729_s13, %s5729_s13, %s4751_s4  }
  0xc2   :  { %s4715_s21 = scalar_lea.vmem %s256_s19, 8192  ;;  %p4720_p11 = scmp.lt.s32.totalorder %s256_s19, %s256_s19 }
  0xc3   :  { %p4716_p10 = scmp.ne.s32.totalorder %s256_s19, %s4715_s21  ;;  %p4721_p12 = scmp.lt.s32.totalorder %s4715_s21, %s4715_s21 }
  0xc5   :  { %p4722_p13 = por %p4721_p12, %p4720_p11 }
  0xc7   :  { %p4723_p0 = pnand %p4722_p13, %p4716_p10 }
  0xc9   :  { %4726 = shalt.err (!%p4723_p0)
}
  0xca   :  { %261 = dma.hbm_to_vmem [thread:$0]  %s5705_s27, 8192, %s256_s19, [#allocation26], %s4746_s30, %s4746_s30, %s4747_s3  }
  0xcb   :  { %4727 = dma.done.wait [#allocation3], 128  }
  0xcc   :  { %4728 = vsyncadd [#allocation3], 4294967168 }
  0xcd   :  { %4729 = dma.done.wait [#allocation5], 1024  }
  0xce   :  { %4730 = vsyncadd [#allocation5], 4294966272 }
  0xcf   :  { %4731 = dma.done.wait [#allocation8], 1024  }
  0xd0   :  { %4732 = vsyncadd [#allocation8], 4294966272 }
  0xd1   :  { %4733 = dma.done.wait [#allocation11], 1536  }
  0xd2   :  { %4734 = vsyncadd [#allocation11], 4294965760 }
  0xd3   :  { %4735 = dma.done.wait [#allocation14], 8320  }
  0xd4   :  { %4736 = vsyncadd [#allocation14], 4294958976 }
  0xd5   :  { %4737 = dma.done.wait [#allocation17], 544  }
  0xd6   :  { %4738 = vsyncadd [#allocation17], 4294966752 }
  0xd7   :  { %4739 = dma.done.wait [#allocation20], 1024  }
  0xd8   :  { %4740 = vsyncadd [#allocation20], 4294966272 }
  0xd9   :  { %4741 = dma.done.wait [#allocation23], 1024  }
  0xda   :  { %4742 = vsyncadd [#allocation23], 4294966272 }
  0xdb   :  { %4743 = dma.done.wait [#allocation26], 16384  }
  0xdc   :  { %4744 = vsyncadd [#allocation26], 4294950912  ;;  %v4766_v0 = vmov 0   ;;  %s5734_s30 = sld [smem:[#allocation37_spill]]  ;;  %v4767_v11 = vmov 0.0   ;;  %v332_v12 = vlaneseq  ;;  %vm355_vm0 = vcmask 523264  }
  0xdd   :  { %4317 = vset.pattern.permute.xlu0 %v4766_v0  ;;  %4318 = vset.pattern.permute.xlu1 %v4766_v0  ;;  %s5735_s20 = sld [smem:[#allocation39_spill]]  ;;  %v354_v19 = vld [vmem:[#allocation2] sm:$0xff]  ;;  %vm437_vm3 = vcmask 261120   ;;  %v471_v36 = vld [vmem:[#allocation6 + $0x10] sm:$0xff]  ;;  %v470_v37 = vld [vmem:[#allocation6 + $0x8] sm:$0xff]  ;;  %vm4768_vm4 = vmmov 0  }
  0xde   :  { %v5044_v13 = vand.u32 127, %v332_v12  ;;  %v472_v35 = vld [vmem:[#allocation6 + $0x18] sm:$0xff]  ;;  %v469_v38 = vld [vmem:[#allocation6] sm:$0xff]  ;;  %s4769_s7 = smov 80   ;;  %s4770_s10 = smov 96   ;;  %vm560_vm5 = vcmask 130048  }
  0xdf   :  { %4031 = vmatprep.subr.mxu1 %v472_v35  ;;  %v313_v46 = vld [vmem:[#allocation4] ss:$0 sm:$0xff]  ;;  %v314_v48 = vld [vmem:[#allocation4 + $0x1] ss:$0 sm:$0xff]  ;;  %v315_v55 = vld [vmem:[#allocation4 + $0x2] ss:$0 sm:$0xff] }
  0xe0   :  { %4032 = vmatpush3.msra.mxu1 %v472_v35  ;;  %s4771_s24 = smov 112   ;;  %s5736_s4 = sld [smem:[#allocation38_spill]]  ;;  %vm641_vm6 = vcmask 64512   ;;  %vm1589_vm7 = vcmask 1040384   ;;  %vm3810_vm10 = vcmask 123904   ;;  %vm3801_vm11 = vcmask 1041408  }
  0xe1   :  { %4033 = vmatprep.subr.mxu1 %v471_v36  ;;  %s4772_s13 = smov 64   ;;  %s5737_s2 = sld [smem:[#allocation46_spill]]  ;;  %vm3815_vm12 = vcmask 1024  }
  0xe2   :  { %v330_v1 = vld [vmem:[%s5734_s30] sm:$0xff]  ;;  %v331_v4 = vld [vmem:[%s5734_s30 + $0x8] sm:$0xff]  ;;  %4034 = vmatpush3.msra.mxu1 %v471_v36  ;;  %s5738_s11 = sld [smem:[#allocation49_spill]] }
  0xe3   :  { %v353_v2 = vld [vmem:[%s5735_s20 + $0x38] sm:$0xff]  ;;  %335 = vperm.xlu0 %4317, %v330_v1   ;;  %v352_v3 = vld [vmem:[%s5735_s20 + $0x30] sm:$0xff]  ;;  %v351_v5 = vld [vmem:[%s5735_s20 + $0x28] sm:$0xff]  ;;  %4035 = vmatprep.subr.mxu1 %v470_v37  ;;  %s5739_s17 = sld [smem:[#allocation41_spill]] }
  0xe4   :  { %4012 = vmatprep.subr.mxu0 %v353_v2  ;;  %v350_v6 = vld [vmem:[%s5735_s20 + $0x20] sm:$0xff]  ;;  %v349_v7 = vld [vmem:[%s5735_s20 + $0x18] sm:$0xff]  ;;  %v348_v8 = vld [vmem:[%s5735_s20 + $0x10] sm:$0xff]  ;;  %4036 = vmatpush3.msra.mxu1 %v470_v37 }
  0xe5   :  { %4013 = vmatpush3.msra.mxu0 %v353_v2  ;;  %v347_v9 = vld [vmem:[%s5735_s20 + $0x8] sm:$0xff]  ;;  %v346_v10 = vld [vmem:[%s5735_s20] sm:$0xff]  ;;  %4037 = vmatprep.subr.mxu1 %v469_v38  ;;  %s4773_s20 = smov 48  }
  0xe6   :  { %4014 = vmatprep.subr.mxu0 %v352_v3  ;;  %4038 = vmatpush3.msra.mxu1 %v469_v38  ;;  %v554_v2 = vld [vmem:[%s5736_s4] sm:$0x3] }
  0xe7   :  { %4015 = vmatpush3.msra.mxu0 %v352_v3  ;;  %338 = vperm.xlu0 %4317, %v331_v4   ;;  %v637_v3 = vshrl.u32 %v332_v12, 7  ;;  %v555_v4 = vsub.f32 1.0, %v554_v2 }
  0xe8   :  { %4016 = vmatprep.subr.mxu0 %v351_v5  ;;  %4042 = vmatprep.subr.mxu1 %v4767_v11 }
  0xe9   :  { %4017 = vmatpush3.msra.mxu0 %v351_v5  ;;  %v5108_v5 = vsub.s32 0, %v637_v3 }
  0xea   :  { %4018 = vmatprep.subr.mxu0 %v350_v6 }
  0xeb   :  { %4019 = vmatpush3.msra.mxu0 %v350_v6  ;;  %v556_v6 = vmul.f32 -1e+09, %v555_v4 }
  0xec   :  { %4020 = vmatprep.subr.mxu0 %v349_v7 }
  0xed   :  { %4021 = vmatpush3.msra.mxu0 %v349_v7  ;;  %v639_v7 = vrot.slane %v556_v6, %v5108_v5 }
  0xee   :  { %4022 = vmatprep.subr.mxu0 %v348_v8 }
  0xef   :  { %4023 = vmatpush3.msra.mxu0 %v348_v8 }
  0xf0   :  { %4024 = vmatprep.subr.mxu0 %v347_v9 }
  0xf1   :  { %4025 = vmatpush3.msra.mxu0 %v347_v9 }
  0xf2   :  { %4026 = vmatprep.subr.mxu0 %v346_v10 }
  0xf3   :  { %4027 = vmatpush3.msra.mxu0 %v346_v10 }
  0xf4   :  { %4052 = vmatprep.subr.mxu0 %v4767_v11 }
 0x15e   :  { %v336_v14 = vpop.permute.xlu0 %335 }
 0x15f   :  { %vm340_vm1 = vcmp.eq.s32.totalorder %v336_v14, %v5044_v13 }
 0x160   :  { %v3830_v15 = vsel %vm340_vm1, 1.0, %v4767_v11 }
 0x161   :  { %4028 = vmatprep.mubr.msk.f32.mxu0 %vm355_vm0, %v3830_v15 }
 0x162   :  { %v339_v16 = vpop.permute.xlu0 %338 }
 0x163   :  { %vm341_vm2 = vcmp.eq.s32.totalorder %v339_v16, %v5044_v13 }
 0x164   :  { %v3831_v17 = vsel %vm341_vm2, 1.0, %v4767_v11 }
 0x165   :  { %4029 = vmatmul.mubr.msk.f32.vlgmr.msra.gmra.mxu0 %vm355_vm0, %v3831_v17 }
 0x166   :  { %4054 = vmatprep.mubr.msk.f32.mxu0 %vm4768_vm4, %v4767_v11 }
 0x225   :  { %v4030_v18 = vpop.f32.mrf.mxu0 }
 0x226   :  { %v434_v22 = vadd.f32 %v4030_v18, %v354_v19  ;;  %v5112_v18 = vsub.s32 1, %v637_v3 }
 0x227   :  { %v428_v20 = vpop.f32.mrf.mxu0 }
 0x228   :  { %v429_v21 = vadd.f32 %v428_v20, %v354_v19  ;;  %v441_v24 = vsel %vm437_vm3, %v434_v22, 0.0 }
 0x22a   :  { %v438_v23 = vsel %vm437_vm3, %v429_v21, 0.0 }
 0x22b   :  { %439 = vadd.xlane.f32.xlu1 %v438_v23 }
 0x22f   :  { %442 = vadd.xlane.f32.xlu1 %v441_v24 }
 0x2b4   :  { %v440_v25 = vpop.xlane.xlu1 %439 }
 0x2b5   :  { %v445_v26 = vmul.f32 0.03125, %v440_v25 }
 0x2b7   :  { %v447_v27 = vsub.f32 %v429_v21, %v445_v26  ;;  %v982_v21 = vrot.slane %v556_v6, %v5112_v18 }
 0x2b8   :  { %v443_v28 = vpop.xlane.xlu1 %442 }
 0x2b9   :  { %v446_v29 = vmul.f32 0.03125, %v443_v28  ;;  %v449_v30 = vmul.f32 %v447_v27, %v447_v27 }
 0x2bb   :  { %v448_v31 = vsub.f32 %v434_v22, %v446_v29  ;;  %v451_v32 = vsel %vm437_vm3, %v449_v30, 0.0 }
 0x2bc   :  { %452 = vadd.xlane.f32.xlu0 %v451_v32 }
 0x2bd   :  { %v450_v33 = vmul.f32 %v448_v31, %v448_v31 }
 0x2bf   :  { %v454_v34 = vsel %vm437_vm3, %v450_v33, 0.0 }
 0x2c0   :  { %455 = vadd.xlane.f32.xlu1 %v454_v34 }
 0x345   :  { %v453_v39 = vpop.xlane.xlu0 %452 }
 0x346   :  { %v457_v40 = vmul.f32 0.03125, %v453_v39 }
 0x348   :  { %v459_v41 = vadd.f32 1e-12, %v457_v40 }
 0x349   :  { %v456_v42 = vpop.xlane.xlu1 %455 }
 0x34a   :  { %4319 = vrsqrt.f32 %v459_v41  ;;  %v458_v43 = vmul.f32 0.03125, %v456_v42 }
 0x34c   :  { %v460_v44 = vadd.f32 1e-12, %v458_v43 }
 0x34e   :  { %4321 = vrsqrt.f32 %v460_v44 }
 0x357   :  { %v4320_v45 = vpop.eup %4319 }
 0x358   :  { %v463_v47 = vmul.f32 %v4320_v45, %v447_v27 }
 0x35a   :  { %v465_v49 = vmul.f32 %v463_v47, %v313_v46 }
 0x35b   :  { %v4322_v50 = vpop.eup %4321 }
 0x35c   :  { %v464_v51 = vmul.f32 %v4322_v50, %v448_v31  ;;  %v5057_v52 = vadd.f32 %v465_v49, %v314_v48 }
 0x35e   :  { %v466_v53 = vmul.f32 %v464_v51, %v313_v46  ;;  %4039 = vmatprep.mubr.msk.f32.mxu1 %vm437_vm3, %v5057_v52 }
 0x360   :  { %v5061_v54 = vadd.f32 %v466_v53, %v314_v48 }
 0x362   :  { %4040 = vmatmul.mubr.msk.f32.vlgmr.msra.gmra.mxu1 %vm437_vm3, %v5061_v54 }
 0x363   :  { %4044 = vmatprep.mubr.msk.f32.mxu1 %vm4768_vm4, %v4767_v11 }
 0x422   :  { %v4041_v56 = vpop.f32.mrf.mxu1 }
 0x423   :  { %v5069_v57 = vadd.f32 %v4041_v56, %v315_v55 }
 0x424   :  { %v545_v58 = vpop.f32.mrf.mxu1 }
 0x425   :  { %v5071_v59 = vadd.f32 %v545_v58, %v315_v55  ;;  %1073 = vrot.lane.b32.xlu0 %v5069_v57, %s4769_s7 }
 0x427   :  { %558 = vrot.lane.b32.xlu1 %v5071_v59, %s4770_s10 }
 0x42b   :  { %731 = vrot.lane.b32.xlu1 %v5071_v59, %s4769_s7 }
 0x42f   :  { %729 = vrot.lane.b32.xlu1 %v5071_v59, %s4771_s24 }
 0x433   :  { %902 = vrot.lane.b32.xlu1 %v5069_v57, %s4770_s10 }
 0x437   :  { %1071 = vrot.lane.b32.xlu1 %v5069_v57, %s4771_s24 }
 0x497   :  { %v1074_v0 = vpop.permute.xlu0 %1073 }
 0x499   :  { %v559_v60 = vpop.permute.xlu1 %558 }
 0x49a   :  { %4043 = vmatpush3.xpose.msk.msra.mxu1 %vm560_vm5, %v559_v60 }
 0x49b   :  { %4047 = vmatprep.subr.mxu1 %v4767_v11 }
 0x49d   :  { %4045 = vmatmul.mubr.msk.f32.vlgmr.msra.gmra.mxu1 %vm560_vm5, %v5071_v59  ;;  %v732_v61 = vpop.permute.xlu1 %731 }
 0x49e   :  { %4053 = vmatpush3.xpose.msk.msra.mxu0 %vm560_vm5, %v732_v61  ;;  %4049 = vmatprep.mubr.msk.f32.mxu1 %vm4768_vm4, %v4767_v11 }
 0x49f   :  { %4062 = vmatprep.subr.mxu0 %v4767_v11 }
 0x4a1   :  { %v730_v62 = vpop.permute.xlu1 %729 }
 0x4a2   :  { %4055 = vmatmul.mubr.msk.f32.vlgmr.msra.gmra.mxu0 %vm560_vm5, %v730_v62 }
 0x4a3   :  { %4064 = vmatprep.mubr.msk.f32.mxu0 %vm4768_vm4, %v4767_v11 }
 0x4a5   :  { %v903_v63 = vpop.permute.xlu1 %902 }
 0x4a6   :  { %4063 = vmatpush3.xpose.msk.msra.mxu0 %vm560_vm5, %v903_v63 }
 0x4a7   :  { %4072 = vmatprep.subr.mxu0 %v4767_v11 }
 0x4a9   :  { %4065 = vmatmul.mubr.msk.f32.vlgmr.msra.gmra.mxu0 %vm560_vm5, %v5069_v57  ;;  %v1072_v1 = vpop.permute.xlu1 %1071 }
 0x4aa   :  { %4073 = vmatpush3.xpose.msk.msra.mxu0 %vm560_vm5, %v1074_v0  ;;  %4074 = vmatprep.mubr.msk.f32.mxu0 %vm4768_vm4, %v4767_v11 }
 0x4ad   :  { %4075 = vmatmul.mubr.msk.f32.vlgmr.msra.gmra.mxu0 %vm560_vm5, %v1072_v1 }
 0x55d   :  { %v631_v8 = vpop.f32.mrf.mxu1 }
 0x55e   :  { %v635_v9 = vmul.f32 0.25, %v631_v8  ;;  %v1245_v8 = vld [vmem:[#allocation7 + $0x10] sm:$0xff] }
 0x55f   :  { %v4046_v10 = vpop.f32.mrf.mxu1 }
 0x560   :  { %v640_v14 = vadd.f32 %v639_v7, %v635_v9  ;;  %v1244_v9 = vld [vmem:[#allocation7 + $0x8] sm:$0xff]  ;;  %v1243_v10 = vld [vmem:[#allocation7] sm:$0xff] }
 0x562   :  { %v803_v15 = vpop.f32.mrf.mxu0  ;;  %v642_v16 = vsel %vm641_vm6, %v640_v14, -inf }
 0x563   :  { %v807_v17 = vmul.f32 0.25, %v803_v15  ;;  %643 = vmax.xlane.f32.xlu1 %v642_v16 }
 0x564   :  { %v4056_v19 = vpop.f32.mrf.mxu0 }
 0x565   :  { %v808_v12 = vadd.f32 %v807_v17, %v639_v7  ;;  %v1246_v7 = vld [vmem:[#allocation7 + $0x18] sm:$0xff] }
 0x567   :  { %v809_v20 = vsel %vm641_vm6, %v808_v12, -inf }
 0x568   :  { %810 = vmax.xlane.f32.xlu0 %v809_v20 }
 0x569   :  { %v974_v22 = vpop.f32.mrf.mxu0 }
 0x56a   :  { %v978_v23 = vmul.f32 0.25, %v974_v22 }
 0x56b   :  { %v4066_v24 = vpop.f32.mrf.mxu0 }
 0x56c   :  { %v983_v25 = vadd.f32 %v982_v21, %v978_v23 }
 0x56d   :  { %v1145_v26 = vpop.f32.mrf.mxu0 }
 0x56e   :  { %v1149_v27 = vmul.f32 0.25, %v1145_v26  ;;  %v984_v28 = vsel %vm641_vm6, %v983_v25, -inf  ;;  %v316_v26 = vld [vmem:[#allocation4 + $0x3] ss:$0 sm:$0xff] }
 0x56f   :  { %985 = vmax.xlane.f32.xlu1 %v984_v28  ;;  %v4076_v29 = vpop.f32.mrf.mxu0 }
 0x570   :  { %v1150_v30 = vadd.f32 %v1149_v27, %v982_v21 }
 0x572   :  { %v1151_v31 = vsel %vm641_vm6, %v1150_v30, -inf }
 0x573   :  { %1152 = vmax.xlane.f32.xlu1 %v1151_v31 }
 0x584   :  { %653 = vrot.lane.b32.xlu1 %v5071_v59, %s4772_s13 }
 0x5ec   :  { %v644_v32 = vpop.xlane.xlu1 %643 }
 0x5ed   :  { %v645_v33 = vsub.f32 %v640_v14, %v644_v32 }
 0x5ef   :  { %v646_v34 = vmul.f32 1.442695, %v645_v33 }
 0x5f1   :  { %4323 = vpow2.f32 %v646_v34  ;;  %v811_v35 = vpop.xlane.xlu0 %810 }
 0x5f2   :  { %v812_v36 = vsub.f32 %v808_v12, %v811_v35 }
 0x5f4   :  { %v813_v37 = vmul.f32 1.442695, %v812_v36 }
 0x5f6   :  { %4325 = vpow2.f32 %v813_v37 }
 0x5f8   :  { %v986_v38 = vpop.xlane.xlu1 %985 }
 0x5f9   :  { %v987_v39 = vsub.f32 %v983_v25, %v986_v38 }
 0x5fb   :  { %v988_v40 = vmul.f32 1.442695, %v987_v39 }
 0x5fc   :  { %v1153_v41 = vpop.xlane.xlu1 %1152 }
 0x5fd   :  { %4327 = vpow2.f32 %v988_v40  ;;  %v1154_v42 = vsub.f32 %v1150_v30, %v1153_v41 }
 0x5fe   :  { %v4324_v43 = vpop.eup %4323 }
 0x5ff   :  { %v1155_v44 = vmul.f32 1.442695, %v1154_v42  ;;  %v648_v45 = vsel %vm641_vm6, %v4324_v43, 0.0 }
 0x600   :  { %649 = vadd.xlane.f32.xlu1 %v648_v45  ;;  %v654_v46 = vpop.permute.xlu1 %653  ;;  %v1361_v45 = vld [vmem:[#allocation9 + $0x8] sm:$0xff] }
 0x601   :  { %4329 = vpow2.f32 %v1155_v44  ;;  %4048 = vmatpush3.msra.mxu1 %v654_v46  ;;  %v1363_v44 = vld [vmem:[#allocation9 + $0x18] sm:$0xff]  ;;  %v1360_v46 = vld [vmem:[#allocation9] sm:$0xff] }
 0x602   :  { %4057 = vmatprep.subr.mxu1 %v4767_v11 }
 0x603   :  { %v4326_v47 = vpop.eup %4325 }
 0x604   :  { %v815_v48 = vsel %vm641_vm6, %v4326_v47, 0.0 }
 0x605   :  { %816 = vadd.xlane.f32.xlu0 %v815_v48 }
 0x60a   :  { %v4328_v49 = vpop.eup %4327 }
 0x60b   :  { %v990_v50 = vsel %vm641_vm6, %v4328_v49, 0.0 }
 0x60c   :  { %991 = vadd.xlane.f32.xlu1 %v990_v50 }
 0x60e   :  { %v4330_v51 = vpop.eup %4329 }
 0x60f   :  { %v1157_v53 = vsel %vm641_vm6, %v4330_v51, 0.0 }
 0x610   :  { %1158 = vadd.xlane.f32.xlu0 %v1157_v53 }
 0x61d   :  { %995 = vrot.lane.b32.xlu1 %v5069_v57, %s4772_s13 }
 0x621   :  { %1162 = vrot.lane.b32.xlu1 %v5069_v57, %s4773_s20 }
 0x626   :  { %820 = vrot.lane.b32.xlu0 %v5071_v59, %s4773_s20 }
 0x689   :  { %v650_v55 = vpop.xlane.xlu1 %649 }
 0x68a   :  { %4331 = vrcp.f32 %v650_v55 }
 0x68e   :  { %v817_v56 = vpop.xlane.xlu0 %816 }
 0x68f   :  { %4333 = vrcp.f32 %v817_v56  ;;  %v317_v56 = vld [vmem:[#allocation4 + $0x4] ss:$0 sm:$0xff] }
 0x695   :  { %v992_v58 = vpop.xlane.xlu1 %991 }
 0x696   :  { %4335 = vrcp.f32 %v992_v58 }
 0x697   :  { %v4332_v60 = vpop.eup %4331 }
 0x698   :  { %v652_v61 = vmul.f32 %v4332_v60, %v4324_v43  ;;  %v318_v60 = vld [vmem:[#allocation4 + $0x5] ss:$0 sm:$0xff] }
 0x699   :  { %v1159_v62 = vpop.xlane.xlu0 %1158  ;;  %v996_v59 = vpop.permute.xlu1 %995 }
 0x69a   :  { %4337 = vrcp.f32 %v1159_v62  ;;  %4050 = vmatmul.mubr.msk.f32.vlgmr.msra.gmra.mxu1 %vm641_vm6, %v652_v61 }
 0x69b   :  { %4059 = vmatprep.mubr.msk.f32.mxu1 %vm4768_vm4, %v4767_v11 }
 0x69c   :  { %v4334_v63 = vpop.eup %4333 }
 0x69d   :  { %v821_v57 = vpop.permute.xlu0 %820  ;;  %v819_v0 = vmul.f32 %v4334_v63, %v4326_v47  ;;  %v1163_v3 = vpop.permute.xlu1 %1162 }
 0x69e   :  { %4058 = vmatpush3.msra.mxu1 %v821_v57 }
 0x69f   :  { %4060 = vmatmul.mubr.msk.f32.vlgmr.msra.gmra.mxu1 %vm641_vm6, %v819_v0  ;;  %4067 = vmatprep.subr.mxu1 %v4767_v11 }
 0x6a0   :  { %4068 = vmatpush3.msra.mxu1 %v996_v59  ;;  %4069 = vmatprep.mubr.msk.f32.mxu1 %vm4768_vm4, %v4767_v11 }
 0x6a1   :  { %4077 = vmatprep.subr.mxu1 %v4767_v11 }
 0x6a3   :  { %v4336_v1 = vpop.eup %4335 }
 0x6a4   :  { %v994_v2 = vmul.f32 %v4336_v1, %v4328_v49  ;;  %v1478_v1 = vld [vmem:[%s5737_s2 + $0x78] sm:$0xff] }
 0x6a5   :  { %4104 = vmatprep.subr.mxu0 %v1478_v1 }
 0x6a6   :  { %4070 = vmatmul.mubr.msk.f32.vlgmr.msra.gmra.mxu1 %vm641_vm6, %v994_v2  ;;  %4105 = vmatpush3.msra.mxu0 %v1478_v1  ;;  %v1477_v2 = vld [vmem:[%s5737_s2 + $0x70] sm:$0xff]  ;;  %v1593_v1 = vld [vmem:[#allocation10 + $0x10] sm:$0xff] }
 0x6a7   :  { %v4338_v4 = vpop.eup %4337  ;;  %4078 = vmatpush3.msra.mxu1 %v1163_v3  ;;  %4079 = vmatprep.mubr.msk.f32.mxu1 %vm4768_vm4, %v4767_v11  ;;  %v1476_v3 = vld [vmem:[%s5737_s2 + $0x68] sm:$0xff] }
 0x6a8   :  { %v1161_v6 = vmul.f32 %v4338_v4, %v4330_v51  ;;  %4082 = vmatprep.subr.mxu1 %v1246_v7  ;;  %4106 = vmatprep.subr.mxu0 %v1477_v2  ;;  %v1475_v4 = vld [vmem:[%s5737_s2 + $0x60] sm:$0xff] }
 0x6a9   :  { %4107 = vmatpush3.msra.mxu0 %v1477_v2  ;;  %v1592_v2 = vld [vmem:[#allocation10 + $0x8] sm:$0xff] }
 0x6aa   :  { %4080 = vmatmul.mubr.msk.f32.vlgmr.msra.gmra.mxu1 %vm641_vm6, %v1161_v6  ;;  %4108 = vmatprep.subr.mxu0 %v1476_v3  ;;  %v1474_v6 = vld [vmem:[%s5737_s2 + $0x58] sm:$0xff] }
 0x6ab   :  { %4083 = vmatpush3.msra.mxu1 %v1246_v7  ;;  %4109 = vmatpush3.msra.mxu0 %v1476_v3  ;;  %v1473_v7 = vld [vmem:[%s5737_s2 + $0x50] sm:$0xff]  ;;  %v1591_v3 = vld [vmem:[#allocation10] sm:$0xff] }
 0x6ac   :  { %4084 = vmatprep.subr.mxu1 %v1245_v8  ;;  %4110 = vmatprep.subr.mxu0 %v1475_v4 }
 0x6ad   :  { %4085 = vmatpush3.msra.mxu1 %v1245_v8  ;;  %4111 = vmatpush3.msra.mxu0 %v1475_v4  ;;  %v1472_v8 = vld [vmem:[%s5737_s2 + $0x48] sm:$0xff] }
 0x6ae   :  { %4086 = vmatprep.subr.mxu1 %v1244_v9  ;;  %4112 = vmatprep.subr.mxu0 %v1474_v6 }
 0x6af   :  { %4087 = vmatpush3.msra.mxu1 %v1244_v9  ;;  %4113 = vmatpush3.msra.mxu0 %v1474_v6  ;;  %v1471_v9 = vld [vmem:[%s5737_s2 + $0x40] sm:$0xff] }
 0x6b0   :  { %4088 = vmatprep.subr.mxu1 %v1243_v10  ;;  %4114 = vmatprep.subr.mxu0 %v1473_v7 }
 0x6b1   :  { %4089 = vmatpush3.msra.mxu1 %v1243_v10  ;;  %4115 = vmatpush3.msra.mxu0 %v1473_v7  ;;  %v1470_v10 = vld [vmem:[%s5737_s2 + $0x38] sm:$0xff] }
 0x6b2   :  { %4093 = vmatprep.subr.mxu1 %v1363_v44  ;;  %4116 = vmatprep.subr.mxu0 %v1472_v8 }
 0x6b3   :  { %4117 = vmatpush3.msra.mxu0 %v1472_v8 }
 0x6b4   :  { %4118 = vmatprep.subr.mxu0 %v1471_v9 }
 0x6b5   :  { %4119 = vmatpush3.msra.mxu0 %v1471_v9 }
 0x6b6   :  { %4120 = vmatprep.subr.mxu0 %v1470_v10 }
 0x6b7   :  { %4121 = vmatpush3.msra.mxu0 %v1470_v10 }
 0x75a   :  { %v725_v14 = vpop.f32.mrf.mxu1 }
 0x75c   :  { %v4051_v15 = vpop.f32.mrf.mxu1 }
 0x75d   :  { %v1468_v15 = vld [vmem:[%s5737_s2 + $0x28] sm:$0xff] }
 0x75f   :  { %v892_v16 = vpop.f32.mrf.mxu1 }
 0x760   :  { %897 = vrot.lane.b32.xlu0 %v892_v16, %s4747_s3  ;;  %v1467_v16 = vld [vmem:[%s5737_s2 + $0x20] sm:$0xff] }
 0x761   :  { %v4061_v17 = vpop.f32.mrf.mxu1 }
 0x762   :  { %v1466_v17 = vld [vmem:[%s5737_s2 + $0x18] sm:$0xff] }
 0x766   :  { %v1067_v19 = vpop.f32.mrf.mxu1 }
 0x768   :  { %v4071_v12 = vpop.f32.mrf.mxu1 }
 0x769   :  { %v1464_v12 = vld [vmem:[%s5737_s2 + $0x8] sm:$0xff] }
 0x76a   :  { %v1234_v20 = vpop.f32.mrf.mxu1 }
 0x76b   :  { %1239 = vrot.lane.b32.xlu1 %v1234_v20, %s4747_s3  ;;  %v1463_v20 = vld [vmem:[%s5737_s2] sm:$0xff] }
 0x76c   :  { %v4081_v21 = vpop.f32.mrf.mxu1 }
 0x76d   :  { %v319_v21 = vld [vmem:[#allocation4 + $0x6] ss:$0 sm:$0xff] }
 0x7d2   :  { %v898_v22 = vpop.permute.xlu0 %897 }
 0x7d3   :  { %v900_v23 = vsel %vm560_vm5, %v725_v14, %v898_v22  ;;  %v1469_v14 = vld [vmem:[%s5737_s2 + $0x30] sm:$0xff] }
 0x7d4   :  { %4090 = vmatprep.mubr.msk.f32.mxu1 %vm437_vm3, %v900_v23  ;;  %4122 = vmatprep.subr.mxu0 %v1469_v14 }
 0x7d5   :  { %4123 = vmatpush3.msra.mxu0 %v1469_v14 }
 0x7d6   :  { %4124 = vmatprep.subr.mxu0 %v1468_v15 }
 0x7d7   :  { %4125 = vmatpush3.msra.mxu0 %v1468_v15  ;;  %v321_v15 = vld [vmem:[#allocation4 + $0x10] ss:$0 sm:$0xff] }
 0x7d8   :  { %4126 = vmatprep.subr.mxu0 %v1467_v16 }
 0x7d9   :  { %4127 = vmatpush3.msra.mxu0 %v1467_v16 }
 0x7da   :  { %4128 = vmatprep.subr.mxu0 %v1466_v17 }
 0x7db   :  { %4129 = vmatpush3.msra.mxu0 %v1466_v17 }
 0x7dd   :  { %v1240_v24 = vpop.permute.xlu1 %1239 }
 0x7de   :  { %v1242_v25 = vsel %vm560_vm5, %v1067_v19, %v1240_v24  ;;  %v1465_v19 = vld [vmem:[%s5737_s2 + $0x10] sm:$0xff] }
 0x7df   :  { %4091 = vmatmul.mubr.msk.f32.vlgmr.msra.gmra.mxu1 %vm437_vm3, %v1242_v25  ;;  %4130 = vmatprep.subr.mxu0 %v1465_v19 }
 0x7e0   :  { %4094 = vmatpush3.msra.mxu1 %v1363_v44  ;;  %4131 = vmatpush3.msra.mxu0 %v1465_v19  ;;  %v322_v19 = vld [vmem:[#allocation4 + $0x11] ss:$0 sm:$0xff] }
 0x7e1   :  { %4132 = vmatprep.subr.mxu0 %v1464_v12 }
 0x7e2   :  { %4133 = vmatpush3.msra.mxu0 %v1464_v12 }
 0x7e3   :  { %4134 = vmatprep.subr.mxu0 %v1463_v20 }
 0x7e4   :  { %4135 = vmatpush3.msra.mxu0 %v1463_v20 }
 0x89f   :  { %v4092_v27 = vpop.f32.mrf.mxu1 }
 0x8a0   :  { %v1325_v28 = vadd.f32 %v4092_v27, %v316_v26 }
 0x8a1   :  { %v1319_v29 = vpop.f32.mrf.mxu1 }
 0x8a2   :  { %v1320_v30 = vadd.f32 %v1319_v29, %v316_v26  ;;  %v1329_v31 = vadd.f32 %v1325_v28, %v5061_v54 }
 0x8a4   :  { %v1333_v32 = vsel %vm437_vm3, %v1329_v31, 0.0  ;;  %v1328_v33 = vadd.f32 %v1320_v30, %v5057_v52  ;;  %v1362_v52 = vld [vmem:[#allocation9 + $0x10] sm:$0xff] }
 0x8a5   :  { %1334 = vadd.xlane.f32.xlu1 %v1333_v32  ;;  %4095 = vmatprep.subr.mxu1 %v1362_v52 }
 0x8a6   :  { %v1330_v34 = vsel %vm437_vm3, %v1328_v33, 0.0  ;;  %4096 = vmatpush3.msra.mxu1 %v1362_v52 }
 0x8a7   :  { %1331 = vadd.xlane.f32.xlu0 %v1330_v34  ;;  %4097 = vmatprep.subr.mxu1 %v1361_v45 }
 0x8a8   :  { %4098 = vmatpush3.msra.mxu1 %v1361_v45 }
 0x8a9   :  { %4099 = vmatprep.subr.mxu1 %v1360_v46 }
 0x8aa   :  { %4100 = vmatpush3.msra.mxu1 %v1360_v46 }
 0x8ab   :  { %4139 = vmatprep.subr.mxu1 %v4767_v11 }
 0x92e   :  { %v1335_v35 = vpop.xlane.xlu1 %1334 }
 0x92f   :  { %v1337_v36 = vmul.f32 0.03125, %v1335_v35 }
 0x930   :  { %v1332_v37 = vpop.xlane.xlu0 %1331 }
 0x931   :  { %v1336_v38 = vmul.f32 0.03125, %v1332_v37  ;;  %v1339_v39 = vsub.f32 %v1329_v31, %v1337_v36 }
 0x933   :  { %v1338_v40 = vsub.f32 %v1328_v33, %v1336_v38  ;;  %v1341_v43 = vmul.f32 %v1339_v39, %v1339_v39 }
 0x935   :  { %v1340_v41 = vmul.f32 %v1338_v40, %v1338_v40  ;;  %v1345_v54 = vsel %vm437_vm3, %v1341_v43, 0.0 }
 0x937   :  { %v1342_v42 = vsel %vm437_vm3, %v1340_v41, 0.0 }
 0x938   :  { %1343 = vadd.xlane.f32.xlu0 %v1342_v42 }
 0x93c   :  { %1346 = vadd.xlane.f32.xlu0 %v1345_v54  ;;  %v320_v54 = vld [vmem:[#allocation4 + $0x7] ss:$0 sm:$0xff] }
 0x9c1   :  { %v1344_v47 = vpop.xlane.xlu0 %1343 }
 0x9c2   :  { %v1348_v48 = vmul.f32 0.03125, %v1344_v47 }
 0x9c4   :  { %v1350_v49 = vadd.f32 1e-12, %v1348_v48 }
 0x9c5   :  { %v1347_v50 = vpop.xlane.xlu0 %1346 }
 0x9c6   :  { %4339 = vrsqrt.f32 %v1350_v49  ;;  %v1349_v51 = vmul.f32 0.03125, %v1347_v50 }
 0x9c8   :  { %v1351_v53 = vadd.f32 1e-12, %v1349_v51 }
 0x9ca   :  { %4341 = vrsqrt.f32 %v1351_v53 }
 0x9d3   :  { %v4340_v55 = vpop.eup %4339 }
 0x9d4   :  { %v1354_v58 = vmul.f32 %v4340_v55, %v1338_v40 }
 0x9d6   :  { %v1356_v61 = vmul.f32 %v1354_v58, %v317_v56 }
 0x9d7   :  { %v4342_v62 = vpop.eup %4341 }
 0x9d8   :  { %v1355_v63 = vmul.f32 %v4342_v62, %v1339_v39  ;;  %v5156_v57 = vadd.f32 %v1356_v61, %v318_v60 }
 0x9da   :  { %v1357_v0 = vmul.f32 %v1355_v63, %v317_v56  ;;  %4101 = vmatprep.mubr.msk.f32.mxu1 %vm437_vm3, %v5156_v57 }
 0x9dc   :  { %v5160_v59 = vadd.f32 %v1357_v0, %v318_v60 }
 0x9de   :  { %4102 = vmatmul.mubr.msk.f32.vlgmr.msra.gmra.mxu1 %vm437_vm3, %v5160_v59 }
 0x9df   :  { %4147 = vmatprep.mubr.msk.f32.mxu1 %vm4768_vm4, %v4767_v11 }
 0xa9e   :  { %v4103_v22 = vpop.f32.mrf.mxu1 }
 0xa9f   :  { %v1442_v23 = vadd.f32 %v4103_v22, %v319_v21 }
 0xaa0   :  { %v1436_v24 = vpop.f32.mrf.mxu1 }
 0xaa1   :  { %v1446_v25 = vmul.f32 %v1442_v23, %v1442_v23  ;;  %v1437_v26 = vadd.f32 %v1436_v24, %v319_v21 }
 0xaa3   :  { %v1448_v27 = vmul.f32 %v1446_v25, %v1442_v23  ;;  %v1445_v28 = vmul.f32 %v1437_v26, %v1437_v26 }
 0xaa5   :  { %v1450_v29 = vmul.f32 0.044715, %v1448_v27  ;;  %v1447_v30 = vmul.f32 %v1445_v28, %v1437_v26  ;;  %v1675_v27 = vld [vmem:[#allocation12 + $0x30] sm:$0xff]  ;;  %v1674_v28 = vld [vmem:[#allocation12 + $0x28] sm:$0xff] }
 0xaa7   :  { %v1452_v31 = vadd.f32 %v1450_v29, %v1442_v23  ;;  %v1449_v32 = vmul.f32 0.044715, %v1447_v30  ;;  %v1673_v29 = vld [vmem:[#allocation12 + $0x20] sm:$0xff]  ;;  %v1672_v30 = vld [vmem:[#allocation12 + $0x18] sm:$0xff] }
 0xaa9   :  { %v1454_v33 = vmul.f32 0.7978846, %v1452_v31  ;;  %v1451_v34 = vadd.f32 %v1449_v32, %v1437_v26  ;;  %v1671_v31 = vld [vmem:[#allocation12 + $0x10] sm:$0xff]  ;;  %v1670_v32 = vld [vmem:[#allocation12 + $0x8] sm:$0xff] }
 0xaab   :  { %4343 = vtanh.f32 %v1454_v33  ;;  %v1453_v35 = vmul.f32 0.7978846, %v1451_v34  ;;  %v1669_v33 = vld [vmem:[#allocation12] sm:$0xff]  ;;  %v2077_v34 = vld [vmem:[%s5692_s14] sm:$0xff] }
 0xaad   :  { %4345 = vtanh.f32 %v1453_v35  ;;  %v1795_v35 = vld [vmem:[%s5738_s11 + $0xf8] sm:$0xff] }
 0xab8   :  { %v4344_v36 = vpop.eup %4343 }
 0xab9   :  { %v1458_v37 = vadd.f32 1.0, %v4344_v36  ;;  %v323_v36 = vld [vmem:[#allocation4 + $0x12] ss:$0 sm:$0xff] }
 0xaba   :  { %v4346_v38 = vpop.eup %4345 }
 0xabb   :  { %v1457_v39 = vadd.f32 1.0, %v4346_v38  ;;  %v1460_v40 = vmul.f32 0.5, %v1458_v37 }
 0xabd   :  { %v1459_v41 = vmul.f32 0.5, %v1457_v39  ;;  %v1462_v43 = vmul.f32 %v1460_v40, %v1442_v23  ;;  %v1794_v40 = vld [vmem:[%s5738_s11 + $0xf0] sm:$0xff] }
 0xabf   :  { %v1461_v42 = vmul.f32 %v1459_v41, %v1437_v26  ;;  %v1676_v26 = vld [vmem:[#allocation12 + $0x38] sm:$0xff] }
 0xac1   :  { %4136 = vmatprep.mubr.f32.mxu0 %v1461_v42  ;;  %v1793_v42 = vld [vmem:[%s5738_s11 + $0xe8] sm:$0xff] }
 0xac2   :  { %4137 = vmatmul.mubr.f32.vlgmr.msra.gmra.mxu0 %v1462_v43  ;;  %v1792_v43 = vld [vmem:[%s5738_s11 + $0xe0] sm:$0xff] }
 0xb82   :  { %v4138_v44 = vpop.f32.mrf.mxu0 }
 0xb83   :  { %v1551_v52 = vadd.f32 %v4138_v44, %v320_v54  ;;  %v1790_v44 = vld [vmem:[%s5738_s11 + $0xd0] sm:$0xff] }
 0xb84   :  { %v1545_v45 = vpop.f32.mrf.mxu0 }
 0xb85   :  { %v1546_v46 = vadd.f32 %v1545_v45, %v320_v54  ;;  %v1555_v47 = vadd.f32 %v1551_v52, %v5160_v59  ;;  %v1594_v59 = vld [vmem:[#allocation10 + $0x18] sm:$0xff]  ;;  %v1791_v54 = vld [vmem:[%s5738_s11 + $0xd8] sm:$0xff]  ;;  %v1789_v52 = vld [vmem:[%s5738_s11 + $0xc8] sm:$0xff] }
 0xb86   :  { %4140 = vmatpush3.msra.mxu1 %v1594_v59  ;;  %v1788_v45 = vld [vmem:[%s5738_s11 + $0xc0] sm:$0xff]  ;;  %v1771_v59 = vld [vmem:[%s5738_s11 + $0x38] sm:$0xff] }
 0xb87   :  { %v1559_v48 = vsel %vm437_vm3, %v1555_v47, 0.0  ;;  %v1554_v49 = vadd.f32 %v1546_v46, %v5156_v57  ;;  %v2078_v57 = vld [vmem:[%s5692_s14 + $0x8] sm:$0xff]  ;;  %4141 = vmatprep.subr.mxu1 %v4767_v11  ;;  %v1787_v46 = vld [vmem:[%s5738_s11 + $0xb8] sm:$0xff] }
 0xb88   :  { %1560 = vadd.xlane.f32.xlu1 %v1559_v48  ;;  %4142 = vmatpush3.msra.mxu1 %v1593_v1  ;;  %v1785_v48 = vld [vmem:[%s5738_s11 + $0xa8] sm:$0xff]  ;;  %v1770_v1 = vld [vmem:[%s5738_s11 + $0x30] sm:$0xff] }
 0xb89   :  { %v1556_v50 = vsel %vm437_vm3, %v1554_v49, 0.0  ;;  %4143 = vmatprep.subr.mxu1 %v4767_v11 }
 0xb8a   :  { %1557 = vadd.xlane.f32.xlu0 %v1556_v50  ;;  %4144 = vmatpush3.msra.mxu1 %v1592_v2  ;;  %v1783_v50 = vld [vmem:[%s5738_s11 + $0x98] sm:$0xff]  ;;  %v1769_v2 = vld [vmem:[%s5738_s11 + $0x28] sm:$0xff] }
 0xb8b   :  { %4145 = vmatprep.subr.mxu1 %v4767_v11 }
 0xb8c   :  { %4146 = vmatpush3.msra.mxu1 %v1591_v3  ;;  %v1768_v3 = vld [vmem:[%s5738_s11 + $0x20] sm:$0xff] }
 0xb8d   :  { %1715 = vmatprep.subr.mxu1 %v1676_v26  ;;  %v1813_v26 = vld [vmem:[%s5738_s11 + $0x188] sm:$0xff] }
 0xc11   :  { %v1561_v51 = vpop.xlane.xlu1 %1560 }
 0xc12   :  { %v1563_v53 = vmul.f32 0.03125, %v1561_v51  ;;  %v1782_v51 = vld [vmem:[%s5738_s11 + $0x90] sm:$0xff] }
 0xc13   :  { %v1558_v55 = vpop.xlane.xlu0 %1557 }
 0xc14   :  { %v1565_v56 = vsub.f32 %v1555_v47, %v1563_v53  ;;  %v1562_v58 = vmul.f32 0.03125, %v1558_v55  ;;  %v1786_v47 = vld [vmem:[%s5738_s11 + $0xb0] sm:$0xff]  ;;  %v1781_v53 = vld [vmem:[%s5738_s11 + $0x88] sm:$0xff]  ;;  %v1780_v55 = vld [vmem:[%s5738_s11 + $0x80] sm:$0xff] }
 0xc16   :  { %v1564_v60 = vsub.f32 %v1554_v49, %v1562_v58  ;;  %v1567_v61 = vmul.f32 %v1565_v56, %v1565_v56  ;;  %v1784_v49 = vld [vmem:[%s5738_s11 + $0xa0] sm:$0xff]  ;;  %v1778_v58 = vld [vmem:[%s5738_s11 + $0x70] sm:$0xff] }
 0xc18   :  { %v1571_v62 = vsel %vm437_vm3, %v1567_v61, 0.0  ;;  %v1566_v63 = vmul.f32 %v1564_v60, %v1564_v60  ;;  %v1776_v61 = vld [vmem:[%s5738_s11 + $0x60] sm:$0xff] }
 0xc19   :  { %1572 = vadd.xlane.f32.xlu1 %v1571_v62  ;;  %v1775_v62 = vld [vmem:[%s5738_s11 + $0x58] sm:$0xff] }
 0xc1a   :  { %v1568_v0 = vsel %vm437_vm3, %v1566_v63, 0.0  ;;  %v1774_v63 = vld [vmem:[%s5738_s11 + $0x50] sm:$0xff] }
 0xc1b   :  { %1569 = vadd.xlane.f32.xlu0 %v1568_v0  ;;  %v1773_v0 = vld [vmem:[%s5738_s11 + $0x48] sm:$0xff] }
 0xc2a   :  { %2080 = vperm.xlu1 %4318, %v2077_v34   ;;  %v1805_v34 = vld [vmem:[%s5738_s11 + $0x148] sm:$0xff] }
 0xc31   :  { %2083 = vperm.xlu0 %4317, %v2078_v57   ;;  %v1772_v57 = vld [vmem:[%s5738_s11 + $0x40] sm:$0xff] }
 0xca2   :  { %v1573_v4 = vpop.xlane.xlu1 %1572 }
 0xca3   :  { %v1575_v6 = vmul.f32 0.03125, %v1573_v4  ;;  %v1767_v4 = vld [vmem:[%s5738_s11 + $0x18] sm:$0xff] }
 0xca4   :  { %v1570_v7 = vpop.xlane.xlu0 %1569 }
 0xca5   :  { %v1577_v8 = vadd.f32 1e-12, %v1575_v6  ;;  %v1574_v9 = vmul.f32 0.03125, %v1570_v7  ;;  %v1766_v6 = vld [vmem:[%s5738_s11 + $0x10] sm:$0xff]  ;;  %v1765_v7 = vld [vmem:[%s5738_s11 + $0x8] sm:$0xff] }
 0xca7   :  { %4347 = vrsqrt.f32 %v1577_v8  ;;  %v1576_v10 = vadd.f32 1e-12, %v1574_v9  ;;  %v1764_v8 = vld [vmem:[%s5738_s11] sm:$0xff]  ;;  %v1827_v9 = vld [vmem:[%s5738_s11 + $0x1f8] sm:$0xff] }
 0xca9   :  { %4349 = vrsqrt.f32 %v1576_v10  ;;  %v1826_v10 = vld [vmem:[%s5738_s11 + $0x1f0] sm:$0xff] }
 0xcb4   :  { %v4348_v14 = vpop.eup %4347 }
 0xcb5   :  { %v1581_v16 = vmul.f32 %v4348_v14, %v1565_v56  ;;  %v1779_v56 = vld [vmem:[%s5738_s11 + $0x78] sm:$0xff]  ;;  %v1825_v14 = vld [vmem:[%s5738_s11 + $0x1e8] sm:$0xff] }
 0xcb6   :  { %v4350_v17 = vpop.eup %4349 }
 0xcb7   :  { %v1580_v12 = vmul.f32 %v4350_v17, %v1564_v60  ;;  %v1583_v20 = vmul.f32 %v1581_v16, %v321_v15  ;;  %v1777_v60 = vld [vmem:[%s5738_s11 + $0x68] sm:$0xff]  ;;  %v1823_v16 = vld [vmem:[%s5738_s11 + $0x1d8] sm:$0xff]  ;;  %v1822_v17 = vld [vmem:[%s5738_s11 + $0x1d0] sm:$0xff] }
 0xcb9   :  { %v1582_v21 = vmul.f32 %v1580_v12, %v321_v15  ;;  %v1585_v22 = vadd.f32 %v1583_v20, %v322_v19  ;;  %v1824_v15 = vld [vmem:[%s5738_s11 + $0x1e0] sm:$0xff]  ;;  %v1819_v20 = vld [vmem:[%s5738_s11 + $0x1b8] sm:$0xff] }
 0xcba   :  { %v1820_v12 = vld [vmem:[%s5738_s11 + $0x1c0] sm:$0xff] }
 0xcbb   :  { %v1584_v23 = vadd.f32 %v1582_v21, %v322_v19  ;;  %v1587_v24 = vrot.slane %v1585_v22, 7  ;;  %v1821_v19 = vld [vmem:[%s5738_s11 + $0x1c8] sm:$0xff]  ;;  %v1818_v21 = vld [vmem:[%s5738_s11 + $0x1b0] sm:$0xff] }
 0xcbc   :  { %v1817_v22 = vld [vmem:[%s5738_s11 + $0x1a8] sm:$0xff] }
 0xcbd   :  { %v1590_v25 = vsel %vm1589_vm7, %v1584_v23, %v1587_v24  ;;  %v1816_v23 = vld [vmem:[%s5738_s11 + $0x1a0] sm:$0xff]  ;;  %v1815_v24 = vld [vmem:[%s5738_s11 + $0x198] sm:$0xff] }
 0xcbe   :  { %4148 = vmatmul.mubr.msk.f32.vlgmr.msra.gmra.mxu1 %vm437_vm3, %v1590_v25  ;;  %v1814_v25 = vld [vmem:[%s5738_s11 + $0x190] sm:$0xff] }
 0xcbf   :  { %1755 = vmatprep.mubr.f32.mxu1 %v4767_v11  ;;  %1716 = vmatpush1.msra.mxu1 %v1675_v27  ;;  %v1812_v27 = vld [vmem:[%s5738_s11 + $0x180] sm:$0xff] }
 0xcc0   :  { %1717 = vmatprep.subr.mxu1 %v1674_v28  ;;  %v1811_v28 = vld [vmem:[%s5738_s11 + $0x178] sm:$0xff] }
 0xcc1   :  { %1718 = vmatpush1.msra.mxu1 %v1673_v29  ;;  %v1810_v29 = vld [vmem:[%s5738_s11 + $0x170] sm:$0xff] }
 0xcc2   :  { %1719 = vmatprep.subr.mxu1 %v1672_v30  ;;  %v1809_v30 = vld [vmem:[%s5738_s11 + $0x168] sm:$0xff] }
 0xcc3   :  { %1720 = vmatpush1.msra.mxu1 %v1671_v31  ;;  %v1808_v31 = vld [vmem:[%s5738_s11 + $0x160] sm:$0xff] }
 0xcc4   :  { %1721 = vmatprep.subr.mxu1 %v1670_v32  ;;  %v1807_v32 = vld [vmem:[%s5738_s11 + $0x158] sm:$0xff] }
 0xcc5   :  { %1722 = vmatpush1.msra.mxu1 %v1669_v33  ;;  %v1806_v33 = vld [vmem:[%s5738_s11 + $0x150] sm:$0xff] }
 0xcc6   :  { %1839 = vmatprep.subr.mxu1 %v1795_v35  ;;  %v1804_v35 = vld [vmem:[%s5738_s11 + $0x140] sm:$0xff] }
 0xd7e   :  { %v1664_v37 = vpop.f32.mrf.mxu1 }
 0xd7f   :  { %v1665_v38 = vadd.f32 %v1664_v37, %v323_v36  ;;  %v1803_v36 = vld [vmem:[%s5738_s11 + $0x138] sm:$0xff]  ;;  %v1802_v37 = vld [vmem:[%s5738_s11 + $0x130] sm:$0xff] }
 0xd80   :  { %v4149_v39 = vpop.f32.mrf.mxu1 }
 0xd81   :  { %4351 = vtanh.f32 %v1665_v38  ;;  %v1801_v38 = vld [vmem:[%s5738_s11 + $0x128] sm:$0xff]  ;;  %v1800_v39 = vld [vmem:[%s5738_s11 + $0x120] sm:$0xff] }
 0xd8e   :  { %v4352_v41 = vpop.eup %4351 }
 0xd8f   :  { %3853 = vmatmul.mubr.msk.f32.vlgmr.msra.gmra.mxu1 %vm437_vm3, %v4352_v41  ;;  %v1798_v41 = vld [vmem:[%s5738_s11 + $0x110] sm:$0xff] }
 0xd90   :  { %1840 = vmatpush1.msra.mxu1 %v1794_v40  ;;  %v1799_v40 = vld [vmem:[%s5738_s11 + $0x118] sm:$0xff] }
 0xd91   :  { %1841 = vmatprep.subr.mxu1 %v1793_v42  ;;  %v1797_v42 = vld [vmem:[%s5738_s11 + $0x108] sm:$0xff] }
 0xd92   :  { %1842 = vmatpush1.msra.mxu1 %v1792_v43  ;;  %v1796_v43 = vld [vmem:[%s5738_s11 + $0x100] sm:$0xff] }
 0xd93   :  { %1843 = vmatprep.subr.mxu1 %v1791_v54  ;;  %v5428_v54 = vld [vmem:[%s5694_s16 + $0x38] sm:$0xff] }
 0xd94   :  { %1844 = vmatpush1.msra.mxu1 %v1790_v44  ;;  %v1943_v44 = vld [vmem:[#allocation13 + $0xf8] sm:$0xff] }
 0xd95   :  { %1845 = vmatprep.subr.mxu1 %v1789_v52  ;;  %v1942_v52 = vld [vmem:[#allocation13 + $0xf0] sm:$0xff]  ;;  %1987 = vmatprep.subr.mxu0 %v1943_v44 }
 0xd96   :  { %1846 = vmatpush1.msra.mxu1 %v1788_v45  ;;  %v1941_v45 = vld [vmem:[#allocation13 + $0xe8] sm:$0xff]  ;;  %1988 = vmatpush1.msra.mxu0 %v1942_v52  ;;  %v2081_v52 = vpop.permute.xlu1 %2080 }
 0xd97   :  { %1847 = vmatprep.subr.mxu1 %v1787_v46  ;;  %v1940_v46 = vld [vmem:[#allocation13 + $0xe0] sm:$0xff]  ;;  %1989 = vmatprep.subr.mxu0 %v1941_v45  ;;  %vm2085_vm8 = vcmp.eq.s32.totalorder %v2081_v52, %v5044_v13  ;;  %v2060_v52 = vld [vmem:[#allocation18] ss:$0 sm:$0xff] }
 0xd98   :  { %1848 = vmatpush1.msra.mxu1 %v1786_v47  ;;  %v1939_v47 = vld [vmem:[#allocation13 + $0xd8] sm:$0xff]  ;;  %1990 = vmatpush1.msra.mxu0 %v1940_v46 }
 0xd99   :  { %1849 = vmatprep.subr.mxu1 %v1785_v48  ;;  %v1938_v48 = vld [vmem:[#allocation13 + $0xd0] sm:$0xff]  ;;  %1991 = vmatprep.subr.mxu0 %v1939_v47 }
 0xd9a   :  { %1850 = vmatpush1.msra.mxu1 %v1784_v49  ;;  %v1937_v49 = vld [vmem:[#allocation13 + $0xc8] sm:$0xff]  ;;  %1992 = vmatpush1.msra.mxu0 %v1938_v48 }
 0xd9b   :  { %1851 = vmatprep.subr.mxu1 %v1783_v50  ;;  %v1936_v50 = vld [vmem:[#allocation13 + $0xc0] sm:$0xff]  ;;  %1993 = vmatprep.subr.mxu0 %v1937_v49 }
 0xd9c   :  { %1852 = vmatpush1.msra.mxu1 %v1782_v51  ;;  %v1935_v51 = vld [vmem:[#allocation13 + $0xb8] sm:$0xff]  ;;  %1994 = vmatpush1.msra.mxu0 %v1936_v50  ;;  %v3854_v50 = vsel %vm2085_vm8, 1.0, %v4767_v11 }
 0xd9d   :  { %1853 = vmatprep.subr.mxu1 %v1781_v53  ;;  %v1934_v53 = vld [vmem:[#allocation13 + $0xb0] sm:$0xff]  ;;  %1995 = vmatprep.subr.mxu0 %v1935_v51  ;;  %v2097_v51 = vld [vmem:[%s5694_s16 + $0x30] sm:$0xff] }
 0xd9e   :  { %1854 = vmatpush1.msra.mxu1 %v1780_v55  ;;  %v1933_v55 = vld [vmem:[#allocation13 + $0xa8] sm:$0xff]  ;;  %1996 = vmatpush1.msra.mxu0 %v1934_v53  ;;  %v2096_v53 = vld [vmem:[%s5694_s16 + $0x28] sm:$0xff] }
 0xd9f   :  { %1855 = vmatprep.subr.mxu1 %v1779_v56  ;;  %v1932_v56 = vld [vmem:[#allocation13 + $0xa0] sm:$0xff]  ;;  %1997 = vmatprep.subr.mxu0 %v1933_v55  ;;  %v2095_v55 = vld [vmem:[%s5694_s16 + $0x20] sm:$0xff] }
 0xda0   :  { %1856 = vmatpush1.msra.mxu1 %v1778_v58  ;;  %v1931_v58 = vld [vmem:[#allocation13 + $0x98] sm:$0xff]  ;;  %1998 = vmatpush1.msra.mxu0 %v1932_v56  ;;  %v2094_v56 = vld [vmem:[%s5694_s16 + $0x18] sm:$0xff] }
 0xda1   :  { %1857 = vmatprep.subr.mxu1 %v1777_v60  ;;  %v1930_v60 = vld [vmem:[#allocation13 + $0x90] sm:$0xff]  ;;  %1999 = vmatprep.subr.mxu0 %v1931_v58  ;;  %v2084_v58 = vpop.permute.xlu0 %2083 }
 0xda2   :  { %1858 = vmatpush1.msra.mxu1 %v1776_v61  ;;  %v1929_v61 = vld [vmem:[#allocation13 + $0x88] sm:$0xff]  ;;  %2000 = vmatpush1.msra.mxu0 %v1930_v60  ;;  %v2092_v60 = vld [vmem:[%s5694_s16 + $0x8] sm:$0xff]  ;;  %vm2086_vm9 = vcmp.eq.s32.totalorder %v2084_v58, %v5044_v13 }
 0xda3   :  { %1859 = vmatprep.subr.mxu1 %v1775_v62  ;;  %v1928_v62 = vld [vmem:[#allocation13 + $0x80] sm:$0xff]  ;;  %2001 = vmatprep.subr.mxu0 %v1929_v61  ;;  %v2091_v61 = vld [vmem:[%s5694_s16] sm:$0xff]  ;;  %v2062_v58 = vld [vmem:[#allocation18 + $0x2] ss:$0 sm:$0xff] }
 0xda4   :  { %1860 = vmatpush1.msra.mxu1 %v1774_v63  ;;  %v1927_v63 = vld [vmem:[#allocation13 + $0x78] sm:$0xff]  ;;  %2002 = vmatpush1.msra.mxu0 %v1928_v62  ;;  %v3855_v62 = vsel %vm2086_vm9, 1.0, %v4767_v11  ;;  %v1948_v13 = vld [vmem:[#allocation13 + $0x120] sm:$0xff] }
 0xda5   :  { %1861 = vmatprep.subr.mxu1 %v1773_v0  ;;  %v1926_v0 = vld [vmem:[#allocation13 + $0x70] sm:$0xff]  ;;  %2003 = vmatprep.subr.mxu0 %v1927_v63  ;;  %v1951_v63 = vld [vmem:[#allocation13 + $0x138] sm:$0xff] }
 0xda6   :  { %1862 = vmatpush1.msra.mxu1 %v1772_v57  ;;  %v1925_v57 = vld [vmem:[#allocation13 + $0x68] sm:$0xff]  ;;  %2004 = vmatpush1.msra.mxu0 %v1926_v0  ;;  %v1950_v0 = vld [vmem:[#allocation13 + $0x130] sm:$0xff] }
 0xda7   :  { %1863 = vmatprep.subr.mxu1 %v1771_v59  ;;  %v1924_v59 = vld [vmem:[#allocation13 + $0x60] sm:$0xff]  ;;  %2005 = vmatprep.subr.mxu0 %v1925_v57  ;;  %v1949_v57 = vld [vmem:[#allocation13 + $0x128] sm:$0xff] }
 0xda8   :  { %1864 = vmatpush1.msra.mxu1 %v1770_v1  ;;  %v1923_v1 = vld [vmem:[#allocation13 + $0x58] sm:$0xff]  ;;  %2006 = vmatpush1.msra.mxu0 %v1924_v59 }
 0xda9   :  { %1865 = vmatprep.subr.mxu1 %v1769_v2  ;;  %v1922_v2 = vld [vmem:[#allocation13 + $0x50] sm:$0xff]  ;;  %2007 = vmatprep.subr.mxu0 %v1923_v1  ;;  %v1947_v59 = vld [vmem:[#allocation13 + $0x118] sm:$0xff] }
 0xdaa   :  { %1866 = vmatpush1.msra.mxu1 %v1768_v3  ;;  %v1921_v3 = vld [vmem:[#allocation13 + $0x48] sm:$0xff]  ;;  %2008 = vmatpush1.msra.mxu0 %v1922_v2  ;;  %v1946_v1 = vld [vmem:[#allocation13 + $0x110] sm:$0xff] }
 0xdab   :  { %1867 = vmatprep.subr.mxu1 %v1767_v4  ;;  %v1920_v4 = vld [vmem:[#allocation13 + $0x40] sm:$0xff]  ;;  %2009 = vmatprep.subr.mxu0 %v1921_v3  ;;  %v1945_v2 = vld [vmem:[#allocation13 + $0x108] sm:$0xff] }
 0xdac   :  { %1868 = vmatpush1.msra.mxu1 %v1766_v6  ;;  %v1919_v6 = vld [vmem:[#allocation13 + $0x38] sm:$0xff]  ;;  %2010 = vmatpush1.msra.mxu0 %v1920_v4  ;;  %v1944_v3 = vld [vmem:[#allocation13 + $0x100] sm:$0xff] }
 0xdad   :  { %1869 = vmatprep.subr.mxu1 %v1765_v7  ;;  %v1918_v7 = vld [vmem:[#allocation13 + $0x30] sm:$0xff]  ;;  %2011 = vmatprep.subr.mxu0 %v1919_v6 }
 0xdae   :  { %1870 = vmatpush1.msra.mxu1 %v1764_v8  ;;  %v1917_v8 = vld [vmem:[#allocation13 + $0x28] sm:$0xff]  ;;  %2012 = vmatpush1.msra.mxu0 %v1918_v7  ;;  %v327_v4 = vld [vmem:[#allocation4 + $0x14] ss:$8 sm:$0x3] }
 0xdaf   :  { %1871 = vmatprep.subr.mxu1 %v1827_v9  ;;  %v1916_v9 = vld [vmem:[#allocation13 + $0x20] sm:$0xff]  ;;  %2013 = vmatprep.subr.mxu0 %v1917_v8  ;;  %v1832_v6 = vrot.slane %v327_v4, %v5108_v5  ;;  %v1836_v7 = vrot.slane %v327_v4, %v5112_v18 }
 0xdb0   :  { %1872 = vmatpush2.msra.mxu1 %v1826_v10  ;;  %v1915_v10 = vld [vmem:[#allocation13 + $0x18] sm:$0xff]  ;;  %2014 = vmatpush1.msra.mxu0 %v1916_v9 }
 0xdb1   :  { %1873 = vmatprep.subr.mxu1 %v1825_v14  ;;  %v1914_v14 = vld [vmem:[#allocation13 + $0x10] sm:$0xff]  ;;  %2015 = vmatprep.subr.mxu0 %v1915_v10 }
 0xdb2   :  { %1874 = vmatpush2.msra.mxu1 %v1824_v15  ;;  %v1913_v15 = vld [vmem:[#allocation13 + $0x8] sm:$0xff]  ;;  %2016 = vmatpush1.msra.mxu0 %v1914_v14 }
 0xdb3   :  { %1875 = vmatprep.subr.mxu1 %v1823_v16  ;;  %v1912_v16 = vld [vmem:[#allocation13] sm:$0xff]  ;;  %2017 = vmatprep.subr.mxu0 %v1913_v15 }
 0xdb4   :  { %1876 = vmatpush2.msra.mxu1 %v1822_v17  ;;  %v1975_v17 = vld [vmem:[#allocation13 + $0x1f8] sm:$0xff]  ;;  %2018 = vmatpush1.msra.mxu0 %v1912_v16 }
 0xdb5   :  { %1877 = vmatprep.subr.mxu1 %v1821_v19  ;;  %v1974_v19 = vld [vmem:[#allocation13 + $0x1f0] sm:$0xff]  ;;  %2019 = vmatprep.subr.mxu0 %v1975_v17  ;;  %v2099_v17 = vld [vmem:[#allocation15] sm:$0xff] }
 0xdb6   :  { %1878 = vmatpush2.msra.mxu1 %v1820_v12  ;;  %v1973_v12 = vld [vmem:[#allocation13 + $0x1e8] sm:$0xff]  ;;  %2020 = vmatpush2.msra.mxu0 %v1974_v19 }
 0xdb7   :  { %1879 = vmatprep.subr.mxu1 %v1819_v20  ;;  %v1972_v20 = vld [vmem:[#allocation13 + $0x1e0] sm:$0xff]  ;;  %2021 = vmatprep.subr.mxu0 %v1973_v12 }
 0xdb8   :  { %1880 = vmatpush2.msra.mxu1 %v1818_v21  ;;  %v1971_v21 = vld [vmem:[#allocation13 + $0x1d8] sm:$0xff]  ;;  %2022 = vmatpush2.msra.mxu0 %v1972_v20 }
 0xdb9   :  { %1881 = vmatprep.subr.mxu1 %v1817_v22  ;;  %v1970_v22 = vld [vmem:[#allocation13 + $0x1d0] sm:$0xff]  ;;  %2023 = vmatprep.subr.mxu0 %v1971_v21 }
 0xdba   :  { %1882 = vmatpush2.msra.mxu1 %v1816_v23  ;;  %v1969_v23 = vld [vmem:[#allocation13 + $0x1c8] sm:$0xff]  ;;  %2024 = vmatpush2.msra.mxu0 %v1970_v22 }
 0xdbb   :  { %1883 = vmatprep.subr.mxu1 %v1815_v24  ;;  %v1968_v24 = vld [vmem:[#allocation13 + $0x1c0] sm:$0xff]  ;;  %2025 = vmatprep.subr.mxu0 %v1969_v23 }
 0xdbc   :  { %1884 = vmatpush2.msra.mxu1 %v1814_v25  ;;  %v1967_v25 = vld [vmem:[#allocation13 + $0x1b8] sm:$0xff]  ;;  %2026 = vmatpush2.msra.mxu0 %v1968_v24 }
 0xdbd   :  { %1885 = vmatprep.subr.mxu1 %v1813_v26  ;;  %v1966_v26 = vld [vmem:[#allocation13 + $0x1b0] sm:$0xff]  ;;  %2027 = vmatprep.subr.mxu0 %v1967_v25 }
 0xdbe   :  { %1886 = vmatpush2.msra.mxu1 %v1812_v27  ;;  %v1965_v27 = vld [vmem:[#allocation13 + $0x1a8] sm:$0xff]  ;;  %2028 = vmatpush2.msra.mxu0 %v1966_v26 }
 0xdbf   :  { %1887 = vmatprep.subr.mxu1 %v1811_v28  ;;  %v1964_v28 = vld [vmem:[#allocation13 + $0x1a0] sm:$0xff]  ;;  %2029 = vmatprep.subr.mxu0 %v1965_v27 }
 0xdc0   :  { %1888 = vmatpush2.msra.mxu1 %v1810_v29  ;;  %v1963_v29 = vld [vmem:[#allocation13 + $0x198] sm:$0xff]  ;;  %2030 = vmatpush2.msra.mxu0 %v1964_v28 }
 0xdc1   :  { %1889 = vmatprep.subr.mxu1 %v1809_v30  ;;  %v1962_v30 = vld [vmem:[#allocation13 + $0x190] sm:$0xff]  ;;  %2031 = vmatprep.subr.mxu0 %v1963_v29 }
 0xdc2   :  { %1890 = vmatpush2.msra.mxu1 %v1808_v31  ;;  %v1961_v31 = vld [vmem:[#allocation13 + $0x188] sm:$0xff]  ;;  %2032 = vmatpush2.msra.mxu0 %v1962_v30 }
 0xdc3   :  { %1891 = vmatprep.subr.mxu1 %v1807_v32  ;;  %v1960_v32 = vld [vmem:[#allocation13 + $0x180] sm:$0xff]  ;;  %2033 = vmatprep.subr.mxu0 %v1961_v31 }
 0xdc4   :  { %1892 = vmatpush2.msra.mxu1 %v1806_v33  ;;  %v1959_v33 = vld [vmem:[#allocation13 + $0x178] sm:$0xff]  ;;  %2034 = vmatpush2.msra.mxu0 %v1960_v32 }
 0xdc5   :  { %1893 = vmatprep.subr.mxu1 %v1805_v34  ;;  %v1958_v34 = vld [vmem:[#allocation13 + $0x170] sm:$0xff]  ;;  %2035 = vmatprep.subr.mxu0 %v1959_v33 }
 0xdc6   :  { %1894 = vmatpush2.msra.mxu1 %v1804_v35  ;;  %v1957_v35 = vld [vmem:[#allocation13 + $0x168] sm:$0xff]  ;;  %2036 = vmatpush2.msra.mxu0 %v1958_v34 }
 0xdc7   :  { %1895 = vmatprep.subr.mxu1 %v1803_v36  ;;  %v1956_v36 = vld [vmem:[#allocation13 + $0x160] sm:$0xff]  ;;  %2037 = vmatprep.subr.mxu0 %v1957_v35 }
 0xdc8   :  { %1896 = vmatpush2.msra.mxu1 %v1802_v37  ;;  %v1955_v37 = vld [vmem:[#allocation13 + $0x158] sm:$0xff]  ;;  %2038 = vmatpush2.msra.mxu0 %v1956_v36  ;;  %v2214_v34 = vld [vmem:[#allocation19 + $0x18] sm:$0xff] }
 0xdc9   :  { %1897 = vmatprep.subr.mxu1 %v1801_v38  ;;  %v1954_v38 = vld [vmem:[#allocation13 + $0x150] sm:$0xff]  ;;  %2039 = vmatprep.subr.mxu0 %v1955_v37  ;;  %v2213_v35 = vld [vmem:[#allocation19 + $0x10] sm:$0xff] }
 0xdca   :  { %1898 = vmatpush2.msra.mxu1 %v1800_v39  ;;  %v1953_v39 = vld [vmem:[#allocation13 + $0x148] sm:$0xff]  ;;  %2040 = vmatpush2.msra.mxu0 %v1954_v38  ;;  %v2212_v36 = vld [vmem:[#allocation19 + $0x8] sm:$0xff] }
 0xdcb   :  { %1899 = vmatprep.subr.mxu1 %v1799_v40  ;;  %v1952_v40 = vld [vmem:[#allocation13 + $0x140] sm:$0xff]  ;;  %2041 = vmatprep.subr.mxu0 %v1953_v39  ;;  %v2211_v37 = vld [vmem:[#allocation19] sm:$0xff] }
 0xdcc   :  { %1900 = vmatpush2.msra.mxu1 %v1798_v41  ;;  %2042 = vmatpush2.msra.mxu0 %v1952_v40  ;;  %v325_v41 = vld [vmem:[#allocation4 + $0x13] ss:$8 sm:$0x3] }
 0xdcd   :  { %1901 = vmatprep.subr.mxu1 %v1797_v42  ;;  %v1681_v42 = vrot.slane %v325_v41, %v5108_v5  ;;  %2043 = vmatprep.subr.mxu0 %v1951_v63 }
 0xdce   :  { %1902 = vmatpush2.msra.mxu1 %v1796_v43  ;;  %v1685_v43 = vrot.slane %v325_v41, %v5112_v18  ;;  %2044 = vmatpush2.msra.mxu0 %v1950_v0 }
 0xdcf   :  { %4150 = vmatprep.subr.mxu1 %v5428_v54  ;;  %2045 = vmatprep.subr.mxu0 %v1949_v57 }
 0xdd0   :  { %2046 = vmatpush2.msra.mxu0 %v1948_v13 }
 0xdd1   :  { %2047 = vmatprep.subr.mxu0 %v1947_v59 }
 0xdd2   :  { %2048 = vmatpush2.msra.mxu0 %v1946_v1 }
 0xdd3   :  { %2049 = vmatprep.subr.mxu0 %v1945_v2  ;;  %v2296_v2 = vld [vmem:[%s5693_s15] sm:$0x3] }
 0xdd4   :  { %2050 = vmatpush2.msra.mxu0 %v1944_v3  ;;  %v2297_v3 = vsub.f32 1.0, %v2296_v2 }
 0xdd5   :  { %4169 = vmatprep.subr.mxu0 %v2214_v34 }
 0xdd6   :  { %v2298_v4 = vmul.f32 -1e+09, %v2297_v3 }
 0xe4f   :  { %v1757_v44 = vpop.f32.mrf.mxu1 }
 0xe50   :  { %v1758_v45 = vadd.f32 %v1757_v44, %v1681_v42 }
 0xe51   :  { %v1759_v46 = vpop.f32.mrf.mxu1 }
 0xe52   :  { %v1760_v47 = vadd.f32 %v1759_v46, %v1685_v43  ;;  %v1762_v49 = vmax.f32 %v1758_v45, 0.0 }
 0xe54   :  { %v1763_v48 = vmax.f32 %v1760_v47, 0.0 }
 0xe56   :  { %1903 = vmatprep.mubr.f32.mxu1 %v1763_v48 }
 0xe57   :  { %1904 = vmatmul.mubr.f32.vlgmr.msra.gmra.mxu1 %v1762_v49  ;;  %v2061_v49 = vld [vmem:[#allocation18 + $0x1] ss:$0 sm:$0xff] }
 0xe58   :  { %4151 = vmatpush3.msra.mxu1 %v5428_v54  ;;  %4166 = vmatprep.mubr.msk.f32.mxu1 %vm355_vm0, %v3854_v50  ;;  %v2093_v54 = vld [vmem:[%s5694_s16 + $0x10] sm:$0xff] }
 0xe59   :  { %4152 = vmatprep.subr.mxu1 %v2097_v51 }
 0xe5a   :  { %4153 = vmatpush3.msra.mxu1 %v2097_v51 }
 0xe5b   :  { %4154 = vmatprep.subr.mxu1 %v2096_v53 }
 0xe5c   :  { %4155 = vmatpush3.msra.mxu1 %v2096_v53 }
 0xe5d   :  { %4156 = vmatprep.subr.mxu1 %v2095_v55 }
 0xe5e   :  { %4157 = vmatpush3.msra.mxu1 %v2095_v55 }
 0xe5f   :  { %4158 = vmatprep.subr.mxu1 %v2094_v56 }
 0xe60   :  { %4159 = vmatpush3.msra.mxu1 %v2094_v56 }
 0xe61   :  { %4160 = vmatprep.subr.mxu1 %v2093_v54 }
 0xe62   :  { %4161 = vmatpush3.msra.mxu1 %v2093_v54 }
 0xe63   :  { %4162 = vmatprep.subr.mxu1 %v2092_v60 }
 0xe64   :  { %4163 = vmatpush3.msra.mxu1 %v2092_v60 }
 0xe65   :  { %4164 = vmatprep.subr.mxu1 %v2091_v61 }
 0xe66   :  { %4165 = vmatpush3.msra.mxu1 %v2091_v61 }
 0xe67   :  { %4167 = vmatmul.mubr.msk.f32.vlgmr.msra.gmra.mxu1 %vm355_vm0, %v3855_v62  ;;  %4180 = vmatprep.subr.mxu1 %v4767_v11 }
 0xe68   :  { %4182 = vmatprep.mubr.msk.f32.mxu1 %vm4768_vm4, %v4767_v11 }
 0xf17   :  { %v1905_v8 = vpop.f32.mrf.mxu1 }
 0xf18   :  { %v1906_v9 = vadd.f32 %v1905_v8, %v1832_v6  ;;  %v2380_v6 = vrot.slane %v2298_v4, %v5108_v5 }
 0xf19   :  { %v1907_v10 = vpop.f32.mrf.mxu1 }
 0xf1a   :  { %v1908_v14 = vadd.f32 %v1907_v10, %v1836_v7  ;;  %v1910_v16 = vmax.f32 %v1906_v9, 0.0 }
 0xf1c   :  { %v1911_v15 = vmax.f32 %v1908_v14, 0.0 }
 0xf1e   :  { %2051 = vmatprep.mubr.f32.mxu0 %v1911_v15 }
 0xf1f   :  { %2052 = vmatmul.mubr.f32.vlgmr.msra.gmra.mxu0 %v1910_v16 }
 0xf20   :  { %4170 = vmatpush3.msra.mxu0 %v2214_v34 }
 0xf21   :  { %4171 = vmatprep.subr.mxu0 %v2213_v35 }
 0xf22   :  { %4172 = vmatpush3.msra.mxu0 %v2213_v35 }
 0xf23   :  { %4173 = vmatprep.subr.mxu0 %v2212_v36 }
 0xf24   :  { %4174 = vmatpush3.msra.mxu0 %v2212_v36 }
 0xf25   :  { %4175 = vmatprep.subr.mxu0 %v2211_v37 }
 0xf26   :  { %4176 = vmatpush3.msra.mxu0 %v2211_v37 }
 0xf27   :  { %v4168_v19 = vpop.f32.mrf.mxu1  ;;  %4190 = vmatprep.subr.mxu0 %v4767_v11 }
 0xf28   :  { %v2178_v12 = vadd.f32 %v4168_v19, %v2099_v17 }
 0xf29   :  { %v2172_v20 = vpop.f32.mrf.mxu1 }
 0xf2a   :  { %v2173_v21 = vadd.f32 %v2172_v20, %v2099_v17  ;;  %v2184_v22 = vsel %vm437_vm3, %v2178_v12, 0.0  ;;  %v2722_v20 = vrot.slane %v2298_v4, %v5112_v18 }
 0xf2b   :  { %2185 = vadd.xlane.f32.xlu0 %v2184_v22 }
 0xf2c   :  { %v2181_v23 = vsel %vm437_vm3, %v2173_v21, 0.0 }
 0xf2d   :  { %2182 = vadd.xlane.f32.xlu1 %v2181_v23 }
 0xfb4   :  { %v2186_v24 = vpop.xlane.xlu0 %2185 }
 0xfb5   :  { %v2188_v25 = vmul.f32 0.03125, %v2186_v24 }
 0xfb6   :  { %v2183_v26 = vpop.xlane.xlu1 %2182 }
 0xfb7   :  { %v2190_v27 = vsub.f32 %v2178_v12, %v2188_v25  ;;  %v2187_v28 = vmul.f32 0.03125, %v2183_v26 }
 0xfb9   :  { %v2189_v29 = vsub.f32 %v2173_v21, %v2187_v28  ;;  %v2192_v30 = vmul.f32 %v2190_v27, %v2190_v27 }
 0xfbb   :  { %v2196_v31 = vsel %vm437_vm3, %v2192_v30, 0.0  ;;  %v2191_v32 = vmul.f32 %v2189_v29, %v2189_v29 }
 0xfbc   :  { %2197 = vadd.xlane.f32.xlu0 %v2196_v31 }
 0xfbd   :  { %v2193_v33 = vsel %vm437_vm3, %v2191_v32, 0.0 }
 0xfbe   :  { %2194 = vadd.xlane.f32.xlu1 %v2193_v33 }
 0xfdf   :  { %v5481_v55 = vpop.f32.mrf.mxu0 }
 0xfe1   :  { %v5483_v56 = vpop.f32.mrf.mxu0 }
0x1045   :  { %v2198_v38 = vpop.xlane.xlu0 %2197 }
0x1046   :  { %v2200_v39 = vmul.f32 0.03125, %v2198_v38 }
0x1047   :  { %v2195_v40 = vpop.xlane.xlu1 %2194 }
0x1048   :  { %v2202_v41 = vadd.f32 1e-12, %v2200_v39  ;;  %v2199_v42 = vmul.f32 0.03125, %v2195_v40 }
0x104a   :  { %4353 = vrsqrt.f32 %v2202_v41  ;;  %v2201_v43 = vadd.f32 1e-12, %v2199_v42 }
0x104c   :  { %4355 = vrsqrt.f32 %v2201_v43 }
0x1057   :  { %v4354_v44 = vpop.eup %4353 }
0x1058   :  { %v2206_v45 = vmul.f32 %v4354_v44, %v2190_v27 }
0x1059   :  { %v4356_v46 = vpop.eup %4355 }
0x105a   :  { %v2205_v47 = vmul.f32 %v4356_v46, %v2189_v29  ;;  %v2208_v48 = vmul.f32 %v2206_v45, %v2060_v52 }
0x105c   :  { %v2207_v50 = vmul.f32 %v2205_v47, %v2060_v52  ;;  %v5473_v53 = vadd.f32 %v2208_v48, %v2061_v49 }
0x105e   :  { %v5471_v51 = vadd.f32 %v2207_v50, %v2061_v49 }
0x1060   :  { %4177 = vmatprep.mubr.msk.f32.mxu0 %vm437_vm3, %v5471_v51 }
0x1061   :  { %4178 = vmatmul.mubr.msk.f32.vlgmr.msra.gmra.mxu0 %vm437_vm3, %v5473_v53 }
0x1062   :  { %4192 = vmatprep.mubr.msk.f32.mxu0 %vm4768_vm4, %v4767_v11 }
0x1121   :  { %v4179_v54 = vpop.f32.mrf.mxu0 }
0x1122   :  { %v5491_v62 = vadd.f32 %v4179_v54, %v2062_v58 }
0x1123   :  { %v2287_v60 = vpop.f32.mrf.mxu0 }
0x1124   :  { %v5485_v61 = vadd.f32 %v2287_v60, %v2062_v58 }
0x1126   :  { %2471 = vrot.lane.b32.xlu0 %v5485_v61, %s4769_s7  ;;  %2300 = vrot.lane.b32.xlu1 %v5485_v61, %s4770_s10 }
0x112a   :  { %2813 = vrot.lane.b32.xlu0 %v5491_v62, %s4769_s7  ;;  %2469 = vrot.lane.b32.xlu1 %v5485_v61, %s4771_s24 }
0x112e   :  { %2642 = vrot.lane.b32.xlu1 %v5491_v62, %s4770_s10 }
0x1132   :  { %2811 = vrot.lane.b32.xlu1 %v5491_v62, %s4771_s24 }
0x1198   :  { %v2472_v63 = vpop.permute.xlu0 %2471  ;;  %v2301_v0 = vpop.permute.xlu1 %2300 }
0x1199   :  { %4181 = vmatpush3.xpose.msk.msra.mxu1 %vm560_vm5, %v2301_v0  ;;  %4191 = vmatpush3.xpose.msk.msra.mxu0 %vm560_vm5, %v2472_v63 }
0x119a   :  { %4200 = vmatprep.subr.mxu0 %v4767_v11  ;;  %4185 = vmatprep.subr.mxu1 %v4767_v11 }
0x119c   :  { %4183 = vmatmul.mubr.msk.f32.vlgmr.msra.gmra.mxu1 %vm560_vm5, %v5485_v61  ;;  %v2470_v57 = vpop.permute.xlu1 %2469  ;;  %v2814_v59 = vpop.permute.xlu0 %2813 }
0x119d   :  { %4193 = vmatmul.mubr.msk.f32.vlgmr.msra.gmra.mxu0 %vm560_vm5, %v2470_v57  ;;  %4187 = vmatprep.mubr.msk.f32.mxu1 %vm4768_vm4, %v4767_v11 }
0x119e   :  { %4202 = vmatprep.mubr.msk.f32.mxu0 %vm4768_vm4, %v4767_v11 }
0x11a0   :  { %v2643_v13 = vpop.permute.xlu1 %2642 }
0x11a1   :  { %4201 = vmatpush3.xpose.msk.msra.mxu0 %vm560_vm5, %v2643_v13 }
0x11a2   :  { %4210 = vmatprep.subr.mxu0 %v4767_v11 }
0x11a4   :  { %4203 = vmatmul.mubr.msk.f32.vlgmr.msra.gmra.mxu0 %vm560_vm5, %v5491_v62  ;;  %v2812_v1 = vpop.permute.xlu1 %2811 }
0x11a5   :  { %4211 = vmatpush3.xpose.msk.msra.mxu0 %vm560_vm5, %v2814_v59  ;;  %4212 = vmatprep.mubr.msk.f32.mxu0 %vm4768_vm4, %v4767_v11 }
0x11a8   :  { %4213 = vmatmul.mubr.msk.f32.vlgmr.msra.gmra.mxu0 %vm560_vm5, %v2812_v1 }
0x125c   :  { %v2372_v7 = vpop.f32.mrf.mxu1 }
0x125d   :  { %v2376_v8 = vmul.f32 0.25, %v2372_v7  ;;  %v2543_v9 = vpop.f32.mrf.mxu0  ;;  %v2986_v7 = vld [vmem:[#allocation21 + $0x18] sm:$0xff] }
0x125e   :  { %v2547_v10 = vmul.f32 0.25, %v2543_v9  ;;  %v4184_v14 = vpop.f32.mrf.mxu1  ;;  %4220 = vmatprep.subr.mxu0 %v2986_v7  ;;  %v2984_v9 = vld [vmem:[#allocation21 + $0x8] sm:$0xff] }
0x125f   :  { %v4194_v15 = vpop.f32.mrf.mxu0  ;;  %v2381_v16 = vadd.f32 %v2380_v6, %v2376_v8  ;;  %v2985_v8 = vld [vmem:[#allocation21 + $0x10] sm:$0xff]  ;;  %4221 = vmatpush3.msra.mxu0 %v2986_v7  ;;  %v3214_v7 = vld [vmem:[%s5701_s23 + $0x58] sm:$0xff] }
0x1260   :  { %v2548_v17 = vadd.f32 %v2547_v10, %v2380_v6  ;;  %4222 = vmatprep.subr.mxu0 %v2985_v8  ;;  %v2983_v10 = vld [vmem:[#allocation21] sm:$0xff] }
0x1261   :  { %v2382_v19 = vsel %vm641_vm6, %v2381_v16, -inf  ;;  %4223 = vmatpush3.msra.mxu0 %v2985_v8  ;;  %v3213_v8 = vld [vmem:[%s5701_s23 + $0x50] sm:$0xff] }
0x1262   :  { %2383 = vmax.xlane.f32.xlu0 %v2382_v19  ;;  %v2549_v12 = vsel %vm641_vm6, %v2548_v17, -inf  ;;  %4224 = vmatprep.subr.mxu0 %v2984_v9 }
0x1263   :  { %2550 = vmax.xlane.f32.xlu1 %v2549_v12  ;;  %4225 = vmatpush3.msra.mxu0 %v2984_v9  ;;  %v3212_v9 = vld [vmem:[%s5701_s23 + $0x48] sm:$0xff] }
0x1264   :  { %v2714_v21 = vpop.f32.mrf.mxu0  ;;  %4226 = vmatprep.subr.mxu0 %v2983_v10 }
0x1265   :  { %v2718_v22 = vmul.f32 0.25, %v2714_v21  ;;  %4227 = vmatpush3.msra.mxu0 %v2983_v10  ;;  %v3211_v10 = vld [vmem:[%s5701_s23 + $0x40] sm:$0xff] }
0x1266   :  { %v4204_v23 = vpop.f32.mrf.mxu0 }
0x1267   :  { %v2723_v24 = vadd.f32 %v2722_v20, %v2718_v22 }
0x1268   :  { %v2885_v25 = vpop.f32.mrf.mxu0 }
0x1269   :  { %v2889_v26 = vmul.f32 0.25, %v2885_v25  ;;  %v2724_v27 = vsel %vm641_vm6, %v2723_v24, -inf }
0x126a   :  { %2725 = vmax.xlane.f32.xlu0 %v2724_v27  ;;  %v4214_v28 = vpop.f32.mrf.mxu0 }
0x126b   :  { %v2890_v29 = vadd.f32 %v2889_v26, %v2722_v20  ;;  %v2063_v26 = vld [vmem:[#allocation18 + $0x3] ss:$0 sm:$0xff] }
0x126d   :  { %v2891_v30 = vsel %vm641_vm6, %v2890_v29, -inf }
0x126e   :  { %2892 = vmax.xlane.f32.xlu0 %v2891_v30 }
0x1274   :  { %2393 = vrot.lane.b32.xlu1 %v5485_v61, %s4772_s13 }
0x12eb   :  { %v2384_v31 = vpop.xlane.xlu0 %2383 }
0x12ec   :  { %v2385_v32 = vsub.f32 %v2381_v16, %v2384_v31  ;;  %v2551_v33 = vpop.xlane.xlu1 %2550 }
0x12ed   :  { %v2552_v34 = vsub.f32 %v2548_v17, %v2551_v33 }
0x12ee   :  { %v2386_v35 = vmul.f32 1.442695, %v2385_v32 }
0x12ef   :  { %v2553_v36 = vmul.f32 1.442695, %v2552_v34 }
0x12f0   :  { %4357 = vpow2.f32 %v2386_v35  ;;  %v2394_v37 = vpop.permute.xlu1 %2393 }
0x12f1   :  { %4359 = vpow2.f32 %v2553_v36  ;;  %4186 = vmatpush3.msra.mxu1 %v2394_v37 }
0x12f2   :  { %4195 = vmatprep.subr.mxu1 %v4767_v11 }
0x12f3   :  { %v2726_v38 = vpop.xlane.xlu0 %2725 }
0x12f4   :  { %v2727_v39 = vsub.f32 %v2723_v24, %v2726_v38 }
0x12f6   :  { %v2728_v40 = vmul.f32 1.442695, %v2727_v39 }
0x12f7   :  { %v2893_v41 = vpop.xlane.xlu0 %2892 }
0x12f8   :  { %4361 = vpow2.f32 %v2728_v40  ;;  %v2894_v42 = vsub.f32 %v2890_v29, %v2893_v41 }
0x12fa   :  { %v2895_v43 = vmul.f32 1.442695, %v2894_v42 }
0x12fc   :  { %4363 = vpow2.f32 %v2895_v43 }
0x12fd   :  { %v4358_v44 = vpop.eup %4357 }
0x12fe   :  { %v4360_v52 = vpop.eup %4359  ;;  %v2388_v45 = vsel %vm641_vm6, %v4358_v44, 0.0 }
0x12ff   :  { %2389 = vadd.xlane.f32.xlu1 %v2388_v45  ;;  %v2555_v46 = vsel %vm641_vm6, %v4360_v52, 0.0  ;;  %v3100_v45 = vld [vmem:[#allocation22] sm:$0xff] }
0x1300   :  { %2556 = vadd.xlane.f32.xlu0 %v2555_v46 }
0x1305   :  { %v4362_v47 = vpop.eup %4361 }
0x1306   :  { %v2730_v48 = vsel %vm641_vm6, %v4362_v47, 0.0 }
0x1307   :  { %2731 = vadd.xlane.f32.xlu1 %v2730_v48 }
0x1309   :  { %v4364_v49 = vpop.eup %4363 }
0x130a   :  { %v2897_v50 = vsel %vm641_vm6, %v4364_v49, 0.0 }
0x130b   :  { %2898 = vadd.xlane.f32.xlu0 %v2897_v50 }
0x1318   :  { %2735 = vrot.lane.b32.xlu1 %v5491_v62, %s4772_s13 }
0x131c   :  { %2902 = vrot.lane.b32.xlu1 %v5491_v62, %s4773_s20 }
0x1321   :  { %2560 = vrot.lane.b32.xlu0 %v5485_v61, %s4773_s20 }
0x1388   :  { %v2390_v54 = vpop.xlane.xlu1 %2389 }
0x1389   :  { %4365 = vrcp.f32 %v2390_v54  ;;  %v2557_v58 = vpop.xlane.xlu0 %2556 }
0x138a   :  { %4367 = vrcp.f32 %v2557_v58 }
0x1390   :  { %v2732_v60 = vpop.xlane.xlu1 %2731 }
0x1391   :  { %4369 = vrcp.f32 %v2732_v60  ;;  %v2064_v60 = vld [vmem:[#allocation18 + $0x4] ss:$0 sm:$0xff] }
0x1394   :  { %v2899_v63 = vpop.xlane.xlu0 %2898  ;;  %v2736_v62 = vpop.permute.xlu1 %2735 }
0x1395   :  { %4371 = vrcp.f32 %v2899_v63 }
0x1396   :  { %v4366_v0 = vpop.eup %4365 }
0x1397   :  { %v2392_v57 = vmul.f32 %v4366_v0, %v4358_v44  ;;  %v4368_v13 = vpop.eup %4367  ;;  %v3103_v44 = vld [vmem:[#allocation22 + $0x18] sm:$0xff]  ;;  %v2065_v0 = vld [vmem:[#allocation18 + $0x5] ss:$0 sm:$0xff] }
0x1398   :  { %v2561_v59 = vpop.permute.xlu0 %2560  ;;  %v2559_v61 = vmul.f32 %v4368_v13, %v4360_v52  ;;  %v2903_v3 = vpop.permute.xlu1 %2902  ;;  %v3101_v52 = vld [vmem:[#allocation22 + $0x8] sm:$0xff] }
0x1399   :  { %4188 = vmatmul.mubr.msk.f32.vlgmr.msra.gmra.mxu1 %vm641_vm6, %v2392_v57 }
0x139a   :  { %4196 = vmatpush3.msra.mxu1 %v2561_v59  ;;  %4197 = vmatprep.mubr.msk.f32.mxu1 %vm4768_vm4, %v4767_v11 }
0x139b   :  { %4205 = vmatprep.subr.mxu1 %v4767_v11 }
0x139d   :  { %4198 = vmatmul.mubr.msk.f32.vlgmr.msra.gmra.mxu1 %vm641_vm6, %v2559_v61 }
0x139e   :  { %v4370_v1 = vpop.eup %4369  ;;  %4206 = vmatpush3.msra.mxu1 %v2736_v62  ;;  %4207 = vmatprep.mubr.msk.f32.mxu1 %vm4768_vm4, %v4767_v11 }
0x139f   :  { %4215 = vmatprep.subr.mxu1 %v4767_v11  ;;  %v2734_v2 = vmul.f32 %v4370_v1, %v4362_v47 }
0x13a1   :  { %4208 = vmatmul.mubr.msk.f32.vlgmr.msra.gmra.mxu1 %vm641_vm6, %v2734_v2  ;;  %v3218_v2 = vld [vmem:[%s5701_s23 + $0x78] sm:$0xff] }
0x13a2   :  { %v4372_v4 = vpop.eup %4371  ;;  %4216 = vmatpush3.msra.mxu1 %v2903_v3  ;;  %4217 = vmatprep.mubr.msk.f32.mxu1 %vm4768_vm4, %v4767_v11  ;;  %v3217_v3 = vld [vmem:[%s5701_s23 + $0x70] sm:$0xff] }
0x13a3   :  { %v2901_v6 = vmul.f32 %v4372_v4, %v4364_v49  ;;  %4231 = vmatprep.subr.mxu1 %v3103_v44  ;;  %4242 = vmatprep.subr.mxu0 %v3218_v2  ;;  %v3216_v4 = vld [vmem:[%s5701_s23 + $0x68] sm:$0xff] }
0x13a5   :  { %4218 = vmatmul.mubr.msk.f32.vlgmr.msra.gmra.mxu1 %vm641_vm6, %v2901_v6  ;;  %v3215_v6 = vld [vmem:[%s5701_s23 + $0x60] sm:$0xff] }
0x13a6   :  { %4232 = vmatpush3.msra.mxu1 %v3103_v44  ;;  %v2067_v44 = vld [vmem:[#allocation18 + $0x7] ss:$0 sm:$0xff] }
0x1459   :  { %v2465_v14 = vpop.f32.mrf.mxu1 }
0x145b   :  { %v4189_v15 = vpop.f32.mrf.mxu1 }
0x145c   :  { %v3209_v15 = vld [vmem:[%s5701_s23 + $0x30] sm:$0xff] }
0x145d   :  { %v2632_v16 = vpop.f32.mrf.mxu1 }
0x145e   :  { %2637 = vrot.lane.b32.xlu0 %v2632_v16, %s4747_s3  ;;  %v3208_v16 = vld [vmem:[%s5701_s23 + $0x28] sm:$0xff] }
0x145f   :  { %v4199_v17 = vpop.f32.mrf.mxu1 }
0x1460   :  { %v3207_v17 = vld [vmem:[%s5701_s23 + $0x20] sm:$0xff] }
0x1461   :  { %v2807_v19 = vpop.f32.mrf.mxu1 }
0x1463   :  { %v4209_v12 = vpop.f32.mrf.mxu1 }
0x1464   :  { %v3205_v12 = vld [vmem:[%s5701_s23 + $0x10] sm:$0xff] }
0x1465   :  { %v2974_v20 = vpop.f32.mrf.mxu1 }
0x1466   :  { %2979 = vrot.lane.b32.xlu1 %v2974_v20, %s4747_s3  ;;  %v3204_v20 = vld [vmem:[%s5701_s23 + $0x8] sm:$0xff] }
0x1467   :  { %v4219_v21 = vpop.f32.mrf.mxu1 }
0x1468   :  { %v3203_v21 = vld [vmem:[%s5701_s23] sm:$0xff] }
0x14d0   :  { %v2638_v22 = vpop.permute.xlu0 %2637 }
0x14d1   :  { %v2640_v23 = vsel %vm560_vm5, %v2465_v14, %v2638_v22  ;;  %v3210_v14 = vld [vmem:[%s5701_s23 + $0x38] sm:$0xff] }
0x14d2   :  { %4228 = vmatprep.mubr.msk.f32.mxu0 %vm437_vm3, %v2640_v23  ;;  %v2066_v22 = vld [vmem:[#allocation18 + $0x6] ss:$0 sm:$0xff] }
0x14d8   :  { %v2980_v24 = vpop.permute.xlu1 %2979 }
0x14d9   :  { %v2982_v25 = vsel %vm560_vm5, %v2807_v19, %v2980_v24  ;;  %v3206_v19 = vld [vmem:[%s5701_s23 + $0x18] sm:$0xff] }
0x14da   :  { %4229 = vmatmul.mubr.msk.f32.vlgmr.msra.gmra.mxu0 %vm437_vm3, %v2982_v25 }
0x14db   :  { %4243 = vmatpush3.msra.mxu0 %v3218_v2  ;;  %v3333_v2 = vld [vmem:[#allocation24 + $0x18] sm:$0xff] }
0x14dc   :  { %4244 = vmatprep.subr.mxu0 %v3217_v3 }
0x14dd   :  { %4245 = vmatpush3.msra.mxu0 %v3217_v3  ;;  %v3331_v3 = vld [vmem:[#allocation24 + $0x8] sm:$0xff] }
0x14de   :  { %4246 = vmatprep.subr.mxu0 %v3216_v4 }
0x14df   :  { %4247 = vmatpush3.msra.mxu0 %v3216_v4  ;;  %v3330_v4 = vld [vmem:[#allocation24] sm:$0xff] }
0x14e0   :  { %4248 = vmatprep.subr.mxu0 %v3215_v6 }
0x14e1   :  { %4249 = vmatpush3.msra.mxu0 %v3215_v6 }
0x14e2   :  { %4250 = vmatprep.subr.mxu0 %v3214_v7 }
0x14e3   :  { %4251 = vmatpush3.msra.mxu0 %v3214_v7 }
0x14e4   :  { %4252 = vmatprep.subr.mxu0 %v3213_v8 }
0x14e5   :  { %4253 = vmatpush3.msra.mxu0 %v3213_v8 }
0x14e6   :  { %4254 = vmatprep.subr.mxu0 %v3212_v9 }
0x14e7   :  { %4255 = vmatpush3.msra.mxu0 %v3212_v9 }
0x14e8   :  { %4256 = vmatprep.subr.mxu0 %v3211_v10 }
0x14e9   :  { %4257 = vmatpush3.msra.mxu0 %v3211_v10 }
0x14ea   :  { %4258 = vmatprep.subr.mxu0 %v3210_v14 }
0x14eb   :  { %4259 = vmatpush3.msra.mxu0 %v3210_v14 }
0x14ec   :  { %4260 = vmatprep.subr.mxu0 %v3209_v15 }
0x14ed   :  { %4261 = vmatpush3.msra.mxu0 %v3209_v15 }
0x14ee   :  { %4262 = vmatprep.subr.mxu0 %v3208_v16 }
0x14ef   :  { %4263 = vmatpush3.msra.mxu0 %v3208_v16  ;;  %v2068_v16 = vld [vmem:[#allocation18 + $0x10] ss:$0 sm:$0xff] }
0x14f0   :  { %4264 = vmatprep.subr.mxu0 %v3207_v17 }
0x14f1   :  { %4265 = vmatpush3.msra.mxu0 %v3207_v17 }
0x14f2   :  { %4266 = vmatprep.subr.mxu0 %v3206_v19 }
0x14f3   :  { %4267 = vmatpush3.msra.mxu0 %v3206_v19 }
0x14f4   :  { %4268 = vmatprep.subr.mxu0 %v3205_v12 }
0x14f5   :  { %4269 = vmatpush3.msra.mxu0 %v3205_v12  ;;  %v2069_v12 = vld [vmem:[#allocation18 + $0x11] ss:$0 sm:$0xff] }
0x14f6   :  { %4270 = vmatprep.subr.mxu0 %v3204_v20 }
0x14f7   :  { %4271 = vmatpush3.msra.mxu0 %v3204_v20 }
0x14f8   :  { %4272 = vmatprep.subr.mxu0 %v3203_v21 }
0x14f9   :  { %4273 = vmatpush3.msra.mxu0 %v3203_v21 }
0x159a   :  { %v4230_v27 = vpop.f32.mrf.mxu0 }
0x159b   :  { %v3065_v28 = vadd.f32 %v4230_v27, %v2063_v26 }
0x159c   :  { %v3059_v29 = vpop.f32.mrf.mxu0 }
0x159d   :  { %v3060_v30 = vadd.f32 %v3059_v29, %v2063_v26  ;;  %v3069_v31 = vadd.f32 %v3065_v28, %v5473_v53 }
0x159f   :  { %v3073_v32 = vsel %vm437_vm3, %v3069_v31, 0.0  ;;  %v3068_v33 = vadd.f32 %v3060_v30, %v5471_v51  ;;  %v3102_v51 = vld [vmem:[#allocation22 + $0x10] sm:$0xff] }
0x15a0   :  { %3074 = vadd.xlane.f32.xlu1 %v3073_v32  ;;  %4233 = vmatprep.subr.mxu1 %v3102_v51 }
0x15a1   :  { %v3070_v34 = vsel %vm437_vm3, %v3068_v33, 0.0  ;;  %4234 = vmatpush3.msra.mxu1 %v3102_v51 }
0x15a2   :  { %3071 = vadd.xlane.f32.xlu0 %v3070_v34  ;;  %4235 = vmatprep.subr.mxu1 %v3101_v52 }
0x15a3   :  { %4236 = vmatpush3.msra.mxu1 %v3101_v52 }
0x15a4   :  { %4237 = vmatprep.subr.mxu1 %v3100_v45 }
0x15a5   :  { %4238 = vmatpush3.msra.mxu1 %v3100_v45 }
0x15a6   :  { %4277 = vmatprep.subr.mxu1 %v4767_v11 }
0x1629   :  { %v3075_v35 = vpop.xlane.xlu1 %3074 }
0x162a   :  { %v3077_v36 = vmul.f32 0.03125, %v3075_v35 }
0x162b   :  { %v3072_v37 = vpop.xlane.xlu0 %3071 }
0x162c   :  { %v3076_v38 = vmul.f32 0.03125, %v3072_v37  ;;  %v3079_v39 = vsub.f32 %v3069_v31, %v3077_v36 }
0x162e   :  { %v3078_v40 = vsub.f32 %v3068_v33, %v3076_v38  ;;  %v3081_v43 = vmul.f32 %v3079_v39, %v3079_v39 }
0x1630   :  { %v3080_v41 = vmul.f32 %v3078_v40, %v3078_v40  ;;  %v3085_v53 = vsel %vm437_vm3, %v3081_v43, 0.0 }
0x1632   :  { %v3082_v42 = vsel %vm437_vm3, %v3080_v41, 0.0 }
0x1633   :  { %3083 = vadd.xlane.f32.xlu0 %v3082_v42 }
0x1637   :  { %3086 = vadd.xlane.f32.xlu0 %v3085_v53 }
0x16bc   :  { %v3084_v46 = vpop.xlane.xlu0 %3083 }
0x16bd   :  { %v3088_v47 = vmul.f32 0.03125, %v3084_v46 }
0x16bf   :  { %v3090_v48 = vadd.f32 1e-12, %v3088_v47 }
0x16c0   :  { %v3087_v49 = vpop.xlane.xlu0 %3086 }
0x16c1   :  { %4373 = vrsqrt.f32 %v3090_v48  ;;  %v3089_v50 = vmul.f32 0.03125, %v3087_v49 }
0x16c3   :  { %v3091_v54 = vadd.f32 1e-12, %v3089_v50 }
0x16c5   :  { %4375 = vrsqrt.f32 %v3091_v54 }
0x16ce   :  { %v4374_v58 = vpop.eup %4373 }
0x16cf   :  { %v3094_v63 = vmul.f32 %v4374_v58, %v3078_v40 }
0x16d1   :  { %v3096_v57 = vmul.f32 %v3094_v63, %v2064_v60 }
0x16d2   :  { %v4376_v13 = vpop.eup %4375 }
0x16d3   :  { %v3095_v59 = vmul.f32 %v4376_v13, %v3079_v39  ;;  %v5567_v62 = vadd.f32 %v3096_v57, %v2065_v0 }
0x16d5   :  { %v3097_v61 = vmul.f32 %v3095_v59, %v2064_v60  ;;  %4239 = vmatprep.mubr.msk.f32.mxu1 %vm437_vm3, %v5567_v62 }
0x16d7   :  { %v5571_v1 = vadd.f32 %v3097_v61, %v2065_v0 }
0x16d9   :  { %4240 = vmatmul.mubr.msk.f32.vlgmr.msra.gmra.mxu1 %vm437_vm3, %v5571_v1 }
0x16da   :  { %4285 = vmatprep.mubr.msk.f32.mxu1 %vm4768_vm4, %v4767_v11  ;;  %4278 = vmatpush3.msra.mxu1 %v3333_v2  ;;  %v3509_v2 = vld [vmem:[#allocation25 + $0x30] sm:$0xff] }
0x16db   :  { %4279 = vmatprep.subr.mxu1 %v4767_v11 }
0x1799   :  { %v4241_v23 = vpop.f32.mrf.mxu1 }
0x179a   :  { %v3182_v24 = vadd.f32 %v4241_v23, %v2066_v22 }
0x179b   :  { %v3176_v25 = vpop.f32.mrf.mxu1 }
0x179c   :  { %v3186_v26 = vmul.f32 %v3182_v24, %v3182_v24  ;;  %v3177_v27 = vadd.f32 %v3176_v25, %v2066_v22 }
0x179e   :  { %v3188_v28 = vmul.f32 %v3186_v26, %v3182_v24  ;;  %v3185_v29 = vmul.f32 %v3177_v27, %v3177_v27 }
0x17a0   :  { %v3190_v30 = vmul.f32 0.044715, %v3188_v28  ;;  %v3187_v31 = vmul.f32 %v3185_v29, %v3177_v27  ;;  %v3414_v28 = vld [vmem:[%s5703_s25 + $0x30] sm:$0xff]  ;;  %v3413_v29 = vld [vmem:[%s5703_s25 + $0x28] sm:$0xff] }
0x17a2   :  { %v3192_v32 = vadd.f32 %v3190_v30, %v3182_v24  ;;  %v3189_v33 = vmul.f32 0.044715, %v3187_v31  ;;  %v3412_v30 = vld [vmem:[%s5703_s25 + $0x20] sm:$0xff]  ;;  %v3410_v31 = vld [vmem:[%s5703_s25 + $0x10] sm:$0xff] }
0x17a4   :  { %v3194_v34 = vmul.f32 0.7978846, %v3192_v32  ;;  %v3191_v35 = vadd.f32 %v3189_v33, %v3177_v27  ;;  %v3409_v32 = vld [vmem:[%s5703_s25 + $0x8] sm:$0xff]  ;;  %v3408_v33 = vld [vmem:[%s5703_s25] sm:$0xff] }
0x17a6   :  { %4377 = vtanh.f32 %v3194_v34  ;;  %v3193_v36 = vmul.f32 0.7978846, %v3191_v35  ;;  %v3534_v34 = vld [vmem:[#allocation25 + $0xf8] sm:$0xff]  ;;  %v2070_v35 = vld [vmem:[#allocation18 + $0x12] ss:$0 sm:$0xff] }
0x17a8   :  { %4379 = vtanh.f32 %v3193_v36 }
0x17b3   :  { %v4378_v37 = vpop.eup %4377 }
0x17b4   :  { %v3198_v38 = vadd.f32 1.0, %v4378_v37 }
0x17b5   :  { %v4380_v39 = vpop.eup %4379 }
0x17b6   :  { %v3197_v40 = vadd.f32 1.0, %v4380_v39  ;;  %v3200_v41 = vmul.f32 0.5, %v3198_v38  ;;  %v3533_v39 = vld [vmem:[#allocation25 + $0xf0] sm:$0xff] }
0x17b8   :  { %v3199_v42 = vmul.f32 0.5, %v3197_v40  ;;  %v3202_v53 = vmul.f32 %v3200_v41, %v3182_v24  ;;  %v3532_v41 = vld [vmem:[#allocation25 + $0xe8] sm:$0xff] }
0x17ba   :  { %v3201_v43 = vmul.f32 %v3199_v42, %v3177_v27  ;;  %v3415_v27 = vld [vmem:[%s5703_s25 + $0x38] sm:$0xff] }
0x17bb   :  { %v3531_v42 = vld [vmem:[#allocation25 + $0xe0] sm:$0xff] }
0x17bc   :  { %4274 = vmatprep.mubr.f32.mxu0 %v3201_v43  ;;  %v3530_v43 = vld [vmem:[#allocation25 + $0xd8] sm:$0xff] }
0x17bd   :  { %4275 = vmatmul.mubr.f32.vlgmr.msra.gmra.mxu0 %v3202_v53  ;;  %v3529_v53 = vld [vmem:[#allocation25 + $0xd0] sm:$0xff] }
0x187d   :  { %v4276_v51 = vpop.f32.mrf.mxu0 }
0x187e   :  { %v3291_v52 = vadd.f32 %v4276_v51, %v2067_v44  ;;  %v3527_v51 = vld [vmem:[#allocation25 + $0xc0] sm:$0xff] }
0x187f   :  { %v3285_v45 = vpop.f32.mrf.mxu0 }
0x1880   :  { %v3286_v46 = vadd.f32 %v3285_v45, %v2067_v44  ;;  %v3295_v47 = vadd.f32 %v3291_v52, %v5571_v1  ;;  %v3528_v44 = vld [vmem:[#allocation25 + $0xc8] sm:$0xff]  ;;  %v3526_v52 = vld [vmem:[#allocation25 + $0xb8] sm:$0xff]  ;;  %v3525_v45 = vld [vmem:[#allocation25 + $0xb0] sm:$0xff] }
0x1882   :  { %v3299_v48 = vsel %vm437_vm3, %v3295_v47, 0.0  ;;  %v3294_v49 = vadd.f32 %v3286_v46, %v5567_v62  ;;  %v3332_v62 = vld [vmem:[#allocation24 + $0x10] sm:$0xff]  ;;  %v3524_v46 = vld [vmem:[#allocation25 + $0xa8] sm:$0xff] }
0x1883   :  { %3300 = vadd.xlane.f32.xlu1 %v3299_v48  ;;  %4280 = vmatpush3.msra.mxu1 %v3332_v62  ;;  %v3522_v48 = vld [vmem:[#allocation25 + $0x98] sm:$0xff]  ;;  %v3508_v62 = vld [vmem:[#allocation25 + $0x28] sm:$0xff] }
0x1884   :  { %v3296_v50 = vsel %vm437_vm3, %v3294_v49, 0.0  ;;  %4281 = vmatprep.subr.mxu1 %v4767_v11 }
0x1885   :  { %3297 = vadd.xlane.f32.xlu0 %v3296_v50  ;;  %4282 = vmatpush3.msra.mxu1 %v3331_v3  ;;  %v3520_v50 = vld [vmem:[#allocation25 + $0x88] sm:$0xff]  ;;  %v3507_v3 = vld [vmem:[#allocation25 + $0x20] sm:$0xff] }
0x1886   :  { %4283 = vmatprep.subr.mxu1 %v4767_v11 }
0x1887   :  { %4284 = vmatpush3.msra.mxu1 %v3330_v4  ;;  %v3506_v4 = vld [vmem:[#allocation25 + $0x18] sm:$0xff] }
0x1888   :  { %3454 = vmatprep.subr.mxu1 %v3415_v27  ;;  %v3551_v27 = vld [vmem:[#allocation25 + $0x180] sm:$0xff] }
0x190c   :  { %v3301_v54 = vpop.xlane.xlu1 %3300 }
0x190d   :  { %v3303_v58 = vmul.f32 0.03125, %v3301_v54  ;;  %v3519_v54 = vld [vmem:[#allocation25 + $0x80] sm:$0xff] }
0x190e   :  { %v3298_v60 = vpop.xlane.xlu0 %3297 }
0x190f   :  { %v3305_v63 = vsub.f32 %v3295_v47, %v3303_v58  ;;  %v3302_v0 = vmul.f32 0.03125, %v3298_v60  ;;  %v3523_v47 = vld [vmem:[#allocation25 + $0xa0] sm:$0xff]  ;;  %v3518_v58 = vld [vmem:[#allocation25 + $0x78] sm:$0xff]  ;;  %v3517_v60 = vld [vmem:[#allocation25 + $0x70] sm:$0xff] }
0x1911   :  { %v3304_v57 = vsub.f32 %v3294_v49, %v3302_v0  ;;  %v3307_v13 = vmul.f32 %v3305_v63, %v3305_v63  ;;  %v3521_v49 = vld [vmem:[#allocation25 + $0x90] sm:$0xff]  ;;  %v3515_v0 = vld [vmem:[#allocation25 + $0x60] sm:$0xff] }
0x1913   :  { %v3311_v59 = vsel %vm437_vm3, %v3307_v13, 0.0  ;;  %v3306_v61 = vmul.f32 %v3304_v57, %v3304_v57  ;;  %v3513_v13 = vld [vmem:[#allocation25 + $0x50] sm:$0xff] }
0x1914   :  { %3312 = vadd.xlane.f32.xlu1 %v3311_v59  ;;  %v3512_v59 = vld [vmem:[#allocation25 + $0x48] sm:$0xff] }
0x1915   :  { %v3308_v1 = vsel %vm437_vm3, %v3306_v61, 0.0  ;;  %v3511_v61 = vld [vmem:[#allocation25 + $0x40] sm:$0xff] }
0x1916   :  { %3309 = vadd.xlane.f32.xlu0 %v3308_v1  ;;  %v3510_v1 = vld [vmem:[#allocation25 + $0x38] sm:$0xff] }
0x199d   :  { %v3313_v6 = vpop.xlane.xlu1 %3312 }
0x199e   :  { %v3315_v7 = vmul.f32 0.03125, %v3313_v6  ;;  %v3505_v6 = vld [vmem:[#allocation25 + $0x10] sm:$0xff] }
0x199f   :  { %v3310_v8 = vpop.xlane.xlu0 %3309 }
0x19a0   :  { %v3317_v9 = vadd.f32 1e-12, %v3315_v7  ;;  %v3314_v10 = vmul.f32 0.03125, %v3310_v8  ;;  %v3504_v7 = vld [vmem:[#allocation25 + $0x8] sm:$0xff]  ;;  %v3503_v8 = vld [vmem:[#allocation25] sm:$0xff] }
0x19a2   :  { %4381 = vrsqrt.f32 %v3317_v9  ;;  %v3316_v14 = vadd.f32 1e-12, %v3314_v10  ;;  %v3566_v9 = vld [vmem:[#allocation25 + $0x1f8] sm:$0xff]  ;;  %v3565_v10 = vld [vmem:[#allocation25 + $0x1f0] sm:$0xff] }
0x19a4   :  { %4383 = vrsqrt.f32 %v3316_v14  ;;  %v3564_v14 = vld [vmem:[#allocation25 + $0x1e8] sm:$0xff] }
0x19af   :  { %v4382_v15 = vpop.eup %4381 }
0x19b0   :  { %v3321_v17 = vmul.f32 %v4382_v15, %v3305_v63  ;;  %v3516_v63 = vld [vmem:[#allocation25 + $0x68] sm:$0xff]  ;;  %v3563_v15 = vld [vmem:[#allocation25 + $0x1e0] sm:$0xff] }
0x19b1   :  { %v4384_v19 = vpop.eup %4383 }
0x19b2   :  { %v3320_v20 = vmul.f32 %v4384_v19, %v3304_v57  ;;  %v3323_v21 = vmul.f32 %v3321_v17, %v2068_v16  ;;  %v3514_v57 = vld [vmem:[#allocation25 + $0x58] sm:$0xff]  ;;  %v3561_v17 = vld [vmem:[#allocation25 + $0x1d0] sm:$0xff]  ;;  %v3560_v19 = vld [vmem:[#allocation25 + $0x1c8] sm:$0xff] }
0x19b4   :  { %v3322_v22 = vmul.f32 %v3320_v20, %v2068_v16  ;;  %v3325_v23 = vadd.f32 %v3323_v21, %v2069_v12  ;;  %v3562_v16 = vld [vmem:[#allocation25 + $0x1d8] sm:$0xff]  ;;  %v3557_v21 = vld [vmem:[#allocation25 + $0x1b0] sm:$0xff] }
0x19b5   :  { %v3558_v20 = vld [vmem:[#allocation25 + $0x1b8] sm:$0xff] }
0x19b6   :  { %v3324_v24 = vadd.f32 %v3322_v22, %v2069_v12  ;;  %v3327_v25 = vrot.slane %v3325_v23, 7  ;;  %v3559_v12 = vld [vmem:[#allocation25 + $0x1c0] sm:$0xff]  ;;  %v3556_v22 = vld [vmem:[#allocation25 + $0x1a8] sm:$0xff] }
0x19b7   :  { %v3555_v23 = vld [vmem:[#allocation25 + $0x1a0] sm:$0xff] }
0x19b8   :  { %v3329_v26 = vsel %vm1589_vm7, %v3324_v24, %v3327_v25  ;;  %v3554_v24 = vld [vmem:[#allocation25 + $0x198] sm:$0xff]  ;;  %v3553_v25 = vld [vmem:[#allocation25 + $0x190] sm:$0xff] }
0x19b9   :  { %4286 = vmatmul.mubr.msk.f32.vlgmr.msra.gmra.mxu1 %vm437_vm3, %v3329_v26  ;;  %v3552_v26 = vld [vmem:[#allocation25 + $0x188] sm:$0xff] }
0x19ba   :  { %3494 = vmatprep.mubr.f32.mxu1 %v4767_v11  ;;  %3455 = vmatpush1.msra.mxu1 %v3414_v28  ;;  %v3411_v11 = vld [vmem:[%s5703_s25 + $0x18] sm:$0xff]  ;;  %v3550_v28 = vld [vmem:[#allocation25 + $0x178] sm:$0xff] }
0x19bb   :  { %3456 = vmatprep.subr.mxu1 %v3413_v29  ;;  %v3549_v29 = vld [vmem:[#allocation25 + $0x170] sm:$0xff] }
0x19bc   :  { %3457 = vmatpush1.msra.mxu1 %v3412_v30  ;;  %v3548_v30 = vld [vmem:[#allocation25 + $0x168] sm:$0xff] }
0x19bd   :  { %3458 = vmatprep.subr.mxu1 %v3411_v11  ;;  %v3547_v11 = vld [vmem:[#allocation25 + $0x160] sm:$0xff] }
0x19be   :  { %3459 = vmatpush1.msra.mxu1 %v3410_v31  ;;  %v3546_v31 = vld [vmem:[#allocation25 + $0x158] sm:$0xff] }
0x19bf   :  { %3460 = vmatprep.subr.mxu1 %v3409_v32  ;;  %v3545_v32 = vld [vmem:[#allocation25 + $0x150] sm:$0xff] }
0x19c0   :  { %3461 = vmatpush1.msra.mxu1 %v3408_v33  ;;  %v3544_v33 = vld [vmem:[#allocation25 + $0x148] sm:$0xff] }
0x19c1   :  { %3578 = vmatprep.subr.mxu1 %v3534_v34  ;;  %v3543_v34 = vld [vmem:[#allocation25 + $0x140] sm:$0xff] }
0x1a79   :  { %v3403_v36 = vpop.f32.mrf.mxu1 }
0x1a7a   :  { %v3404_v37 = vadd.f32 %v3403_v36, %v2070_v35  ;;  %v3542_v35 = vld [vmem:[#allocation25 + $0x138] sm:$0xff]  ;;  %v3541_v36 = vld [vmem:[#allocation25 + $0x130] sm:$0xff] }
0x1a7b   :  { %v4287_v38 = vpop.f32.mrf.mxu1 }
0x1a7c   :  { %4385 = vtanh.f32 %v3404_v37  ;;  %v3540_v37 = vld [vmem:[#allocation25 + $0x128] sm:$0xff]  ;;  %v3539_v38 = vld [vmem:[#allocation25 + $0x120] sm:$0xff] }
0x1a89   :  { %v4386_v40 = vpop.eup %4385 }
0x1a8a   :  { %3877 = vmatmul.mubr.msk.f32.vlgmr.msra.gmra.mxu1 %vm437_vm3, %v4386_v40  ;;  %v3537_v40 = vld [vmem:[#allocation25 + $0x110] sm:$0xff] }
0x1a8b   :  { %3579 = vmatpush1.msra.mxu1 %v3533_v39  ;;  %v3538_v39 = vld [vmem:[#allocation25 + $0x118] sm:$0xff] }
0x1a8c   :  { %3580 = vmatprep.subr.mxu1 %v3532_v41  ;;  %v3536_v41 = vld [vmem:[#allocation25 + $0x108] sm:$0xff] }
0x1a8d   :  { %3581 = vmatpush1.msra.mxu1 %v3531_v42  ;;  %v3535_v42 = vld [vmem:[#allocation25 + $0x100] sm:$0xff] }
0x1a8e   :  { %3582 = vmatprep.subr.mxu1 %v3530_v43  ;;  %v3682_v43 = vld [vmem:[#allocation27 + $0xf8] sm:$0xff] }
0x1a8f   :  { %3583 = vmatpush1.msra.mxu1 %v3529_v53  ;;  %v3681_v53 = vld [vmem:[#allocation27 + $0xf0] sm:$0xff]  ;;  %3726 = vmatprep.subr.mxu0 %v3682_v43 }
0x1a90   :  { %3584 = vmatprep.subr.mxu1 %v3528_v44  ;;  %v3680_v44 = vld [vmem:[#allocation27 + $0xe8] sm:$0xff]  ;;  %3727 = vmatpush1.msra.mxu0 %v3681_v53 }
0x1a91   :  { %3585 = vmatpush1.msra.mxu1 %v3527_v51  ;;  %v3679_v51 = vld [vmem:[#allocation27 + $0xe0] sm:$0xff]  ;;  %3728 = vmatprep.subr.mxu0 %v3680_v44 }
0x1a92   :  { %3586 = vmatprep.subr.mxu1 %v3526_v52  ;;  %v3678_v52 = vld [vmem:[#allocation27 + $0xd8] sm:$0xff]  ;;  %3729 = vmatpush1.msra.mxu0 %v3679_v51 }
0x1a93   :  { %3587 = vmatpush1.msra.mxu1 %v3525_v45  ;;  %v3677_v45 = vld [vmem:[#allocation27 + $0xd0] sm:$0xff]  ;;  %3730 = vmatprep.subr.mxu0 %v3678_v52 }
0x1a94   :  { %3588 = vmatprep.subr.mxu1 %v3524_v46  ;;  %v3676_v46 = vld [vmem:[#allocation27 + $0xc8] sm:$0xff]  ;;  %3731 = vmatpush1.msra.mxu0 %v3677_v45  ;;  %v3690_v45 = vld [vmem:[#allocation27 + $0x138] sm:$0xff] }
0x1a95   :  { %3589 = vmatpush1.msra.mxu1 %v3523_v47  ;;  %v3675_v47 = vld [vmem:[#allocation27 + $0xc0] sm:$0xff]  ;;  %3732 = vmatprep.subr.mxu0 %v3676_v46  ;;  %v3689_v46 = vld [vmem:[#allocation27 + $0x130] sm:$0xff] }
0x1a96   :  { %3590 = vmatprep.subr.mxu1 %v3522_v48  ;;  %v3674_v48 = vld [vmem:[#allocation27 + $0xb8] sm:$0xff]  ;;  %3733 = vmatpush1.msra.mxu0 %v3675_v47  ;;  %v3688_v47 = vld [vmem:[#allocation27 + $0x128] sm:$0xff] }
0x1a97   :  { %3591 = vmatpush1.msra.mxu1 %v3521_v49  ;;  %v3673_v49 = vld [vmem:[#allocation27 + $0xb0] sm:$0xff]  ;;  %3734 = vmatprep.subr.mxu0 %v3674_v48  ;;  %v3687_v48 = vld [vmem:[#allocation27 + $0x120] sm:$0xff] }
0x1a98   :  { %3592 = vmatprep.subr.mxu1 %v3520_v50  ;;  %v3672_v50 = vld [vmem:[#allocation27 + $0xa8] sm:$0xff]  ;;  %3735 = vmatpush1.msra.mxu0 %v3673_v49  ;;  %v3686_v49 = vld [vmem:[#allocation27 + $0x118] sm:$0xff] }
0x1a99   :  { %3593 = vmatpush1.msra.mxu1 %v3519_v54  ;;  %v3671_v54 = vld [vmem:[#allocation27 + $0xa0] sm:$0xff]  ;;  %3736 = vmatprep.subr.mxu0 %v3672_v50  ;;  %v3685_v50 = vld [vmem:[#allocation27 + $0x110] sm:$0xff] }
0x1a9a   :  { %3594 = vmatprep.subr.mxu1 %v3518_v58  ;;  %v3670_v58 = vld [vmem:[#allocation27 + $0x98] sm:$0xff]  ;;  %3737 = vmatpush1.msra.mxu0 %v3671_v54  ;;  %v3684_v54 = vld [vmem:[#allocation27 + $0x108] sm:$0xff] }
0x1a9b   :  { %3595 = vmatpush1.msra.mxu1 %v3517_v60  ;;  %v3669_v60 = vld [vmem:[#allocation27 + $0x90] sm:$0xff]  ;;  %3738 = vmatprep.subr.mxu0 %v3670_v58  ;;  %v3683_v58 = vld [vmem:[#allocation27 + $0x100] sm:$0xff] }
0x1a9c   :  { %3596 = vmatprep.subr.mxu1 %v3516_v63  ;;  %v3668_v63 = vld [vmem:[#allocation27 + $0x88] sm:$0xff]  ;;  %3739 = vmatpush1.msra.mxu0 %v3669_v60  ;;  %v2074_v60 = vld [vmem:[#allocation18 + $0x14] ss:$8 sm:$0x3] }
0x1a9d   :  { %3597 = vmatpush1.msra.mxu1 %v3515_v0  ;;  %v3667_v0 = vld [vmem:[#allocation27 + $0x80] sm:$0xff]  ;;  %3740 = vmatprep.subr.mxu0 %v3668_v63  ;;  %v3571_v63 = vrot.slane %v2074_v60, %v5108_v5 }
0x1a9e   :  { %3598 = vmatprep.subr.mxu1 %v3514_v57  ;;  %v3666_v57 = vld [vmem:[#allocation27 + $0x78] sm:$0xff]  ;;  %3741 = vmatpush1.msra.mxu0 %v3667_v0  ;;  %v3575_v0 = vrot.slane %v2074_v60, %v5112_v18 }
0x1a9f   :  { %3599 = vmatpush1.msra.mxu1 %v3513_v13  ;;  %v3665_v13 = vld [vmem:[#allocation27 + $0x70] sm:$0xff]  ;;  %3742 = vmatprep.subr.mxu0 %v3666_v57 }
0x1aa0   :  { %3600 = vmatprep.subr.mxu1 %v3512_v59  ;;  %v3664_v59 = vld [vmem:[#allocation27 + $0x68] sm:$0xff]  ;;  %3743 = vmatpush1.msra.mxu0 %v3665_v13 }
0x1aa1   :  { %3601 = vmatpush1.msra.mxu1 %v3511_v61  ;;  %v3663_v61 = vld [vmem:[#allocation27 + $0x60] sm:$0xff]  ;;  %3744 = vmatprep.subr.mxu0 %v3664_v59 }
0x1aa2   :  { %3602 = vmatprep.subr.mxu1 %v3510_v1  ;;  %v3662_v1 = vld [vmem:[#allocation27 + $0x58] sm:$0xff]  ;;  %3745 = vmatpush1.msra.mxu0 %v3663_v61 }
0x1aa3   :  { %3603 = vmatpush1.msra.mxu1 %v3509_v2  ;;  %v3661_v2 = vld [vmem:[#allocation27 + $0x50] sm:$0xff]  ;;  %3746 = vmatprep.subr.mxu0 %v3662_v1 }
0x1aa4   :  { %3604 = vmatprep.subr.mxu1 %v3508_v62  ;;  %v3660_v62 = vld [vmem:[#allocation27 + $0x48] sm:$0xff]  ;;  %3747 = vmatpush1.msra.mxu0 %v3661_v2 }
0x1aa5   :  { %3605 = vmatpush1.msra.mxu1 %v3507_v3  ;;  %v3659_v3 = vld [vmem:[#allocation27 + $0x40] sm:$0xff]  ;;  %3748 = vmatprep.subr.mxu0 %v3660_v62  ;;  %v3807_v62 = vld [vmem:[%s5739_s17] sm:$0x3] }
0x1aa6   :  { %3606 = vmatprep.subr.mxu1 %v3506_v4  ;;  %v3658_v4 = vld [vmem:[#allocation27 + $0x38] sm:$0xff]  ;;  %3749 = vmatpush1.msra.mxu0 %v3659_v3 }
0x1aa7   :  { %3607 = vmatpush1.msra.mxu1 %v3505_v6  ;;  %v3657_v6 = vld [vmem:[#allocation27 + $0x30] sm:$0xff]  ;;  %3750 = vmatprep.subr.mxu0 %v3658_v4  ;;  %v3808_v3 = vld [vmem:[#allocation16] sm:$0x3] }
0x1aa8   :  { %3608 = vmatprep.subr.mxu1 %v3504_v7  ;;  %v3656_v7 = vld [vmem:[#allocation27 + $0x28] sm:$0xff]  ;;  %3751 = vmatpush1.msra.mxu0 %v3657_v6  ;;  %v3809_v4 = vmul.f32 %v3808_v3, %v3807_v62 }
0x1aa9   :  { %3609 = vmatpush1.msra.mxu1 %v3503_v8  ;;  %v3655_v8 = vld [vmem:[#allocation27 + $0x20] sm:$0xff]  ;;  %3752 = vmatprep.subr.mxu0 %v3656_v7  ;;  %v329_v7 = vld [vmem:[#allocation4 + $0x15] ss:$8 sm:$0x3] }
0x1aaa   :  { %3610 = vmatprep.subr.mxu1 %v3566_v9  ;;  %v3654_v9 = vld [vmem:[#allocation27 + $0x18] sm:$0xff]  ;;  %3753 = vmatpush1.msra.mxu0 %v3655_v8  ;;  %v3811_v6 = vsel %vm3810_vm10, %v3809_v4, 0.0 }
0x1aab   :  { %3611 = vmatpush2.msra.mxu1 %v3565_v10  ;;  %v3653_v10 = vld [vmem:[#allocation27 + $0x10] sm:$0xff]  ;;  %3754 = vmatprep.subr.mxu0 %v3654_v9  ;;  %v1980_v9 = vrot.slane %v329_v7, %v5108_v5 }
0x1aac   :  { %3612 = vmatprep.subr.mxu1 %v3564_v14  ;;  %v3652_v14 = vld [vmem:[#allocation27 + $0x8] sm:$0xff]  ;;  %3755 = vmatpush1.msra.mxu0 %v3653_v10  ;;  %v2076_v8 = vld [vmem:[#allocation18 + $0x15] ss:$8 sm:$0x3]  ;;  %v1984_v10 = vrot.slane %v329_v7, %v5112_v18 }
0x1aad   :  { %3613 = vmatpush2.msra.mxu1 %v3563_v15  ;;  %v3651_v15 = vld [vmem:[#allocation27] sm:$0xff]  ;;  %3756 = vmatprep.subr.mxu0 %v3652_v14  ;;  %v3719_v14 = vrot.slane %v2076_v8, %v5108_v5 }
0x1aae   :  { %3614 = vmatprep.subr.mxu1 %v3562_v16  ;;  %v3714_v16 = vld [vmem:[#allocation27 + $0x1f8] sm:$0xff]  ;;  %3757 = vmatpush1.msra.mxu0 %v3651_v15  ;;  %v2054_v15 = vadd.f32 %v5481_v55, %v1980_v9 }
0x1aaf   :  { %3615 = vmatpush2.msra.mxu1 %v3561_v17  ;;  %v3713_v17 = vld [vmem:[#allocation27 + $0x1f0] sm:$0xff]  ;;  %3758 = vmatprep.subr.mxu0 %v3714_v16  ;;  %v3723_v16 = vrot.slane %v2076_v8, %v5112_v18 }
0x1ab0   :  { %3616 = vmatprep.subr.mxu1 %v3560_v19  ;;  %v3712_v19 = vld [vmem:[#allocation27 + $0x1e8] sm:$0xff]  ;;  %3759 = vmatpush2.msra.mxu0 %v3713_v17 }
0x1ab1   :  { %3617 = vmatpush2.msra.mxu1 %v3559_v12  ;;  %v3711_v12 = vld [vmem:[#allocation27 + $0x1e0] sm:$0xff]  ;;  %3760 = vmatprep.subr.mxu0 %v3712_v19  ;;  %v2056_v19 = vadd.f32 %v5483_v56, %v1984_v10 }
0x1ab2   :  { %3618 = vmatprep.subr.mxu1 %v3558_v20  ;;  %v3710_v20 = vld [vmem:[#allocation27 + $0x1d8] sm:$0xff]  ;;  %3761 = vmatpush2.msra.mxu0 %v3711_v12 }
0x1ab3   :  { %3619 = vmatpush2.msra.mxu1 %v3557_v21  ;;  %v3709_v21 = vld [vmem:[#allocation27 + $0x1d0] sm:$0xff]  ;;  %3762 = vmatprep.subr.mxu0 %v3710_v20 }
0x1ab4   :  { %3620 = vmatprep.subr.mxu1 %v3556_v22  ;;  %v3708_v22 = vld [vmem:[#allocation27 + $0x1c8] sm:$0xff]  ;;  %3763 = vmatpush2.msra.mxu0 %v3709_v21  ;;  %v2058_v21 = vmax.f32 %v2054_v15, 0.0 }
0x1ab5   :  { %3621 = vmatpush2.msra.mxu1 %v3555_v23  ;;  %v3707_v23 = vld [vmem:[#allocation27 + $0x1c0] sm:$0xff]  ;;  %3764 = vmatprep.subr.mxu0 %v3708_v22 }
0x1ab6   :  { %3622 = vmatprep.subr.mxu1 %v3554_v24  ;;  %v3706_v24 = vld [vmem:[#allocation27 + $0x1b8] sm:$0xff]  ;;  %3765 = vmatpush2.msra.mxu0 %v3707_v23 }
0x1ab7   :  { %3623 = vmatpush2.msra.mxu1 %v3553_v25  ;;  %v3705_v25 = vld [vmem:[#allocation27 + $0x1b0] sm:$0xff]  ;;  %3766 = vmatprep.subr.mxu0 %v3706_v24  ;;  %v2059_v24 = vmax.f32 %v2056_v19, 0.0 }
0x1ab8   :  { %3624 = vmatprep.subr.mxu1 %v3552_v26  ;;  %v3704_v26 = vld [vmem:[#allocation27 + $0x1a8] sm:$0xff]  ;;  %3767 = vmatpush2.msra.mxu0 %v3705_v25 }
0x1ab9   :  { %3625 = vmatpush2.msra.mxu1 %v3551_v27  ;;  %v3703_v27 = vld [vmem:[#allocation27 + $0x1a0] sm:$0xff]  ;;  %3768 = vmatprep.subr.mxu0 %v3704_v26 }
0x1aba   :  { %3626 = vmatprep.subr.mxu1 %v3550_v28  ;;  %v3702_v28 = vld [vmem:[#allocation27 + $0x198] sm:$0xff]  ;;  %3769 = vmatpush2.msra.mxu0 %v3703_v27 }
0x1abb   :  { %3627 = vmatpush2.msra.mxu1 %v3549_v29  ;;  %v3701_v29 = vld [vmem:[#allocation27 + $0x190] sm:$0xff]  ;;  %3770 = vmatprep.subr.mxu0 %v3702_v28 }
0x1abc   :  { %3628 = vmatprep.subr.mxu1 %v3548_v30  ;;  %v3700_v30 = vld [vmem:[#allocation27 + $0x188] sm:$0xff]  ;;  %3771 = vmatpush2.msra.mxu0 %v3701_v29 }
0x1abd   :  { %3629 = vmatpush2.msra.mxu1 %v3547_v11  ;;  %v3699_v11 = vld [vmem:[#allocation27 + $0x180] sm:$0xff]  ;;  %3772 = vmatprep.subr.mxu0 %v3700_v30 }
0x1abe   :  { %3630 = vmatprep.subr.mxu1 %v3546_v31  ;;  %v3698_v31 = vld [vmem:[#allocation27 + $0x178] sm:$0xff]  ;;  %3773 = vmatpush2.msra.mxu0 %v3699_v11 }
0x1abf   :  { %3631 = vmatpush2.msra.mxu1 %v3545_v32  ;;  %v3697_v32 = vld [vmem:[#allocation27 + $0x170] sm:$0xff]  ;;  %3774 = vmatprep.subr.mxu0 %v3698_v31 }
0x1ac0   :  { %3632 = vmatprep.subr.mxu1 %v3544_v33  ;;  %v3696_v33 = vld [vmem:[#allocation27 + $0x168] sm:$0xff]  ;;  %3775 = vmatpush2.msra.mxu0 %v3697_v32 }
0x1ac1   :  { %3633 = vmatpush2.msra.mxu1 %v3543_v34  ;;  %v3695_v34 = vld [vmem:[#allocation27 + $0x160] sm:$0xff]  ;;  %3776 = vmatprep.subr.mxu0 %v3696_v33 }
0x1ac2   :  { %3634 = vmatprep.subr.mxu1 %v3542_v35  ;;  %v3694_v35 = vld [vmem:[#allocation27 + $0x158] sm:$0xff]  ;;  %3777 = vmatpush2.msra.mxu0 %v3695_v34 }
0x1ac3   :  { %3635 = vmatpush2.msra.mxu1 %v3541_v36  ;;  %v3693_v36 = vld [vmem:[#allocation27 + $0x150] sm:$0xff]  ;;  %3778 = vmatprep.subr.mxu0 %v3694_v35 }
0x1ac4   :  { %3636 = vmatprep.subr.mxu1 %v3540_v37  ;;  %v3692_v37 = vld [vmem:[#allocation27 + $0x148] sm:$0xff]  ;;  %3779 = vmatpush2.msra.mxu0 %v3693_v36 }
0x1ac5   :  { %3637 = vmatpush2.msra.mxu1 %v3539_v38  ;;  %v3691_v38 = vld [vmem:[#allocation27 + $0x140] sm:$0xff]  ;;  %3780 = vmatprep.subr.mxu0 %v3692_v37 }
0x1ac6   :  { %3638 = vmatprep.subr.mxu1 %v3538_v39  ;;  %3781 = vmatpush2.msra.mxu0 %v3691_v38  ;;  %v2072_v39 = vld [vmem:[#allocation18 + $0x13] ss:$8 sm:$0x3] }
0x1ac7   :  { %3639 = vmatpush2.msra.mxu1 %v3537_v40  ;;  %v3420_v40 = vrot.slane %v2072_v39, %v5108_v5  ;;  %3782 = vmatprep.subr.mxu0 %v3690_v45 }
0x1ac8   :  { %3640 = vmatprep.subr.mxu1 %v3536_v41  ;;  %v3424_v41 = vrot.slane %v2072_v39, %v5112_v18  ;;  %3783 = vmatpush2.msra.mxu0 %v3689_v46 }
0x1ac9   :  { %3641 = vmatpush2.msra.mxu1 %v3535_v42  ;;  %3784 = vmatprep.subr.mxu0 %v3688_v47 }
0x1aca   :  { %3785 = vmatpush2.msra.mxu0 %v3687_v48  ;;  %3812 = vadd.xlane.f32.xlu0 %v3811_v6 }
0x1acb   :  { %3786 = vmatprep.subr.mxu0 %v3686_v49 }
0x1acc   :  { %3787 = vmatpush2.msra.mxu0 %v3685_v50 }
0x1acd   :  { %3788 = vmatprep.subr.mxu0 %v3684_v54 }
0x1ace   :  { %3789 = vmatpush2.msra.mxu0 %v3683_v58 }
0x1b4a   :  { %v3496_v42 = vpop.f32.mrf.mxu1 }
0x1b4b   :  { %v3497_v43 = vadd.f32 %v3496_v42, %v3420_v40 }
0x1b4c   :  { %v3498_v53 = vpop.f32.mrf.mxu1 }
0x1b4d   :  { %v3499_v44 = vadd.f32 %v3498_v53, %v3424_v41  ;;  %v3501_v52 = vmax.f32 %v3497_v43, 0.0 }
0x1b4f   :  { %v3502_v51 = vmax.f32 %v3499_v44, 0.0 }
0x1b51   :  { %3642 = vmatprep.mubr.f32.mxu1 %v3502_v51 }
0x1b52   :  { %3643 = vmatmul.mubr.f32.vlgmr.msra.gmra.mxu1 %v3501_v52 }
0x1b53   :  { %v3813_v55 = vpop.xlane.xlu0 %3812 }
0x1c12   :  { %v3644_v57 = vpop.f32.mrf.mxu1 }
0x1c13   :  { %v3645_v13 = vadd.f32 %v3644_v57, %v3571_v63 }
0x1c14   :  { %v3646_v59 = vpop.f32.mrf.mxu1 }
0x1c15   :  { %v3647_v61 = vadd.f32 %v3646_v59, %v3575_v0  ;;  %v3649_v2 = vmax.f32 %v3645_v13, 0.0 }
0x1c17   :  { %v3650_v1 = vmax.f32 %v3647_v61, 0.0 }
0x1c19   :  { %3790 = vmatprep.mubr.f32.mxu0 %v3650_v1 }
0x1c1a   :  { %3791 = vmatmul.mubr.f32.vlgmr.msra.gmra.mxu0 %v3649_v2 }
0x1cda   :  { %v3792_v17 = vpop.f32.mrf.mxu0 }
0x1cdb   :  { %v3793_v12 = vadd.f32 %v3792_v17, %v3719_v14 }
0x1cdc   :  { %v3794_v20 = vpop.f32.mrf.mxu0 }
0x1cdd   :  { %v3797_v22 = vmax.f32 %v3793_v12, 0.0  ;;  %v3795_v23 = vadd.f32 %v3794_v20, %v3723_v16 }
0x1cdf   :  { %v3799_v25 = vmul.f32 %v3797_v22, %v2058_v21  ;;  %v3798_v26 = vmax.f32 %v3795_v23, 0.0 }
0x1ce1   :  { %v3800_v27 = vmul.f32 %v3798_v26, %v2059_v24  ;;  %v3802_v28 = vsel %vm3801_vm11, %v3799_v25, 0.0 }
0x1ce3   :  { %v3803_v29 = vsel %vm3801_vm11, %v3800_v27, 0.0 }
0x1ce4   :  { %v3804_v5 = vadd.f32 %v3803_v29, %v3802_v28 }
0x1ce6   :  { %3805 = vadd.xlane.f32.xlu1 %v3804_v5 }
0x1d6f   :  { %v3806_v30 = vpop.xlane.xlu1 %3805 }
0x1d70   :  { %v3814_v18 = vadd.f32 %v3813_v55, %v3806_v30 }
0x1d72   :  { %3816 = vst.msk [vmem:[%s5706_s28] sm:$0x3] %vm3815_vm12, %v3814_v18 }
0x1d73   :  { %3821 = vsyncpa [#allocation3], 1 }
0x1d74   :  { %3822 = vsyncpa [#allocation5], 1 }
0x1d75   :  { %3823 = vsyncpa [#allocation8], 1 }
0x1d76   :  { %3824 = vsyncpa [#allocation11], 1 }
0x1d77   :  { %3825 = vsyncpa [#allocation14], 1 }
0x1d78   :  { %3826 = vsyncpa [#allocation17], 1 }
0x1d79   :  { %3827 = vsyncpa [#allocation20], 1 }
0x1d7a   :  { %3828 = vsyncpa [#allocation23], 1 }
0x1d7b   :  { %3829 = vsyncpa [#allocation26], 1 }

</bundles_post_ra>
